<compile_context>
chip_gen: v5e
topology: v5e:2x2
jax: 0.10.0
libtpu: 0.0.40
codegen_flags: <defaults>
</compile_context>

<pallas_src>
import math

import jax
import jax.numpy as jnp
from jax.experimental import pallas as pl


# ---------------------------------------------------------------------------
# Host-side packer: stack small 2-D f32 matrices into one lane-dense canvas.
# ---------------------------------------------------------------------------
def _pack_canvas(named_mats):
    """Stack small 2-D f32 matrices vertically into one (rows, W) canvas.

    Each entry is padded to a multiple of 8 rows (sublane tile) so every
    in-kernel slice starts on a sublane boundary.  Returns (canvas, offsets)
    where offsets[name] = (row_start, rows, cols) are static Python ints.
    """
    width = max(int(m.shape[1]) for _, m in named_mats)
    width = ((width + 127) // 128) * 128
    offs = {}
    blocks = []
    r = 0
    for name, m in named_mats:
        m = jnp.asarray(m, jnp.float32)
        h, w = int(m.shape[0]), int(m.shape[1])
        hp = ((h + 7) // 8) * 8
        blk = jnp.zeros((hp, width), jnp.float32).at[:h, :w].set(m)
        blocks.append(blk)
        offs[name] = (r, h, w)
        r += hp
    return jnp.concatenate(blocks, axis=0), offs


# ---------------------------------------------------------------------------
# Fused kernel: whole forward pass, everything resident in VMEM / vregs.
# ---------------------------------------------------------------------------
def _make_fused_kernel(b, P, S, H, na, OF, MF, LI, offs):
    PB = P * b

    def kernel(xb_ref, rows_ref, state_ref, wg_ref, w1_ref, w2_ref,
               bigb_ref, sw_ref, total_ref, final_ref):
        bf16 = jnp.bfloat16

        def dot(a, w):
            return jnp.dot(a, w, preferred_element_type=jnp.float32)

        def relu(x):
            return jnp.maximum(x, 0.0)

        def sigmoid(x):
            return 1.0 / (1.0 + jnp.exp(-x))

        def sw(name):
            r0, h, w = offs[name]            # static Python ints
            return sw_ref[r0:r0 + h, 0:w]

        # wide biases: lane-aligned static slices of one slab
        bg = bigb_ref[:, 0:LI]
        b1 = bigb_ref[:, LI:LI + 1024]
        b2 = bigb_ref[:, LI + 1024:LI + 1280]

        # ---- board branch: GraphConv + BN(eval) + ReLU folded into one bf16
        #      MXU matmul, then the 3-layer board MLP head (f32 accumulation) --
        bf_a = relu(dot(xb_ref[...], wg_ref[...]) + bg)            # (R, L*inter)
        bf_a = relu(dot(bf_a.astype(bf16), w1_ref[...]) + b1)      # (R, 1024)
        bf_a = relu(dot(bf_a.astype(bf16), w2_ref[...]) + b2)      # (R, 256)
        bf_a = relu(dot(bf_a, sw("fcb3_w")) + sw("fcb3_b"))        # (R, board_out)

        # ---- order / message branches ----
        xo = rows_ref[:, 0:OF]
        xm = rows_ref[:, OF:OF + MF]
        of = relu(dot(xo, sw("fco1_w")) + sw("fco1_b"))
        of = relu(dot(of, sw("fco2_w")) + sw("fco2_b"))
        mf = relu(dot(xm, sw("fcm1_w")) + sw("fcm1_b"))
        mf = relu(dot(mf, sw("fcm2_w")) + sw("fcm2_b"))

        # ---- LSTM input-gate term for every (step, past, batch) row at once;
        #      w_ih pre-split by branch so no feature concat is needed.
        g_in = (dot(bf_a, sw("wih_b")) + dot(of, sw("wih_o"))
                + dot(mf, sw("wih_m")) + sw("lstm_b"))             # (R, 4H)

        whh = sw("whh")                                            # (H, 4H)
        other = state_ref[:, 0:na]
        me = state_ref[:, na:2 * na]
        h = state_ref[:, 2 * na:2 * na + H]
        c = state_ref[:, 2 * na + H:2 * na + 2 * H]
        h_sum = jnp.zeros_like(h)
        for s in range(S):                                         # static unroll
            gates = g_in[s * PB:(s + 1) * PB, :] + dot(h, whh)     # (PB, 4H) i,f,g,o
            sg = sigmoid(gates)     # whole 128-lane tile -> EUP, no lane masking
            tg = jnp.tanh(gates)
            i_g = sg[:, 0:H]
            f_g = sg[:, H:2 * H]
            g_g = tg[:, 2 * H:3 * H]
            o_g = sg[:, 3 * H:4 * H]
            c = f_g * c + i_g * g_g
            h = o_g * jnp.tanh(c)
            h_sum = h_sum + h

        # ---- character head: fc1 weights pre-split (hidden | other | me) so
        #      cat([h_sum, other, me]) never materializes ----
        q = relu(dot(h_sum, sw("fc1_wh")) + dot(other, sw("fc1_wo"))
                 + dot(me, sw("fc1_wm")) + sw("fc1_b"))
        e = dot(q, sw("fc2_w")) + sw("fc2_b")                      # (PB, char_out)
        total_ref[...] = e

        # final_e_char = sum over past, computed in-kernel (2nd output)
        fin = e[0:b, :]
        for p in range(1, P):
            fin = fin + e[p * b:(p + 1) * b, :]
        final_ref[...] = fin

    return kernel


# ---------------------------------------------------------------------------
# Forward pass: host-side weight refactoring + ONE grid-less pallas_call.
# ---------------------------------------------------------------------------
def gcn_charnet_forward(params, board, order, message, other_ind, me_ind,
                        h0_all, c0_all):
    b, P, S, L, Fb = board.shape
    OF = order.shape[-1]
    MF = message.shape[-1]
    na = other_ind.shape[-1]
    inter = params["gc_W"].shape[-1]
    hidden = params["lstm_whh"].shape[0]
    board_out = params["fcb3_w"].shape[-1]
    order_out = params["fco2_w"].shape[-1]
    char_out = params["fc2_w"].shape[-1]
    LI = L * inter
    R = S * P * b                 # rows ordered (step, past, batch)
    PB = P * b

    # Fold GraphConv per-location weight, adjacency A and eval-mode BatchNorm
    # (per-location running stats + affine) into one dense matrix + bias:
    #   y[n, l*inter+o] = bn_scale[l] * sum_{k,f} x[n,k*Fb+f] A[l,k] W[k,f,o]
    #                     + bn_scale[l]*gc_b[o] + bn_shift[l]
    eps = 1e-5
    bn_scale = params["bn_gamma"] / jnp.sqrt(params["bn_var"] + eps)      # (L,)
    bn_shift = params["bn_beta"] - params["bn_mean"] * bn_scale           # (L,)
    wg = jnp.einsum("lk,kfo,l->kflo", params["A"], params["gc_W"], bn_scale)
    wg = wg.reshape(L * Fb, LI)
    bg = (bn_scale[:, None] * params["gc_b"] + bn_shift[:, None]).reshape(1, LI)

    # Split LSTM input weights by branch (board | order | message); merge biases.
    wih = params["lstm_wih"]
    wih_b = wih[:board_out]
    wih_o = wih[board_out:board_out + order_out]
    wih_m = wih[board_out + order_out:]
    lstm_b = params["lstm_bih"] + params["lstm_bhh"]                      # (1, 4H)

    # Split fc1 weight rows to match cat([h_sum, other_ind, me_ind], -1).
    fc1w = params["fc1_w"]
    fc1_wh = fc1w[:hidden]
    fc1_wo = fc1w[hidden:hidden + na]
    fc1_wm = fc1w[hidden + na:]

    # Pack ALL small weights + narrow biases into ONE canvas (one DMA).
    canvas, offs = _pack_canvas([
        ("fcb3_w", params["fcb3_w"]), ("fcb3_b", params["fcb3_b"]),
        ("fco1_w", params["fco1_w"]), ("fco1_b", params["fco1_b"]),
        ("fco2_w", params["fco2_w"]), ("fco2_b", params["fco2_b"]),
        ("fcm1_w", params["fcm1_w"]), ("fcm1_b", params["fcm1_b"]),
        ("fcm2_w", params["fcm2_w"]), ("fcm2_b", params["fcm2_b"]),
        ("wih_b", wih_b), ("wih_o", wih_o), ("wih_m", wih_m),
        ("whh", params["lstm_whh"]), ("lstm_b", lstm_b),
        ("fc1_wh", fc1_wh), ("fc1_wo", fc1_wo), ("fc1_wm", fc1_wm),
        ("fc1_b", params["fc1_b"]),
        ("fc2_w", params["fc2_w"]), ("fc2_b", params["fc2_b"]),
    ])
    # Wide biases (>128 lanes) in one lane-aligned slab: [bg | fcb1_b | fcb2_b].
    big_bias = jnp.concatenate([bg, params["fcb1_b"], params["fcb2_b"]], axis=-1)

    # Big weights (and the board activations feeding them) in bf16;
    # accumulation stays f32 inside the kernel.
    wg_bf = wg.astype(jnp.bfloat16)
    w1_bf = params["fcb1_w"].astype(jnp.bfloat16)
    w2_bf = params["fcb2_w"].astype(jnp.bfloat16)

    # Re-layout inputs: rows ordered (step, past, batch) so every LSTM step
    # reads one contiguous block of P*b rows; per-row side inputs packed.
    xb = jnp.transpose(board, (2, 1, 0, 3, 4)).reshape(R, L * Fb)
    xb = xb.astype(jnp.bfloat16)
    rows = jnp.concatenate(
        [jnp.transpose(order, (2, 1, 0, 3)).reshape(R, OF),
         jnp.transpose(message, (2, 1, 0, 3)).reshape(R, MF)], axis=-1)
    state = jnp.concatenate(
        [jnp.transpose(other_ind, (1, 0, 2)).reshape(PB, na),
         jnp.transpose(me_ind, (1, 0, 2)).reshape(PB, na),
         h0_all.reshape(PB, hidden),
         c0_all.reshape(PB, hidden)], axis=-1)

    total_rows, final_e_char = pl.pallas_call(
        _make_fused_kernel(b, P, S, hidden, na, OF, MF, LI, offs),
        out_shape=(jax.ShapeDtypeStruct((PB, char_out), jnp.float32),
                   jax.ShapeDtypeStruct((b, char_out), jnp.float32)),
    )(xb, rows, state, wg_bf, w1_bf, w2_bf, big_bias, canvas)

    e_char_total = total_rows.reshape(P, b, char_out)
    return final_e_char, e_char_total


# ---------------------------------------------------------------------------
# Pure-JAX reference (un-fused, original formulation) for correctness checking.
# ---------------------------------------------------------------------------
def _reference_forward(params, board, order, message, other_ind, me_ind,
                       h0_all, c0_all):
    b, P, S, L, Fb = board.shape
    inter = params["gc_W"].shape[-1]
    H = params["lstm_whh"].shape[0]
    eps = 1e-5
    scale = params["bn_gamma"] / jnp.sqrt(params["bn_var"] + eps)
    shift = params["bn_beta"] - params["bn_mean"] * scale
    outs = []
    for p in range(P):
        x = board[:, p].reshape(b * S, L, Fb)
        t = jnp.einsum("nlf,lfo->nlo", x, params["gc_W"])
        y = jnp.einsum("kl,nlo->nko", params["A"], t) + params["gc_b"]
        y = y * scale[None, :, None] + shift[None, :, None]          # BN (eval)
        y = jnp.maximum(y, 0.0)
        bf = y.reshape(b * S, L * inter)
        bf = jnp.maximum(bf @ params["fcb1_w"] + params["fcb1_b"], 0.0)
        bf = jnp.maximum(bf @ params["fcb2_w"] + params["fcb2_b"], 0.0)
        bf = jnp.maximum(bf @ params["fcb3_w"] + params["fcb3_b"], 0.0)
        of = order[:, p].reshape(b * S, -1)
        of = jnp.maximum(of @ params["fco1_w"] + params["fco1_b"], 0.0)
        of = jnp.maximum(of @ params["fco2_w"] + params["fco2_b"], 0.0)
        mf = message[:, p].reshape(b * S, -1)
        mf = jnp.maximum(mf @ params["fcm1_w"] + params["fcm1_b"], 0.0)
        mf = jnp.maximum(mf @ params["fcm2_w"] + params["fcm2_b"], 0.0)
        feat = jnp.concatenate([bf, of, mf], axis=-1).reshape(b, S, H)
        h, c = h0_all[p], c0_all[p]
        h_sum = jnp.zeros_like(h)
        for s in range(S):
            g = (feat[:, s] @ params["lstm_wih"] + h @ params["lstm_whh"]
                 + params["lstm_bih"] + params["lstm_bhh"])
            i_g = jax.nn.sigmoid(g[:, :H])
            f_g = jax.nn.sigmoid(g[:, H:2 * H])
            g_g = jnp.tanh(g[:, 2 * H:3 * H])
            o_g = jax.nn.sigmoid(g[:, 3 * H:])
            c = f_g * c + i_g * g_g
            h = o_g * jnp.tanh(c)
            h_sum = h_sum + h
        q = jnp.concatenate([h_sum, other_ind[:, p], me_ind[:, p]], axis=-1)
        e = jnp.maximum(q @ params["fc1_w"] + params["fc1_b"], 0.0)
        e = e @ params["fc2_w"] + params["fc2_b"]
        outs.append(e)
    total = jnp.stack(outs, axis=0)
    return jnp.sum(total, axis=0), total


# ---------------------------------------------------------------------------
# main: deterministic parameters + inputs, run once
# ---------------------------------------------------------------------------
if __name__ == "__main__":
    key = jax.random.PRNGKey(0)
    ks = iter(jax.random.split(key, 64))

    # small configs consistent with the module's forward
    B, P, S, L = 2, 2, 4, 16          # batch, num_past, num_step, num_loc
    board_feat, order_feat, msg_feat = 8, 8, 8
    inter = 32                        # inter_emb_size (fixed in module)
    board_out, order_out, msg_out = 16, 8, 8
    hidden = board_out + order_out + msg_out   # 32 == LSTM hidden size
    num_agent, char_out = 4, 16

    def rnd(shape, scale=1.0):
        return (jax.random.normal(next(ks), shape) * scale).astype(jnp.float32)

    def lin(in_dim, out_dim):
        s = 1.0 / math.sqrt(in_dim)
        return rnd((in_dim, out_dim), s), rnd((1, out_dim), s)

    params = {}
    params["A"] = rnd((L, L), 1.0 / L)                     # fixed adjacency
    params["gc_W"] = rnd((L, board_feat, inter), math.sqrt(2.0 / board_feat))
    params["gc_b"] = rnd((1, inter), 0.1)
    # BatchNorm1d(num_loc) eval-mode running stats + affine (non-trivial)
    params["bn_gamma"] = (1.0 + rnd((L,), 0.1))
    params["bn_beta"] = rnd((L,), 0.1)
    params["bn_mean"] = rnd((L,), 0.1)
    params["bn_var"] = (0.8 + jnp.abs(rnd((L,), 0.2)))
    params["fcb1_w"], params["fcb1_b"] = lin(L * inter, 1024)
    params["fcb2_w"], params["fcb2_b"] = lin(1024, 256)
    params["fcb3_w"], params["fcb3_b"] = lin(256, board_out)
    params["fco1_w"], params["fco1_b"] = lin(order_feat, 128)
    params["fco2_w"], params["fco2_b"] = lin(128, order_out)
    params["fcm1_w"], params["fcm1_b"] = lin(2 * msg_feat, 64)
    params["fcm2_w"], params["fcm2_b"] = lin(64, msg_out)
    s = 1.0 / math.sqrt(hidden)
    params["lstm_wih"] = rnd((hidden, 4 * hidden), s)      # (in, 4H), gates i,f,g,o
    params["lstm_whh"] = rnd((hidden, 4 * hidden), s)
    params["lstm_bih"] = rnd((1, 4 * hidden), s)
    params["lstm_bhh"] = rnd((1, 4 * hidden), s)
    params["fc1_w"], params["fc1_b"] = lin(hidden + 2 * num_agent, char_out)
    params["fc2_w"], params["fc2_b"] = lin(char_out, char_out)

    # inputs
    board = rnd((B, P, S, L, board_feat))
    order = rnd((B, P, S, order_feat))
    message = rnd((B, P, S, 2 * msg_feat))
    other_ind = rnd((B, P, num_agent))
    me_ind = rnd((B, P, num_agent))
    # init_hidden(batch) == randn per past-index (deterministic stand-in)
    h0_all = rnd((P, B, hidden))
    c0_all = rnd((P, B, hidden))

    fwd = jax.jit(gcn_charnet_forward)
    final_e_char, e_char_total = fwd(params, board, order, message,
                                     other_ind, me_ind, h0_all, c0_all)
    jax.block_until_ready(final_e_char)
    jax.block_until_ready(e_char_total)

    assert final_e_char.shape == (B, char_out)
    assert e_char_total.shape == (P, B, char_out)

    # correctness check against the un-fused pure-JAX reference (f32 throughout)
    with jax.default_matmul_precision("highest"):
        ref_final, ref_total = _reference_forward(
            params, board, order, message, other_ind, me_ind, h0_all, c0_all)
    assert bool(jnp.allclose(e_char_total, ref_total, rtol=5e-2, atol=5e-2)), \
        "Pallas kernel output does not match reference"
    assert bool(jnp.allclose(final_e_char, ref_final, rtol=5e-2, atol=5e-2)), \
        "Pallas kernel sum does not match reference"

    print("KERNEL_OK")
</pallas_src>

<mosaic_0001>
module attributes {stable_mosaic.version = 11 : i64} {
  func.func @kernel(%arg0: memref<16x128xbf16, #tpu.memory_space<vmem>>, %arg1: memref<16x24xf32, #tpu.memory_space<vmem>>, %arg2: memref<4x72xf32, #tpu.memory_space<vmem>>, %arg3: memref<128x512xbf16, #tpu.memory_space<vmem>>, %arg4: memref<512x1024xbf16, #tpu.memory_space<vmem>>, %arg5: memref<1024x256xbf16, #tpu.memory_space<vmem>>, %arg6: memref<1x1792xf32, #tpu.memory_space<vmem>>, %arg7: memref<664x128xf32, #tpu.memory_space<vmem>>, %arg8: memref<4x16xf32, #tpu.memory_space<vmem>>, %arg9: memref<2x16xf32, #tpu.memory_space<vmem>>) attributes {dimension_semantics = [], scalar_prefetch = 0 : i64, scratch_operands = 0 : i64, tpu.core_type = #tpu.core_type<tc>} {
    %c0 = arith.constant 0 : index
    %c0_0 = arith.constant 0 : index
    %0 = vector.load %arg6[%c0, %c0_0] : memref<1x1792xf32, #tpu.memory_space<vmem>>, vector<1x512xf32>
    %c0_1 = arith.constant 0 : index
    %c512 = arith.constant 512 : index
    %1 = vector.load %arg6[%c0_1, %c512] : memref<1x1792xf32, #tpu.memory_space<vmem>>, vector<1x1024xf32>
    %c0_2 = arith.constant 0 : index
    %c1536 = arith.constant 1536 : index
    %2 = vector.load %arg6[%c0_2, %c1536] : memref<1x1792xf32, #tpu.memory_space<vmem>>, vector<1x256xf32>
    %c0_3 = arith.constant 0 : index
    %c0_4 = arith.constant 0 : index
    %3 = vector.load %arg0[%c0_3, %c0_4] : memref<16x128xbf16, #tpu.memory_space<vmem>>, vector<16x128xbf16>
    %c0_5 = arith.constant 0 : index
    %c0_6 = arith.constant 0 : index
    %4 = vector.load %arg3[%c0_5, %c0_6] : memref<128x512xbf16, #tpu.memory_space<vmem>>, vector<128x512xbf16>
    %cst = arith.constant dense<0.000000e+00> : vector<16x512xf32>
    %5 = tpu.matmul %3, %4, %cst {dimension_numbers = #tpu.dot_dimension_numbers<[1], [0], [0], [1], [0, 0, 1, 1], [], []>} : vector<16x128xbf16>, vector<128x512xbf16>, vector<16x512xf32> -> vector<16x512xf32>
    %6 = vector.broadcast %0 : vector<1x512xf32> to vector<16x512xf32>
    %7 = arith.addf %5, %6 : vector<16x512xf32>
    %cst_7 = arith.constant 0.000000e+00 : f32
    %8 = vector.broadcast %cst_7 : f32 to vector<16x512xf32>
    %9 = arith.maximumf %7, %8 : vector<16x512xf32>
    %10 = arith.truncf %9 : vector<16x512xf32> to vector<16x512xbf16>
    %c0_8 = arith.constant 0 : index
    %c0_9 = arith.constant 0 : index
    %11 = vector.load %arg4[%c0_8, %c0_9] : memref<512x1024xbf16, #tpu.memory_space<vmem>>, vector<512x1024xbf16>
    %cst_10 = arith.constant dense<0.000000e+00> : vector<16x1024xf32>
    %12 = tpu.matmul %10, %11, %cst_10 {dimension_numbers = #tpu.dot_dimension_numbers<[1], [0], [0], [1], [0, 0, 1, 1], [], []>} : vector<16x512xbf16>, vector<512x1024xbf16>, vector<16x1024xf32> -> vector<16x1024xf32>
    %13 = vector.broadcast %1 : vector<1x1024xf32> to vector<16x1024xf32>
    %14 = arith.addf %12, %13 : vector<16x1024xf32>
    %cst_11 = arith.constant 0.000000e+00 : f32
    %15 = vector.broadcast %cst_11 : f32 to vector<16x1024xf32>
    %16 = arith.maximumf %14, %15 : vector<16x1024xf32>
    %17 = arith.truncf %16 : vector<16x1024xf32> to vector<16x1024xbf16>
    %c0_12 = arith.constant 0 : index
    %c0_13 = arith.constant 0 : index
    %18 = vector.load %arg5[%c0_12, %c0_13] : memref<1024x256xbf16, #tpu.memory_space<vmem>>, vector<1024x256xbf16>
    %cst_14 = arith.constant dense<0.000000e+00> : vector<16x256xf32>
    %19 = tpu.matmul %17, %18, %cst_14 {dimension_numbers = #tpu.dot_dimension_numbers<[1], [0], [0], [1], [0, 0, 1, 1], [], []>} : vector<16x1024xbf16>, vector<1024x256xbf16>, vector<16x256xf32> -> vector<16x256xf32>
    %20 = vector.broadcast %2 : vector<1x256xf32> to vector<16x256xf32>
    %21 = arith.addf %19, %20 : vector<16x256xf32>
    %cst_15 = arith.constant 0.000000e+00 : f32
    %22 = vector.broadcast %cst_15 : f32 to vector<16x256xf32>
    %23 = arith.maximumf %21, %22 : vector<16x256xf32>
    %c0_16 = arith.constant 0 : index
    %c0_17 = arith.constant 0 : index
    %24 = vector.load %arg7[%c0_16, %c0_17] : memref<664x128xf32, #tpu.memory_space<vmem>>, vector<256x16xf32>
    %cst_18 = arith.constant dense<0.000000e+00> : vector<16x16xf32>
    %25 = tpu.matmul %23, %24, %cst_18 {dimension_numbers = #tpu.dot_dimension_numbers<[1], [0], [0], [1], [0, 0, 1, 1], [], []>} : vector<16x256xf32>, vector<256x16xf32>, vector<16x16xf32> -> vector<16x16xf32>
    %c256 = arith.constant 256 : index
    %c0_19 = arith.constant 0 : index
    %26 = vector.load %arg7[%c256, %c0_19] : memref<664x128xf32, #tpu.memory_space<vmem>>, vector<1x16xf32>
    %27 = vector.broadcast %26 : vector<1x16xf32> to vector<16x16xf32>
    %28 = arith.addf %25, %27 : vector<16x16xf32>
    %cst_20 = arith.constant 0.000000e+00 : f32
    %29 = vector.broadcast %cst_20 : f32 to vector<16x16xf32>
    %30 = arith.maximumf %28, %29 : vector<16x16xf32>
    %c0_21 = arith.constant 0 : index
    %c0_22 = arith.constant 0 : index
    %31 = vector.load %arg1[%c0_21, %c0_22] : memref<16x24xf32, #tpu.memory_space<vmem>>, vector<16x8xf32>
    %c0_23 = arith.constant 0 : index
    %c8 = arith.constant 8 : index
    %32 = vector.load %arg1[%c0_23, %c8] : memref<16x24xf32, #tpu.memory_space<vmem>>, vector<16x16xf32>
    %c264 = arith.constant 264 : index
    %c0_24 = arith.constant 0 : index
    %33 = vector.load %arg7[%c264, %c0_24] : memref<664x128xf32, #tpu.memory_space<vmem>>, vector<8x128xf32>
    %cst_25 = arith.constant dense<0.000000e+00> : vector<16x128xf32>
    %34 = tpu.matmul %31, %33, %cst_25 {dimension_numbers = #tpu.dot_dimension_numbers<[1], [0], [0], [1], [0, 0, 1, 1], [], []>} : vector<16x8xf32>, vector<8x128xf32>, vector<16x128xf32> -> vector<16x128xf32>
    %c272 = arith.constant 272 : index
    %c0_26 = arith.constant 0 : index
    %35 = vector.load %arg7[%c272, %c0_26] : memref<664x128xf32, #tpu.memory_space<vmem>>, vector<1x128xf32>
    %36 = vector.broadcast %35 : vector<1x128xf32> to vector<16x128xf32>
    %37 = arith.addf %34, %36 : vector<16x128xf32>
    %cst_27 = arith.constant 0.000000e+00 : f32
    %38 = vector.broadcast %cst_27 : f32 to vector<16x128xf32>
    %39 = arith.maximumf %37, %38 : vector<16x128xf32>
    %c280 = arith.constant 280 : index
    %c0_28 = arith.constant 0 : index
    %40 = vector.load %arg7[%c280, %c0_28] : memref<664x128xf32, #tpu.memory_space<vmem>>, vector<128x8xf32>
    %cst_29 = arith.constant dense<0.000000e+00> : vector<16x8xf32>
    %41 = tpu.matmul %39, %40, %cst_29 {dimension_numbers = #tpu.dot_dimension_numbers<[1], [0], [0], [1], [0, 0, 1, 1], [], []>} : vector<16x128xf32>, vector<128x8xf32>, vector<16x8xf32> -> vector<16x8xf32>
    %c408 = arith.constant 408 : index
    %c0_30 = arith.constant 0 : index
    %42 = vector.load %arg7[%c408, %c0_30] : memref<664x128xf32, #tpu.memory_space<vmem>>, vector<1x8xf32>
    %43 = vector.broadcast %42 : vector<1x8xf32> to vector<16x8xf32>
    %44 = arith.addf %41, %43 : vector<16x8xf32>
    %cst_31 = arith.constant 0.000000e+00 : f32
    %45 = vector.broadcast %cst_31 : f32 to vector<16x8xf32>
    %46 = arith.maximumf %44, %45 : vector<16x8xf32>
    %c416 = arith.constant 416 : index
    %c0_32 = arith.constant 0 : index
    %47 = vector.load %arg7[%c416, %c0_32] : memref<664x128xf32, #tpu.memory_space<vmem>>, vector<16x64xf32>
    %cst_33 = arith.constant dense<0.000000e+00> : vector<16x64xf32>
    %48 = tpu.matmul %32, %47, %cst_33 {dimension_numbers = #tpu.dot_dimension_numbers<[1], [0], [0], [1], [0, 0, 1, 1], [], []>} : vector<16x16xf32>, vector<16x64xf32>, vector<16x64xf32> -> vector<16x64xf32>
    %c432 = arith.constant 432 : index
    %c0_34 = arith.constant 0 : index
    %49 = vector.load %arg7[%c432, %c0_34] : memref<664x128xf32, #tpu.memory_space<vmem>>, vector<1x64xf32>
    %50 = vector.broadcast %49 : vector<1x64xf32> to vector<16x64xf32>
    %51 = arith.addf %48, %50 : vector<16x64xf32>
    %cst_35 = arith.constant 0.000000e+00 : f32
    %52 = vector.broadcast %cst_35 : f32 to vector<16x64xf32>
    %53 = arith.maximumf %51, %52 : vector<16x64xf32>
    %c440 = arith.constant 440 : index
    %c0_36 = arith.constant 0 : index
    %54 = vector.load %arg7[%c440, %c0_36] : memref<664x128xf32, #tpu.memory_space<vmem>>, vector<64x8xf32>
    %cst_37 = arith.constant dense<0.000000e+00> : vector<16x8xf32>
    %55 = tpu.matmul %53, %54, %cst_37 {dimension_numbers = #tpu.dot_dimension_numbers<[1], [0], [0], [1], [0, 0, 1, 1], [], []>} : vector<16x64xf32>, vector<64x8xf32>, vector<16x8xf32> -> vector<16x8xf32>
    %c504 = arith.constant 504 : index
    %c0_38 = arith.constant 0 : index
    %56 = vector.load %arg7[%c504, %c0_38] : memref<664x128xf32, #tpu.memory_space<vmem>>, vector<1x8xf32>
    %57 = vector.broadcast %56 : vector<1x8xf32> to vector<16x8xf32>
    %58 = arith.addf %55, %57 : vector<16x8xf32>
    %cst_39 = arith.constant 0.000000e+00 : f32
    %59 = vector.broadcast %cst_39 : f32 to vector<16x8xf32>
    %60 = arith.maximumf %58, %59 : vector<16x8xf32>
    %c512_40 = arith.constant 512 : index
    %c0_41 = arith.constant 0 : index
    %61 = vector.load %arg7[%c512_40, %c0_41] : memref<664x128xf32, #tpu.memory_space<vmem>>, vector<16x128xf32>
    %cst_42 = arith.constant dense<0.000000e+00> : vector<16x128xf32>
    %62 = tpu.matmul %30, %61, %cst_42 {dimension_numbers = #tpu.dot_dimension_numbers<[1], [0], [0], [1], [0, 0, 1, 1], [], []>} : vector<16x16xf32>, vector<16x128xf32>, vector<16x128xf32> -> vector<16x128xf32>
    %c528 = arith.constant 528 : index
    %c0_43 = arith.constant 0 : index
    %63 = vector.load %arg7[%c528, %c0_43] : memref<664x128xf32, #tpu.memory_space<vmem>>, vector<8x128xf32>
    %cst_44 = arith.constant dense<0.000000e+00> : vector<16x128xf32>
    %64 = tpu.matmul %46, %63, %cst_44 {dimension_numbers = #tpu.dot_dimension_numbers<[1], [0], [0], [1], [0, 0, 1, 1], [], []>} : vector<16x8xf32>, vector<8x128xf32>, vector<16x128xf32> -> vector<16x128xf32>
    %65 = arith.addf %62, %64 : vector<16x128xf32>
    %c536 = arith.constant 536 : index
    %c0_45 = arith.constant 0 : index
    %66 = vector.load %arg7[%c536, %c0_45] : memref<664x128xf32, #tpu.memory_space<vmem>>, vector<8x128xf32>
    %cst_46 = arith.constant dense<0.000000e+00> : vector<16x128xf32>
    %67 = tpu.matmul %60, %66, %cst_46 {dimension_numbers = #tpu.dot_dimension_numbers<[1], [0], [0], [1], [0, 0, 1, 1], [], []>} : vector<16x8xf32>, vector<8x128xf32>, vector<16x128xf32> -> vector<16x128xf32>
    %68 = arith.addf %65, %67 : vector<16x128xf32>
    %c576 = arith.constant 576 : index
    %c0_47 = arith.constant 0 : index
    %69 = vector.load %arg7[%c576, %c0_47] : memref<664x128xf32, #tpu.memory_space<vmem>>, vector<1x128xf32>
    %70 = vector.broadcast %69 : vector<1x128xf32> to vector<16x128xf32>
    %71 = arith.addf %68, %70 : vector<16x128xf32>
    %c544 = arith.constant 544 : index
    %c0_48 = arith.constant 0 : index
    %72 = vector.load %arg7[%c544, %c0_48] : memref<664x128xf32, #tpu.memory_space<vmem>>, vector<32x128xf32>
    %c0_49 = arith.constant 0 : index
    %c0_50 = arith.constant 0 : index
    %73 = vector.load %arg2[%c0_49, %c0_50] : memref<4x72xf32, #tpu.memory_space<vmem>>, vector<4x4xf32>
    %c0_51 = arith.constant 0 : index
    %c4 = arith.constant 4 : index
    %74 = vector.load %arg2[%c0_51, %c4] : memref<4x72xf32, #tpu.memory_space<vmem>>, vector<4x4xf32>
    %c0_52 = arith.constant 0 : index
    %c8_53 = arith.constant 8 : index
    %75 = vector.load %arg2[%c0_52, %c8_53] : memref<4x72xf32, #tpu.memory_space<vmem>>, vector<4x32xf32>
    %c0_54 = arith.constant 0 : index
    %c40 = arith.constant 40 : index
    %76 = vector.load %arg2[%c0_54, %c40] : memref<4x72xf32, #tpu.memory_space<vmem>>, vector<4x32xf32>
    %cst_55 = arith.constant 0.000000e+00 : f32
    %77 = vector.broadcast %cst_55 : f32 to vector<4x32xf32>
    %78 = vector.extract_strided_slice %71 {offsets = [0, 0], sizes = [4, 128], strides = [1, 1]} : vector<16x128xf32> to vector<4x128xf32>
    %cst_56 = arith.constant dense<0.000000e+00> : vector<4x128xf32>
    %79 = tpu.matmul %75, %72, %cst_56 {dimension_numbers = #tpu.dot_dimension_numbers<[1], [0], [0], [1], [0, 0, 1, 1], [], []>} : vector<4x32xf32>, vector<32x128xf32>, vector<4x128xf32> -> vector<4x128xf32>
    %80 = arith.addf %78, %79 : vector<4x128xf32>
    %cst_57 = arith.constant 0.000000e+00 : f32
    %81 = vector.broadcast %cst_57 : f32 to vector<4x128xf32>
    %82 = arith.subf %81, %80 : vector<4x128xf32>
    %83 = math.exp %82 : vector<4x128xf32>
    %cst_58 = arith.constant 1.000000e+00 : f32
    %84 = vector.broadcast %cst_58 : f32 to vector<4x128xf32>
    %85 = arith.addf %84, %83 : vector<4x128xf32>
    %cst_59 = arith.constant 1.000000e+00 : f32
    %86 = vector.broadcast %cst_59 : f32 to vector<4x128xf32>
    %87 = arith.divf %86, %85 : vector<4x128xf32>
    %88 = math.tanh %80 : vector<4x128xf32>
    %89 = vector.extract_strided_slice %87 {offsets = [0, 0], sizes = [4, 32], strides = [1, 1]} : vector<4x128xf32> to vector<4x32xf32>
    %90 = vector.extract_strided_slice %87 {offsets = [0, 32], sizes = [4, 32], strides = [1, 1]} : vector<4x128xf32> to vector<4x32xf32>
    %91 = vector.extract_strided_slice %88 {offsets = [0, 64], sizes = [4, 32], strides = [1, 1]} : vector<4x128xf32> to vector<4x32xf32>
    %92 = vector.extract_strided_slice %87 {offsets = [0, 96], sizes = [4, 32], strides = [1, 1]} : vector<4x128xf32> to vector<4x32xf32>
    %93 = arith.mulf %90, %76 : vector<4x32xf32>
    %94 = arith.mulf %89, %91 : vector<4x32xf32>
    %95 = arith.addf %93, %94 : vector<4x32xf32>
    %96 = math.tanh %95 : vector<4x32xf32>
    %97 = arith.mulf %92, %96 : vector<4x32xf32>
    %98 = arith.addf %77, %97 : vector<4x32xf32>
    %99 = vector.extract_strided_slice %71 {offsets = [4, 0], sizes = [4, 128], strides = [1, 1]} : vector<16x128xf32> to vector<4x128xf32>
    %cst_60 = arith.constant dense<0.000000e+00> : vector<4x128xf32>
    %100 = tpu.matmul %97, %72, %cst_60 {dimension_numbers = #tpu.dot_dimension_numbers<[1], [0], [0], [1], [0, 0, 1, 1], [], []>} : vector<4x32xf32>, vector<32x128xf32>, vector<4x128xf32> -> vector<4x128xf32>
    %101 = arith.addf %99, %100 : vector<4x128xf32>
    %cst_61 = arith.constant 0.000000e+00 : f32
    %102 = vector.broadcast %cst_61 : f32 to vector<4x128xf32>
    %103 = arith.subf %102, %101 : vector<4x128xf32>
    %104 = math.exp %103 : vector<4x128xf32>
    %cst_62 = arith.constant 1.000000e+00 : f32
    %105 = vector.broadcast %cst_62 : f32 to vector<4x128xf32>
    %106 = arith.addf %105, %104 : vector<4x128xf32>
    %cst_63 = arith.constant 1.000000e+00 : f32
    %107 = vector.broadcast %cst_63 : f32 to vector<4x128xf32>
    %108 = arith.divf %107, %106 : vector<4x128xf32>
    %109 = math.tanh %101 : vector<4x128xf32>
    %110 = vector.extract_strided_slice %108 {offsets = [0, 0], sizes = [4, 32], strides = [1, 1]} : vector<4x128xf32> to vector<4x32xf32>
    %111 = vector.extract_strided_slice %108 {offsets = [0, 32], sizes = [4, 32], strides = [1, 1]} : vector<4x128xf32> to vector<4x32xf32>
    %112 = vector.extract_strided_slice %109 {offsets = [0, 64], sizes = [4, 32], strides = [1, 1]} : vector<4x128xf32> to vector<4x32xf32>
    %113 = vector.extract_strided_slice %108 {offsets = [0, 96], sizes = [4, 32], strides = [1, 1]} : vector<4x128xf32> to vector<4x32xf32>
    %114 = arith.mulf %111, %95 : vector<4x32xf32>
    %115 = arith.mulf %110, %112 : vector<4x32xf32>
    %116 = arith.addf %114, %115 : vector<4x32xf32>
    %117 = math.tanh %116 : vector<4x32xf32>
    %118 = arith.mulf %113, %117 : vector<4x32xf32>
    %119 = arith.addf %98, %118 : vector<4x32xf32>
    %120 = vector.extract_strided_slice %71 {offsets = [8, 0], sizes = [4, 128], strides = [1, 1]} : vector<16x128xf32> to vector<4x128xf32>
    %cst_64 = arith.constant dense<0.000000e+00> : vector<4x128xf32>
    %121 = tpu.matmul %118, %72, %cst_64 {dimension_numbers = #tpu.dot_dimension_numbers<[1], [0], [0], [1], [0, 0, 1, 1], [], []>} : vector<4x32xf32>, vector<32x128xf32>, vector<4x128xf32> -> vector<4x128xf32>
    %122 = arith.addf %120, %121 : vector<4x128xf32>
    %cst_65 = arith.constant 0.000000e+00 : f32
    %123 = vector.broadcast %cst_65 : f32 to vector<4x128xf32>
    %124 = arith.subf %123, %122 : vector<4x128xf32>
    %125 = math.exp %124 : vector<4x128xf32>
    %cst_66 = arith.constant 1.000000e+00 : f32
    %126 = vector.broadcast %cst_66 : f32 to vector<4x128xf32>
    %127 = arith.addf %126, %125 : vector<4x128xf32>
    %cst_67 = arith.constant 1.000000e+00 : f32
    %128 = vector.broadcast %cst_67 : f32 to vector<4x128xf32>
    %129 = arith.divf %128, %127 : vector<4x128xf32>
    %130 = math.tanh %122 : vector<4x128xf32>
    %131 = vector.extract_strided_slice %129 {offsets = [0, 0], sizes = [4, 32], strides = [1, 1]} : vector<4x128xf32> to vector<4x32xf32>
    %132 = vector.extract_strided_slice %129 {offsets = [0, 32], sizes = [4, 32], strides = [1, 1]} : vector<4x128xf32> to vector<4x32xf32>
    %133 = vector.extract_strided_slice %130 {offsets = [0, 64], sizes = [4, 32], strides = [1, 1]} : vector<4x128xf32> to vector<4x32xf32>
    %134 = vector.extract_strided_slice %129 {offsets = [0, 96], sizes = [4, 32], strides = [1, 1]} : vector<4x128xf32> to vector<4x32xf32>
    %135 = arith.mulf %132, %116 : vector<4x32xf32>
    %136 = arith.mulf %131, %133 : vector<4x32xf32>
    %137 = arith.addf %135, %136 : vector<4x32xf32>
    %138 = math.tanh %137 : vector<4x32xf32>
    %139 = arith.mulf %134, %138 : vector<4x32xf32>
    %140 = arith.addf %119, %139 : vector<4x32xf32>
    %141 = vector.extract_strided_slice %71 {offsets = [12, 0], sizes = [4, 128], strides = [1, 1]} : vector<16x128xf32> to vector<4x128xf32>
    %cst_68 = arith.constant dense<0.000000e+00> : vector<4x128xf32>
    %142 = tpu.matmul %139, %72, %cst_68 {dimension_numbers = #tpu.dot_dimension_numbers<[1], [0], [0], [1], [0, 0, 1, 1], [], []>} : vector<4x32xf32>, vector<32x128xf32>, vector<4x128xf32> -> vector<4x128xf32>
    %143 = arith.addf %141, %142 : vector<4x128xf32>
    %cst_69 = arith.constant 0.000000e+00 : f32
    %144 = vector.broadcast %cst_69 : f32 to vector<4x128xf32>
    %145 = arith.subf %144, %143 : vector<4x128xf32>
    %146 = math.exp %145 : vector<4x128xf32>
    %cst_70 = arith.constant 1.000000e+00 : f32
    %147 = vector.broadcast %cst_70 : f32 to vector<4x128xf32>
    %148 = arith.addf %147, %146 : vector<4x128xf32>
    %cst_71 = arith.constant 1.000000e+00 : f32
    %149 = vector.broadcast %cst_71 : f32 to vector<4x128xf32>
    %150 = arith.divf %149, %148 : vector<4x128xf32>
    %151 = math.tanh %143 : vector<4x128xf32>
    %152 = vector.extract_strided_slice %150 {offsets = [0, 0], sizes = [4, 32], strides = [1, 1]} : vector<4x128xf32> to vector<4x32xf32>
    %153 = vector.extract_strided_slice %150 {offsets = [0, 32], sizes = [4, 32], strides = [1, 1]} : vector<4x128xf32> to vector<4x32xf32>
    %154 = vector.extract_strided_slice %151 {offsets = [0, 64], sizes = [4, 32], strides = [1, 1]} : vector<4x128xf32> to vector<4x32xf32>
    %155 = vector.extract_strided_slice %150 {offsets = [0, 96], sizes = [4, 32], strides = [1, 1]} : vector<4x128xf32> to vector<4x32xf32>
    %156 = arith.mulf %153, %137 : vector<4x32xf32>
    %157 = arith.mulf %152, %154 : vector<4x32xf32>
    %158 = arith.addf %156, %157 : vector<4x32xf32>
    %159 = math.tanh %158 : vector<4x32xf32>
    %160 = arith.mulf %155, %159 : vector<4x32xf32>
    %161 = arith.addf %140, %160 : vector<4x32xf32>
    %c584 = arith.constant 584 : index
    %c0_72 = arith.constant 0 : index
    %162 = vector.load %arg7[%c584, %c0_72] : memref<664x128xf32, #tpu.memory_space<vmem>>, vector<32x16xf32>
    %cst_73 = arith.constant dense<0.000000e+00> : vector<4x16xf32>
    %163 = tpu.matmul %161, %162, %cst_73 {dimension_numbers = #tpu.dot_dimension_numbers<[1], [0], [0], [1], [0, 0, 1, 1], [], []>} : vector<4x32xf32>, vector<32x16xf32>, vector<4x16xf32> -> vector<4x16xf32>
    %c616 = arith.constant 616 : index
    %c0_74 = arith.constant 0 : index
    %164 = vector.load %arg7[%c616, %c0_74] : memref<664x128xf32, #tpu.memory_space<vmem>>, vector<4x16xf32>
    %cst_75 = arith.constant dense<0.000000e+00> : vector<4x16xf32>
    %165 = tpu.matmul %73, %164, %cst_75 {dimension_numbers = #tpu.dot_dimension_numbers<[1], [0], [0], [1], [0, 0, 1, 1], [], []>} : vector<4x4xf32>, vector<4x16xf32>, vector<4x16xf32> -> vector<4x16xf32>
    %166 = arith.addf %163, %165 : vector<4x16xf32>
    %c624 = arith.constant 624 : index
    %c0_76 = arith.constant 0 : index
    %167 = vector.load %arg7[%c624, %c0_76] : memref<664x128xf32, #tpu.memory_space<vmem>>, vector<4x16xf32>
    %cst_77 = arith.constant dense<0.000000e+00> : vector<4x16xf32>
    %168 = tpu.matmul %74, %167, %cst_77 {dimension_numbers = #tpu.dot_dimension_numbers<[1], [0], [0], [1], [0, 0, 1, 1], [], []>} : vector<4x4xf32>, vector<4x16xf32>, vector<4x16xf32> -> vector<4x16xf32>
    %169 = arith.addf %166, %168 : vector<4x16xf32>
    %c632 = arith.constant 632 : index
    %c0_78 = arith.constant 0 : index
    %170 = vector.load %arg7[%c632, %c0_78] : memref<664x128xf32, #tpu.memory_space<vmem>>, vector<1x16xf32>
    %171 = vector.broadcast %170 : vector<1x16xf32> to vector<4x16xf32>
    %172 = arith.addf %169, %171 : vector<4x16xf32>
    %cst_79 = arith.constant 0.000000e+00 : f32
    %173 = vector.broadcast %cst_79 : f32 to vector<4x16xf32>
    %174 = arith.maximumf %172, %173 : vector<4x16xf32>
    %c640 = arith.constant 640 : index
    %c0_80 = arith.constant 0 : index
    %175 = vector.load %arg7[%c640, %c0_80] : memref<664x128xf32, #tpu.memory_space<vmem>>, vector<16x16xf32>
    %cst_81 = arith.constant dense<0.000000e+00> : vector<4x16xf32>
    %176 = tpu.matmul %174, %175, %cst_81 {dimension_numbers = #tpu.dot_dimension_numbers<[1], [0], [0], [1], [0, 0, 1, 1], [], []>} : vector<4x16xf32>, vector<16x16xf32>, vector<4x16xf32> -> vector<4x16xf32>
    %c656 = arith.constant 656 : index
    %c0_82 = arith.constant 0 : index
    %177 = vector.load %arg7[%c656, %c0_82] : memref<664x128xf32, #tpu.memory_space<vmem>>, vector<1x16xf32>
    %178 = vector.broadcast %177 : vector<1x16xf32> to vector<4x16xf32>
    %179 = arith.addf %176, %178 : vector<4x16xf32>
    %c0_83 = arith.constant 0 : index
    %c0_84 = arith.constant 0 : index
    %180 = vector.load %arg8[%c0_83, %c0_84] : memref<4x16xf32, #tpu.memory_space<vmem>>, vector<4x16xf32>
    tpu.vector_store %arg8[%c0_83, %c0_84], %179 {strides = array<i32>} : memref<4x16xf32, #tpu.memory_space<vmem>>, vector<4x16xf32>,
    %181 = vector.extract_strided_slice %179 {offsets = [0, 0], sizes = [2, 16], strides = [1, 1]} : vector<4x16xf32> to vector<2x16xf32>
    %182 = vector.extract_strided_slice %179 {offsets = [2, 0], sizes = [2, 16], strides = [1, 1]} : vector<4x16xf32> to vector<2x16xf32>
    %183 = arith.addf %181, %182 : vector<2x16xf32>
    %c0_85 = arith.constant 0 : index
    %c0_86 = arith.constant 0 : index
    %184 = vector.load %arg9[%c0_85, %c0_86] : memref<2x16xf32, #tpu.memory_space<vmem>>, vector<2x16xf32>
    tpu.vector_store %arg9[%c0_85, %c0_86], %183 {strides = array<i32>} : memref<2x16xf32, #tpu.memory_space<vmem>>, vector<2x16xf32>,
    return
  }
}

</mosaic_0001>

<bundles_post_ra>
// kernel: gcn_charnet_forward.1
= control target key start
LH: loop header
LB: loop body
LE: loop exit
PB: predicated region body
PF: predicated region fallthrough
CT: control target
= control target key end

     0   :  { %15 = vsyncpa [#allocation3], 0  ;;  %s9386_s0 = inlined_call_operand.vmem [shape: bf16[16,128], index: 0, kind: input, shape index: {}]   ;;  %s9387_s1 = inlined_call_operand.vmem [shape: f32[16,24], index: 1, kind: input, shape index: {}]   ;;  %s9388_s2 = inlined_call_operand.vmem [shape: f32[4,72], index: 2, kind: input, shape index: {}]   ;;  %s9389_s3 = inlined_call_operand.vmem [shape: bf16[128,512], index: 3, kind: input, shape index: {}]   ;;  %s9390_s4 = inlined_call_operand.vmem [shape: bf16[512,1024], index: 4, kind: input, shape index: {}]   ;;  %s9391_s5 = inlined_call_operand.vmem [shape: bf16[1024,256], index: 5, kind: input, shape index: {}]   ;;  %s9392_s6 = inlined_call_operand.vmem [shape: f32[1,1792], index: 6, kind: input, shape index: {}]   ;;  %s9393_s7 = inlined_call_operand.vmem [shape: f32[664,128], index: 7, kind: input, shape index: {}]   ;;  %s9394_s8 = inlined_call_operand.hbm [shape: f32[4,16], index: 8, kind: output, shape index: {0}]   ;;  %s9395_s9 = inlined_call_operand.hbm [shape: f32[2,16], index: 9, kind: output, shape index: {1}]  }
   0x1   :  { %v4236_v0 = vld [vmem:[%s9389_s3 + $0xe0] sm:$0xf]  ;;  %v5839_v1 = vld [vmem:[%s9389_s3 + $0xec] sm:$0xf0]  ;;  %v5837_v2 = vld [vmem:[%s9389_s3 + $0xe4] sm:$0xf] }
   0x2   :  { %v4237_v3 = vor.u32 %v5839_v1, %v4236_v0  ;;  %v4238_v4 = vld [vmem:[%s9389_s3 + $0xf0] sm:$0xf0]  ;;  %v4244_v5 = vld [vmem:[%s9389_s3 + $0xe8] sm:$0xf]  ;;  %v5840_v6 = vld [vmem:[%s9389_s3 + $0xf4] sm:$0xf0] }
   0x3   :  { %v4241_v7 = vor.u32 %v5837_v2, %v4238_v4  ;;  %v4245_v8 = vor.u32 %v5840_v6, %v4244_v5  ;;  %v5838_v9 = vld [vmem:[%s9389_s3 + $0xec] sm:$0xf]  ;;  %v4246_v10 = vld [vmem:[%s9389_s3 + $0xf8] sm:$0xf0]  ;;  %v4220_v11 = vld [vmem:[%s9389_s3 + $0xc0] sm:$0xf] }
   0x4   :  { %245 = vmatpush.bf16.msra.mxu0 %v4237_v3  ;;  %v4249_v12 = vor.u32 %v5838_v9, %v4246_v10  ;;  %v5835_v13 = vld [vmem:[%s9389_s3 + $0xcc] sm:$0xf0]  ;;  %v5833_v14 = vld [vmem:[%s9389_s3 + $0xc4] sm:$0xf]  ;;  %v4222_v15 = vld [vmem:[%s9389_s3 + $0xd0] sm:$0xf0] }
   0x5   :  { %259 = vmatpush.bf16.msra.mxu1 %v4241_v7  ;;  %273 = vmatpush.bf16.msra.mxu2 %v4245_v8  ;;  %v4221_v16 = vor.u32 %v5835_v13, %v4220_v11  ;;  %v4225_v17 = vor.u32 %v5833_v14, %v4222_v15  ;;  %v4228_v18 = vld [vmem:[%s9389_s3 + $0xc8] sm:$0xf]  ;;  %v5836_v19 = vld [vmem:[%s9389_s3 + $0xd4] sm:$0xf0]  ;;  %v5834_v20 = vld [vmem:[%s9389_s3 + $0xcc] sm:$0xf] }
   0x6   :  { %287 = vmatpush.bf16.msra.mxu3 %v4249_v12  ;;  %v4229_v21 = vor.u32 %v5836_v19, %v4228_v18  ;;  %v4230_v22 = vld [vmem:[%s9389_s3 + $0xd8] sm:$0xf0]  ;;  %v4204_v23 = vld [vmem:[%s9389_s3 + $0xa0] sm:$0xf]  ;;  %v5831_v24 = vld [vmem:[%s9389_s3 + $0xac] sm:$0xf0] }
   0x7   :  { %v4233_v25 = vor.u32 %v5834_v20, %v4230_v22  ;;  %v5829_v26 = vld [vmem:[%s9389_s3 + $0xa4] sm:$0xf]  ;;  %v4206_v27 = vld [vmem:[%s9389_s3 + $0xb0] sm:$0xf0]  ;;  %v4212_v28 = vld [vmem:[%s9389_s3 + $0xa8] sm:$0xf]  ;;  %v4205_v29 = vor.u32 %v5831_v24, %v4204_v23 }
   0x8   :  { %246 = vmatpush.bf16.msra.mxu0 %v4221_v16  ;;  %v5832_v30 = vld [vmem:[%s9389_s3 + $0xb4] sm:$0xf0]  ;;  %v5830_v31 = vld [vmem:[%s9389_s3 + $0xac] sm:$0xf]  ;;  %v4214_v32 = vld [vmem:[%s9389_s3 + $0xb8] sm:$0xf0]  ;;  %v4209_v33 = vor.u32 %v5829_v26, %v4206_v27 }
   0x9   :  { %260 = vmatpush.bf16.msra.mxu1 %v4225_v17  ;;  %274 = vmatpush.bf16.msra.mxu2 %v4229_v21  ;;  %v4213_v34 = vor.u32 %v5832_v30, %v4212_v28  ;;  %v4188_v35 = vld [vmem:[%s9389_s3 + $0x80] sm:$0xf]  ;;  %v5827_v36 = vld [vmem:[%s9389_s3 + $0x8c] sm:$0xf0]  ;;  %v5825_v37 = vld [vmem:[%s9389_s3 + $0x84] sm:$0xf]  ;;  %v4217_v38 = vor.u32 %v5830_v31, %v4214_v32 }
   0xa   :  { %288 = vmatpush.bf16.msra.mxu3 %v4233_v25  ;;  %v4190_v39 = vld [vmem:[%s9389_s3 + $0x90] sm:$0xf0]  ;;  %v4196_v40 = vld [vmem:[%s9389_s3 + $0x88] sm:$0xf]  ;;  %v5828_v41 = vld [vmem:[%s9389_s3 + $0x94] sm:$0xf0]  ;;  %v4189_v44 = vor.u32 %v5827_v36, %v4188_v35 }
   0xb   :  { %v5826_v42 = vld [vmem:[%s9389_s3 + $0x8c] sm:$0xf]  ;;  %v4198_v43 = vld [vmem:[%s9389_s3 + $0x98] sm:$0xf0]  ;;  %v4193_v45 = vor.u32 %v5825_v37, %v4190_v39  ;;  %v4197_v46 = vor.u32 %v5828_v41, %v4196_v40  ;;  %v4172_v47 = vld [vmem:[%s9389_s3 + $0x60] sm:$0xf] }
   0xc   :  { %247 = vmatpush.bf16.msra.mxu0 %v4205_v29  ;;  %v5823_v48 = vld [vmem:[%s9389_s3 + $0x6c] sm:$0xf0]  ;;  %v5821_v49 = vld [vmem:[%s9389_s3 + $0x64] sm:$0xf]  ;;  %v4201_v50 = vor.u32 %v5826_v42, %v4198_v43  ;;  %v4174_v51 = vld [vmem:[%s9389_s3 + $0x70] sm:$0xf0] }
   0xd   :  { %261 = vmatpush.bf16.msra.mxu1 %v4209_v33  ;;  %275 = vmatpush.bf16.msra.mxu2 %v4213_v34  ;;  %v4180_v52 = vld [vmem:[%s9389_s3 + $0x68] sm:$0xf]  ;;  %v5824_v53 = vld [vmem:[%s9389_s3 + $0x74] sm:$0xf0]  ;;  %v5822_v54 = vld [vmem:[%s9389_s3 + $0x6c] sm:$0xf]  ;;  %v4173_v56 = vor.u32 %v5823_v48, %v4172_v47  ;;  %v4177_v57 = vor.u32 %v5821_v49, %v4174_v51 }
   0xe   :  { %289 = vmatpush.bf16.msra.mxu3 %v4217_v38  ;;  %v4182_v55 = vld [vmem:[%s9389_s3 + $0x78] sm:$0xf0]  ;;  %v4181_v58 = vor.u32 %v5824_v53, %v4180_v52  ;;  %v4156_v59 = vld [vmem:[%s9389_s3 + $0x40] sm:$0xf]  ;;  %v5819_v60 = vld [vmem:[%s9389_s3 + $0x4c] sm:$0xf0] }
   0xf   :  { %v5817_v61 = vld [vmem:[%s9389_s3 + $0x44] sm:$0xf]  ;;  %v4185_v62 = vor.u32 %v5822_v54, %v4182_v55  ;;  %v4158_v63 = vld [vmem:[%s9389_s3 + $0x50] sm:$0xf0]  ;;  %v4164_v0 = vld [vmem:[%s9389_s3 + $0x48] sm:$0xf]  ;;  %v4157_v4 = vor.u32 %v5819_v60, %v4156_v59 }
  0x10   :  { %248 = vmatpush.bf16.msra.mxu0 %v4189_v44  ;;  %v5820_v1 = vld [vmem:[%s9389_s3 + $0x54] sm:$0xf0]  ;;  %v5818_v2 = vld [vmem:[%s9389_s3 + $0x4c] sm:$0xf]  ;;  %v4166_v3 = vld [vmem:[%s9389_s3 + $0x58] sm:$0xf0]  ;;  %v4161_v5 = vor.u32 %v5817_v61, %v4158_v63 }
  0x11   :  { %262 = vmatpush.bf16.msra.mxu1 %v4193_v45  ;;  %276 = vmatpush.bf16.msra.mxu2 %v4197_v46  ;;  %v4165_v6 = vor.u32 %v5820_v1, %v4164_v0  ;;  %v4140_v7 = vld [vmem:[%s9389_s3 + $0x20] sm:$0xf]  ;;  %v5815_v8 = vld [vmem:[%s9389_s3 + $0x2c] sm:$0xf0]  ;;  %v5813_v9 = vld [vmem:[%s9389_s3 + $0x24] sm:$0xf]  ;;  %v4169_v10 = vor.u32 %v5818_v2, %v4166_v3 }
  0x12   :  { %290 = vmatpush.bf16.msra.mxu3 %v4201_v50  ;;  %v4142_v11 = vld [vmem:[%s9389_s3 + $0x30] sm:$0xf0]  ;;  %v4148_v12 = vld [vmem:[%s9389_s3 + $0x28] sm:$0xf]  ;;  %v5816_v13 = vld [vmem:[%s9389_s3 + $0x34] sm:$0xf0]  ;;  %v4141_v16 = vor.u32 %v5815_v8, %v4140_v7 }
  0x13   :  { %v5814_v14 = vld [vmem:[%s9389_s3 + $0x2c] sm:$0xf]  ;;  %v4150_v15 = vld [vmem:[%s9389_s3 + $0x38] sm:$0xf0]  ;;  %v4124_v17 = vld [vmem:[%s9389_s3] sm:$0xf]  ;;  %v4145_v18 = vor.u32 %v5813_v9, %v4142_v11  ;;  %v4149_v19 = vor.u32 %v5816_v13, %v4148_v12 }
  0x14   :  { %249 = vmatpush.bf16.msra.mxu0 %v4173_v56  ;;  %v5811_v20 = vld [vmem:[%s9389_s3 + $0xc] sm:$0xf0]  ;;  %v5809_v21 = vld [vmem:[%s9389_s3 + $0x4] sm:$0xf]  ;;  %v4126_v22 = vld [vmem:[%s9389_s3 + $0x10] sm:$0xf0]  ;;  %v4153_v23 = vor.u32 %v5814_v14, %v4150_v15 }
  0x15   :  { %263 = vmatpush.bf16.msra.mxu1 %v4177_v57  ;;  %277 = vmatpush.bf16.msra.mxu2 %v4181_v58  ;;  %v4132_v24 = vld [vmem:[%s9389_s3 + $0x8] sm:$0xf]  ;;  %v5812_v25 = vld [vmem:[%s9389_s3 + $0x14] sm:$0xf0]  ;;  %v5810_v26 = vld [vmem:[%s9389_s3 + $0xc] sm:$0xf]  ;;  %v4125_v30 = vor.u32 %v5811_v20, %v4124_v17  ;;  %v4129_v33 = vor.u32 %v5809_v21, %v4126_v22 }
  0x16   :  { %291 = vmatpush.bf16.msra.mxu3 %v4185_v62  ;;  %v4134_v27 = vld [vmem:[%s9389_s3 + $0x18] sm:$0xf0]  ;;  %v4476_v28 = vld [vmem:[%s9390_s4 + $0x1c0] sm:$0xf]  ;;  %v4133_v34 = vor.u32 %v5812_v25, %v4132_v24 }
  0x17   :  { %v5901_v29 = vld [vmem:[%s9390_s4 + $0x1dc] sm:$0xf0]  ;;  %v4137_v36 = vor.u32 %v5810_v26, %v4134_v27 }
  0x18   :  { %250 = vmatpush.bf16.msra.mxu0 %v4157_v4  ;;  %v4732_v31 = vld [vmem:[%s9390_s4 + $0x3c0] sm:$0xf]  ;;  %v4477_v37 = vor.u32 %v5901_v29, %v4476_v28 }
  0x19   :  { %264 = vmatpush.bf16.msra.mxu1 %v4161_v5  ;;  %278 = vmatpush.bf16.msra.mxu2 %v4165_v6  ;;  %v5965_v32 = vld [vmem:[%s9390_s4 + $0x3dc] sm:$0xf0] }
  0x1a   :  { %292 = vmatpush.bf16.msra.mxu3 %v4169_v10  ;;  %v5808_v35 = vld [vmem:[%s9386_s0] sm:$0xff]  ;;  %v4733_v41 = vor.u32 %v5965_v32, %v4732_v31 }
  0x1b   :  { %v4444_v38 = vld [vmem:[%s9390_s4 + $0x180] sm:$0xf] }
  0x1c   :  { %251 = vmatpush.bf16.msra.mxu0 %v4141_v16  ;;  %v4988_v39 = vld [vmem:[%s9390_s4 + $0x5c0] sm:$0xf] }
  0x1d   :  { %265 = vmatpush.bf16.msra.mxu1 %v4145_v18  ;;  %279 = vmatpush.bf16.msra.mxu2 %v4149_v19  ;;  %v6029_v40 = vld [vmem:[%s9390_s4 + $0x5dc] sm:$0xf0] }
  0x1e   :  { %293 = vmatpush.bf16.msra.mxu3 %v4153_v23  ;;  %v5893_v42 = vld [vmem:[%s9390_s4 + $0x19c] sm:$0xf0]  ;;  %v4989_v47 = vor.u32 %v6029_v40, %v4988_v39 }
  0x1f   :  { %v5244_v43 = vld [vmem:[%s9390_s4 + $0x7c0] sm:$0xf]  ;;  %v4445_v48 = vor.u32 %v5893_v42, %v4444_v38 }
  0x20   :  { %v6093_v44 = vld [vmem:[%s9390_s4 + $0x7dc] sm:$0xf0]  ;;  %252 = vmatpush.bf16.msra.mxu0 %v4125_v30 }
  0x21   :  { %v4700_v45 = vld [vmem:[%s9390_s4 + $0x380] sm:$0xf]  ;;  %266 = vmatpush.bf16.msra.mxu1 %v4129_v33  ;;  %280 = vmatpush.bf16.msra.mxu2 %v4133_v34  ;;  %v5245_v49 = vor.u32 %v6093_v44, %v5244_v43 }
  0x22   :  { %v5957_v46 = vld [vmem:[%s9390_s4 + $0x39c] sm:$0xf0]  ;;  %294 = vmatpush.bf16.msra.mxu3 %v4137_v36 }
  0x23   :  { %v4412_v50 = vld [vmem:[%s9390_s4 + $0x140] sm:$0xf]  ;;  %253 = vmatmul.bf16.vlgmr.msra.gmra.mxu0 %v5808_v35  ;;  %v4701_v53 = vor.u32 %v5957_v46, %v4700_v45 }
  0x24   :  { %1866 = vmatpush.bf16.msrb.mxu0 %v4477_v37  ;;  %v4956_v51 = vld [vmem:[%s9390_s4 + $0x580] sm:$0xf]  ;;  %267 = vmatmul.bf16.vlgmr.msra.gmra.mxu1 %v5808_v35 }
  0x25   :  { %v6021_v52 = vld [vmem:[%s9390_s4 + $0x59c] sm:$0xf0]  ;;  %1880 = vmatpush.bf16.msrb.mxu1 %v4733_v41  ;;  %281 = vmatmul.bf16.vlgmr.msra.gmra.mxu2 %v5808_v35 }
  0x26   :  { %v5885_v54 = vld [vmem:[%s9390_s4 + $0x15c] sm:$0xf0]  ;;  %295 = vmatmul.bf16.vlgmr.msra.gmra.mxu3 %v5808_v35  ;;  %1894 = vmatpush.bf16.msrb.mxu2 %v4989_v47  ;;  %v4957_v59 = vor.u32 %v6021_v52, %v4956_v51 }
  0x27   :  { %v5212_v55 = vld [vmem:[%s9390_s4 + $0x780] sm:$0xf]  ;;  %1908 = vmatpush.bf16.msrb.mxu3 %v5245_v49  ;;  %v4413_v60 = vor.u32 %v5885_v54, %v4412_v50 }
  0x28   :  { %v6085_v56 = vld [vmem:[%s9390_s4 + $0x79c] sm:$0xf0]  ;;  %1867 = vmatpush.bf16.msrb.mxu0 %v4445_v48 }
  0x29   :  { %v4668_v57 = vld [vmem:[%s9390_s4 + $0x340] sm:$0xf]  ;;  %v5213_v61 = vor.u32 %v6085_v56, %v5212_v55  ;;  %1881 = vmatpush.bf16.msrb.mxu1 %v4701_v53 }
  0x2a   :  { %v5949_v58 = vld [vmem:[%s9390_s4 + $0x35c] sm:$0xf0]  ;;  %1895 = vmatpush.bf16.msrb.mxu2 %v4957_v59 }
  0x2b   :  { %v4380_v62 = vld [vmem:[%s9390_s4 + $0x100] sm:$0xf]  ;;  %v4669_v1 = vor.u32 %v5949_v58, %v4668_v57  ;;  %1909 = vmatpush.bf16.msrb.mxu3 %v5213_v61 }
  0x2c   :  { %v4924_v63 = vld [vmem:[%s9390_s4 + $0x540] sm:$0xf]  ;;  %1868 = vmatpush.bf16.msrb.mxu0 %v4413_v60 }
  0x2d   :  { %v6013_v0 = vld [vmem:[%s9390_s4 + $0x55c] sm:$0xf0]  ;;  %1882 = vmatpush.bf16.msrb.mxu1 %v4669_v1 }
  0x2e   :  { %v5877_v2 = vld [vmem:[%s9390_s4 + $0x11c] sm:$0xf0]  ;;  %v4925_v7 = vor.u32 %v6013_v0, %v4924_v63 }
  0x2f   :  { %v5180_v3 = vld [vmem:[%s9390_s4 + $0x740] sm:$0xf]  ;;  %v4381_v8 = vor.u32 %v5877_v2, %v4380_v62 }
  0x30   :  { %v6077_v4 = vld [vmem:[%s9390_s4 + $0x75c] sm:$0xf0]  ;;  %1896 = vmatpush.bf16.msrb.mxu2 %v4925_v7 }
  0x31   :  { %v4636_v5 = vld [vmem:[%s9390_s4 + $0x300] sm:$0xf]  ;;  %v5181_v9 = vor.u32 %v6077_v4, %v5180_v3  ;;  %1869 = vmatpush.bf16.msrb.mxu0 %v4381_v8 }
  0x32   :  { %v5941_v6 = vld [vmem:[%s9390_s4 + $0x31c] sm:$0xf0] }
  0x33   :  { %v4348_v10 = vld [vmem:[%s9390_s4 + $0xc0] sm:$0xf]  ;;  %v4637_v13 = vor.u32 %v5941_v6, %v4636_v5  ;;  %1910 = vmatpush.bf16.msrb.mxu3 %v5181_v9 }
  0x34   :  { %v4892_v11 = vld [vmem:[%s9390_s4 + $0x500] sm:$0xf] }
  0x35   :  { %v6005_v12 = vld [vmem:[%s9390_s4 + $0x51c] sm:$0xf0]  ;;  %1883 = vmatpush.bf16.msrb.mxu1 %v4637_v13 }
  0x36   :  { %v5869_v14 = vld [vmem:[%s9390_s4 + $0xdc] sm:$0xf0]  ;;  %v4893_v19 = vor.u32 %v6005_v12, %v4892_v11 }
  0x37   :  { %v5148_v15 = vld [vmem:[%s9390_s4 + $0x700] sm:$0xf]  ;;  %v4349_v20 = vor.u32 %v5869_v14, %v4348_v10 }
  0x38   :  { %v6069_v16 = vld [vmem:[%s9390_s4 + $0x71c] sm:$0xf0]  ;;  %1897 = vmatpush.bf16.msrb.mxu2 %v4893_v19 }
  0x39   :  { %v4604_v17 = vld [vmem:[%s9390_s4 + $0x2c0] sm:$0xf]  ;;  %v5149_v21 = vor.u32 %v6069_v16, %v5148_v15  ;;  %1870 = vmatpush.bf16.msrb.mxu0 %v4349_v20 }
  0x3a   :  { %v5933_v18 = vld [vmem:[%s9390_s4 + $0x2dc] sm:$0xf0] }
  0x3b   :  { %v4316_v22 = vld [vmem:[%s9390_s4 + $0x80] sm:$0xf]  ;;  %v4605_v25 = vor.u32 %v5933_v18, %v4604_v17  ;;  %1911 = vmatpush.bf16.msrb.mxu3 %v5149_v21 }
  0x3c   :  { %v4860_v23 = vld [vmem:[%s9390_s4 + $0x4c0] sm:$0xf] }
  0x3d   :  { %v5997_v24 = vld [vmem:[%s9390_s4 + $0x4dc] sm:$0xf0]  ;;  %1884 = vmatpush.bf16.msrb.mxu1 %v4605_v25 }
  0x3e   :  { %v5861_v26 = vld [vmem:[%s9390_s4 + $0x9c] sm:$0xf0]  ;;  %v4861_v31 = vor.u32 %v5997_v24, %v4860_v23 }
  0x3f   :  { %v5116_v27 = vld [vmem:[%s9390_s4 + $0x6c0] sm:$0xf]  ;;  %v4317_v34 = vor.u32 %v5861_v26, %v4316_v22 }
  0x40   :  { %v6061_v28 = vld [vmem:[%s9390_s4 + $0x6dc] sm:$0xf0]  ;;  %1898 = vmatpush.bf16.msrb.mxu2 %v4861_v31 }
  0x41   :  { %v4572_v29 = vld [vmem:[%s9390_s4 + $0x280] sm:$0xf]  ;;  %v5117_v35 = vor.u32 %v6061_v28, %v5116_v27  ;;  %1871 = vmatpush.bf16.msrb.mxu0 %v4317_v34 }
  0x42   :  { %v5925_v30 = vld [vmem:[%s9390_s4 + $0x29c] sm:$0xf0] }
  0x43   :  { %v4284_v32 = vld [vmem:[%s9390_s4 + $0x40] sm:$0xf]  ;;  %v4573_v39 = vor.u32 %v5925_v30, %v4572_v29  ;;  %1912 = vmatpush.bf16.msrb.mxu3 %v5117_v35 }
  0x44   :  { %v5853_v33 = vld [vmem:[%s9390_s4 + $0x5c] sm:$0xf0] }
  0x45   :  { %v4540_v36 = vld [vmem:[%s9390_s4 + $0x240] sm:$0xf]  ;;  %v4285_v49 = vor.u32 %v5853_v33, %v4284_v32  ;;  %1885 = vmatpush.bf16.msrb.mxu1 %v4573_v39 }
  0x46   :  { %v4828_v37 = vld [vmem:[%s9390_s4 + $0x480] sm:$0xf] }
  0x47   :  { %v5989_v38 = vld [vmem:[%s9390_s4 + $0x49c] sm:$0xf0] }
  0x48   :  { %v5917_v40 = vld [vmem:[%s9390_s4 + $0x25c] sm:$0xf0]  ;;  %v4829_v45 = vor.u32 %v5989_v38, %v4828_v37 }
  0x49   :  { %v5084_v41 = vld [vmem:[%s9390_s4 + $0x680] sm:$0xf]  ;;  %v4541_v52 = vor.u32 %v5917_v40, %v4540_v36 }
  0x4a   :  { %v6053_v42 = vld [vmem:[%s9390_s4 + $0x69c] sm:$0xf0] }
  0x4b   :  { %v4796_v43 = vld [vmem:[%s9390_s4 + $0x440] sm:$0xf]  ;;  %v5085_v50 = vor.u32 %v6053_v42, %v5084_v41 }
  0x4c   :  { %v5981_v44 = vld [vmem:[%s9390_s4 + $0x45c] sm:$0xf0] }
  0x4d   :  { %v4252_v46 = vld [vmem:[%s9390_s4] sm:$0xf] }
  0x4e   :  { %v5845_v47 = vld [vmem:[%s9390_s4 + $0x1c] sm:$0xf0] }
  0x4f   :  { %v5052_v48 = vld [vmem:[%s9390_s4 + $0x640] sm:$0xf] }
  0x50   :  { %v4508_v51 = vld [vmem:[%s9390_s4 + $0x200] sm:$0xf] }
  0x51   :  { %v6045_v53 = vld [vmem:[%s9390_s4 + $0x65c] sm:$0xf0] }
  0x52   :  { %16 = vsyncpa [#allocation5], 0  ;;  %v5909_v54 = vld [vmem:[%s9390_s4 + $0x21c] sm:$0xf0]  ;;  %v5897_v55 = vld [vmem:[%s9390_s4 + $0x1c4] sm:$0xf]  ;;  %1899 = vmatpush.bf16.msrb.mxu2 %v4829_v45  ;;  %v4797_v59 = vor.u32 %v5981_v44, %v4796_v43  ;;  %1872 = vmatpush.bf16.msrb.mxu0 %v4285_v49  ;;  %v4253_v60 = vor.u32 %v5845_v47, %v4252_v46  ;;  %v5053_v61 = vor.u32 %v6045_v53, %v5052_v48 }
  0x53   :  { %v4478_v56 = vld [vmem:[%s9390_s4 + $0x1e0] sm:$0xf0]  ;;  %1913 = vmatpush.bf16.msrb.mxu3 %v5085_v50  ;;  %v4764_v63 = vld [vmem:[%s9390_s4 + $0x400] sm:$0xf]  ;;  %1886 = vmatpush.bf16.msrb.mxu1 %v4541_v52  ;;  %v4509_v2 = vor.u32 %v5909_v54, %v4508_v51  ;;  %s6324_s23 = smov 120   ;;  %vm3426_vm0 = vcmask 64512  }
  0x54   :  { %v5961_v57 = vld [vmem:[%s9390_s4 + $0x3c4] sm:$0xf]  ;;  %v5973_v0 = vld [vmem:[%s9390_s4 + $0x41c] sm:$0xf0]  ;;  %v4481_v3 = vor.u32 %v5897_v55, %v4478_v56  ;;  %vm3509_vm1 = vcmask 130048   ;;  %vm3549_vm2 = vcmask 523264  }
  0x55   :  { %v4734_v58 = vld [vmem:[%s9390_s4 + $0x3e0] sm:$0xf0]  ;;  %v5020_v1 = vld [vmem:[%s9390_s4 + $0x600] sm:$0xf]  ;;  %v4765_v13 = vor.u32 %v5973_v0, %v4764_v63  ;;  %vm3686_vm3 = vcmask 261120   ;;  %s6326_s16 = smov 32  }
  0x56   :  { %v5889_v62 = vld [vmem:[%s9390_s4 + $0x184] sm:$0xf]  ;;  %v6037_v4 = vld [vmem:[%s9390_s4 + $0x61c] sm:$0xf0]  ;;  %v4737_v7 = vor.u32 %v5961_v57, %v4734_v58  ;;  %1900 = vmatpush.bf16.msrb.mxu2 %v4797_v59  ;;  %1873 = vmatpush.bf16.msrb.mxu0 %v4253_v60  ;;  %s6328_s11 = smov [#allocation2]   ;;  %s4093_s15 = sshll.u32 %s9394_s8, 4  ;;  %s4094_s15 = int_to_ptr.hbm [resolvable:$true] %s4093_s15 }
  0x57   :  { %v6025_v5 = vld [vmem:[%s9390_s4 + $0x5c4] sm:$0xf]  ;;  %1914 = vmatpush.bf16.msrb.mxu3 %v5053_v61  ;;  %v5021_v14 = vor.u32 %v6037_v4, %v5020_v1  ;;  %1887 = vmatpush.bf16.msrb.mxu1 %v4509_v2  ;;  %s4091_s12 = sshll.u32 %s6328_s11, 4  ;;  %s4104_s17 = sshll.u32 %s9395_s9, 4  ;;  %s4092_s12 = int_to_ptr.vmem [resolvable:$true] %s4091_s12  ;;  %s4105_s17 = int_to_ptr.hbm [resolvable:$true] %s4104_s17 }
  0x58   :  { %v4990_v6 = vld [vmem:[%s9390_s4 + $0x5e0] sm:$0xf0] }
  0x59   :  { %v4446_v8 = vld [vmem:[%s9390_s4 + $0x1a0] sm:$0xf0]  ;;  %v4993_v15 = vor.u32 %v6025_v5, %v4990_v6 }
  0x5a   :  { %v6089_v9 = vld [vmem:[%s9390_s4 + $0x7c4] sm:$0xf]  ;;  %1922 = vmatpush.bf16.msra.mxu0 %v4481_v3  ;;  %v4449_v16 = vor.u32 %v5889_v62, %v4446_v8  ;;  %1901 = vmatpush.bf16.msrb.mxu2 %v4765_v13 }
  0x5b   :  { %v5246_v10 = vld [vmem:[%s9390_s4 + $0x7e0] sm:$0xf0]  ;;  %1936 = vmatpush.bf16.msra.mxu1 %v4737_v7  ;;  %1915 = vmatpush.bf16.msrb.mxu3 %v5021_v14 }
  0x5c   :  { %v5953_v11 = vld [vmem:[%s9390_s4 + $0x384] sm:$0xf]  ;;  %v5249_v17 = vor.u32 %v6089_v9, %v5246_v10 }
  0x5d   :  { %v4702_v12 = vld [vmem:[%s9390_s4 + $0x3a0] sm:$0xf0] }
  0x5e   :  { %v5881_v18 = vld [vmem:[%s9390_s4 + $0x144] sm:$0xf]  ;;  %v4705_v21 = vor.u32 %v5953_v11, %v4702_v12  ;;  %1950 = vmatpush.bf16.msra.mxu2 %v4993_v15  ;;  %1923 = vmatpush.bf16.msra.mxu0 %v4449_v16 }
  0x5f   :  { %v6017_v19 = vld [vmem:[%s9390_s4 + $0x584] sm:$0xf]  ;;  %1964 = vmatpush.bf16.msra.mxu3 %v5249_v17 }
  0x60   :  { %v4958_v20 = vld [vmem:[%s9390_s4 + $0x5a0] sm:$0xf0]  ;;  %1937 = vmatpush.bf16.msra.mxu1 %v4705_v21 }
  0x61   :  { %v4414_v22 = vld [vmem:[%s9390_s4 + $0x160] sm:$0xf0]  ;;  %v4961_v27 = vor.u32 %v6017_v19, %v4958_v20 }
  0x62   :  { %v6081_v23 = vld [vmem:[%s9390_s4 + $0x784] sm:$0xf]  ;;  %v4417_v28 = vor.u32 %v5881_v18, %v4414_v22 }
  0x63   :  { %v5214_v24 = vld [vmem:[%s9390_s4 + $0x7a0] sm:$0xf0]  ;;  %1951 = vmatpush.bf16.msra.mxu2 %v4961_v27 }
  0x64   :  { %v5945_v25 = vld [vmem:[%s9390_s4 + $0x344] sm:$0xf]  ;;  %v5217_v29 = vor.u32 %v6081_v23, %v5214_v24  ;;  %1924 = vmatpush.bf16.msra.mxu0 %v4417_v28 }
  0x65   :  { %v4670_v26 = vld [vmem:[%s9390_s4 + $0x360] sm:$0xf0] }
  0x66   :  { %v4673_v30 = vor.u32 %v5945_v25, %v4670_v26  ;;  %v5873_v31 = vld [vmem:[%s9390_s4 + $0x104] sm:$0xf]  ;;  %1965 = vmatpush.bf16.msra.mxu3 %v5217_v29 }
  0x67   :  { %v4382_v32 = vld [vmem:[%s9390_s4 + $0x120] sm:$0xf0] }
  0x68   :  { %v5937_v33 = vld [vmem:[%s9390_s4 + $0x304] sm:$0xf]  ;;  %v4385_v35 = vor.u32 %v5873_v31, %v4382_v32  ;;  %1938 = vmatpush.bf16.msra.mxu1 %v4673_v30 }
  0x69   :  { %v4638_v34 = vld [vmem:[%s9390_s4 + $0x320] sm:$0xf0] }
  0x6a   :  { %v4641_v36 = vor.u32 %v5937_v33, %v4638_v34  ;;  %1925 = vmatpush.bf16.msra.mxu0 %v4385_v35  ;;  %v6009_v37 = vld [vmem:[%s9390_s4 + $0x544] sm:$0xf]  ;;  %v33_v33 = vld [vmem:[%s9392_s6] sm:$0xf] }
  0x6b   :  { %v4926_v38 = vld [vmem:[%s9390_s4 + $0x560] sm:$0xf0]  ;;  %v71_v35 = vperm.slane %v33_v33, 0 }
  0x6c   :  { %1939 = vmatpush.bf16.msra.mxu1 %v4641_v36  ;;  %v6073_v39 = vld [vmem:[%s9390_s4 + $0x744] sm:$0xf]  ;;  %v4929_v40 = vor.u32 %v6009_v37, %v4926_v38  ;;  %v72_v37 = vperm.slane %v33_v33, 1 }
  0x6d   :  { %v5182_v41 = vld [vmem:[%s9390_s4 + $0x760] sm:$0xf0] }
  0x6e   :  { %v5185_v42 = vor.u32 %v6073_v39, %v5182_v41  ;;  %v5865_v43 = vld [vmem:[%s9390_s4 + $0xc4] sm:$0xf]  ;;  %1952 = vmatpush.bf16.msra.mxu2 %v4929_v40 }
  0x6f   :  { %v4350_v44 = vld [vmem:[%s9390_s4 + $0xe0] sm:$0xf0] }
  0x70   :  { %v5929_v45 = vld [vmem:[%s9390_s4 + $0x2c4] sm:$0xf]  ;;  %v4353_v46 = vor.u32 %v5865_v43, %v4350_v44  ;;  %1966 = vmatpush.bf16.msra.mxu3 %v5185_v42 }
  0x71   :  { %v4606_v47 = vld [vmem:[%s9390_s4 + $0x2e0] sm:$0xf0] }
  0x72   :  { %v4609_v48 = vor.u32 %v5929_v45, %v4606_v47  ;;  %v6001_v49 = vld [vmem:[%s9390_s4 + $0x504] sm:$0xf]  ;;  %1926 = vmatpush.bf16.msra.mxu0 %v4353_v46  ;;  %v4484_v46 = vld [vmem:[%s9390_s4 + $0x1c8] sm:$0xf] }
  0x73   :  { %v4894_v50 = vld [vmem:[%s9390_s4 + $0x520] sm:$0xf0]  ;;  %v5902_v47 = vld [vmem:[%s9390_s4 + $0x1e4] sm:$0xf0] }
  0x74   :  { %v4897_v51 = vor.u32 %v6001_v49, %v4894_v50  ;;  %v6065_v52 = vld [vmem:[%s9390_s4 + $0x704] sm:$0xf]  ;;  %1940 = vmatpush.bf16.msra.mxu1 %v4609_v48  ;;  %v73_v49 = vperm.slane %v33_v33, 2 }
  0x75   :  { %v5150_v53 = vld [vmem:[%s9390_s4 + $0x720] sm:$0xf0] }
  0x76   :  { %v5153_v54 = vor.u32 %v6065_v52, %v5150_v53  ;;  %v5857_v55 = vld [vmem:[%s9390_s4 + $0x84] sm:$0xf]  ;;  %1953 = vmatpush.bf16.msra.mxu2 %v4897_v51  ;;  %v4740_v51 = vld [vmem:[%s9390_s4 + $0x3c8] sm:$0xf]  ;;  %v74_v53 = vperm.slane %v33_v33, 3 }
  0x77   :  { %v4318_v56 = vld [vmem:[%s9390_s4 + $0xa0] sm:$0xf0]  ;;  %v5966_v52 = vld [vmem:[%s9390_s4 + $0x3e4] sm:$0xf0] }
  0x78   :  { %v5921_v57 = vld [vmem:[%s9390_s4 + $0x284] sm:$0xf]  ;;  %v4321_v58 = vor.u32 %v5857_v55, %v4318_v56  ;;  %1967 = vmatpush.bf16.msra.mxu3 %v5153_v54  ;;  %v4485_v56 = vor.u32 %v5902_v47, %v4484_v46  ;;  %v5942_v33 = vld [vmem:[%s9390_s4 + $0x324] sm:$0xf0] }
  0x79   :  { %v4574_v59 = vld [vmem:[%s9390_s4 + $0x2a0] sm:$0xf0] }
  0x7a   :  { %v4577_v60 = vor.u32 %v5921_v57, %v4574_v59  ;;  %v5993_v61 = vld [vmem:[%s9390_s4 + $0x4c4] sm:$0xf]  ;;  %1927 = vmatpush.bf16.msra.mxu0 %v4321_v58  ;;  %v4741_v58 = vor.u32 %v5966_v52, %v4740_v51  ;;  %v4452_v59 = vld [vmem:[%s9390_s4 + $0x188] sm:$0xf] }
  0x7b   :  { %v4862_v62 = vld [vmem:[%s9390_s4 + $0x4e0] sm:$0xf0]  ;;  %v5156_v52 = vld [vmem:[%s9390_s4 + $0x708] sm:$0xf] }
  0x7c   :  { %v6057_v63 = vld [vmem:[%s9390_s4 + $0x6c4] sm:$0xf]  ;;  %v4865_v0 = vor.u32 %v5993_v61, %v4862_v62  ;;  %1941 = vmatpush.bf16.msra.mxu1 %v4577_v60  ;;  %v5894_v60 = vld [vmem:[%s9390_s4 + $0x1a4] sm:$0xf0] }
  0x7d   :  { %v5118_v1 = vld [vmem:[%s9390_s4 + $0x6e0] sm:$0xf0] }
  0x7e   :  { %v5121_v2 = vor.u32 %v6057_v63, %v5118_v1  ;;  %v5849_v3 = vld [vmem:[%s9390_s4 + $0x44] sm:$0xf]  ;;  %1954 = vmatpush.bf16.msra.mxu2 %v4865_v0  ;;  %v4708_v63 = vld [vmem:[%s9390_s4 + $0x388] sm:$0xf] }
  0x7f   :  { %v4286_v4 = vld [vmem:[%s9390_s4 + $0x60] sm:$0xf0]  ;;  %v5958_v0 = vld [vmem:[%s9390_s4 + $0x3a4] sm:$0xf0] }
  0x80   :  { %v4289_v5 = vor.u32 %v5849_v3, %v4286_v4  ;;  %v5913_v6 = vld [vmem:[%s9390_s4 + $0x244] sm:$0xf]  ;;  %1968 = vmatpush.bf16.msra.mxu3 %v5121_v2 }
  0x81   :  { %v4542_v7 = vld [vmem:[%s9390_s4 + $0x260] sm:$0xf0] }
  0x82   :  { %v4545_v8 = vor.u32 %v5913_v6, %v4542_v7  ;;  %v5985_v9 = vld [vmem:[%s9390_s4 + $0x484] sm:$0xf]  ;;  %1928 = vmatpush.bf16.msra.mxu0 %v4289_v5  ;;  %v4453_v5 = vor.u32 %v5894_v60, %v4452_v59  ;;  %v4996_v6 = vld [vmem:[%s9390_s4 + $0x5c8] sm:$0xf] }
  0x83   :  { %v4830_v10 = vld [vmem:[%s9390_s4 + $0x4a0] sm:$0xf0]  ;;  %v6030_v7 = vld [vmem:[%s9390_s4 + $0x5e4] sm:$0xf0] }
  0x84   :  { %v6049_v11 = vld [vmem:[%s9390_s4 + $0x684] sm:$0xf]  ;;  %v4833_v12 = vor.u32 %v5985_v9, %v4830_v10  ;;  %1942 = vmatpush.bf16.msra.mxu1 %v4545_v8  ;;  %v5252_v8 = vld [vmem:[%s9390_s4 + $0x7c8] sm:$0xf]  ;;  %v4709_v10 = vor.u32 %v5958_v0, %v4708_v63 }
  0x85   :  { %v5086_v13 = vld [vmem:[%s9390_s4 + $0x6a0] sm:$0xf0]  ;;  %v5998_v63 = vld [vmem:[%s9390_s4 + $0x4e4] sm:$0xf0] }
  0x86   :  { %v5089_v14 = vor.u32 %v6049_v11, %v5086_v13  ;;  %v5841_v15 = vld [vmem:[%s9390_s4 + $0x4] sm:$0xf]  ;;  %1955 = vmatpush.bf16.msra.mxu2 %v4833_v12  ;;  %v6094_v11 = vld [vmem:[%s9390_s4 + $0x7e4] sm:$0xf0] }
  0x87   :  { %v4254_v16 = vld [vmem:[%s9390_s4 + $0x20] sm:$0xf0]  ;;  %v4420_v12 = vld [vmem:[%s9390_s4 + $0x148] sm:$0xf] }
  0x88   :  { %v5905_v17 = vld [vmem:[%s9390_s4 + $0x204] sm:$0xf]  ;;  %v4257_v18 = vor.u32 %v5841_v15, %v4254_v16  ;;  %1969 = vmatpush.bf16.msra.mxu3 %v5089_v14  ;;  %v5886_v13 = vld [vmem:[%s9390_s4 + $0x164] sm:$0xf0] }
  0x89   :  { %v4510_v19 = vld [vmem:[%s9390_s4 + $0x220] sm:$0xf0]  ;;  %v4676_v16 = vld [vmem:[%s9390_s4 + $0x348] sm:$0xf] }
  0x8a   :  { %v4513_v20 = vor.u32 %v5905_v17, %v4510_v19  ;;  %v5977_v21 = vld [vmem:[%s9390_s4 + $0x444] sm:$0xf]  ;;  %1929 = vmatpush.bf16.msra.mxu0 %v4257_v18  ;;  %v5950_v17 = vld [vmem:[%s9390_s4 + $0x364] sm:$0xf0] }
  0x8b   :  { %v4798_v22 = vld [vmem:[%s9390_s4 + $0x460] sm:$0xf0] }
  0x8c   :  { %v6041_v23 = vld [vmem:[%s9390_s4 + $0x644] sm:$0xf]  ;;  %1943 = vmatpush.bf16.msra.mxu1 %v4513_v20  ;;  %v4801_v25 = vor.u32 %v5977_v21, %v4798_v22  ;;  %v4997_v20 = vor.u32 %v6030_v7, %v4996_v6  ;;  %v5253_v22 = vor.u32 %v6094_v11, %v5252_v8  ;;  %v4548_v6 = vld [vmem:[%s9390_s4 + $0x248] sm:$0xf] }
  0x8d   :  { %v5054_v24 = vld [vmem:[%s9390_s4 + $0x660] sm:$0xf0]  ;;  %v5918_v7 = vld [vmem:[%s9390_s4 + $0x264] sm:$0xf0] }
  0x8e   :  { %v5057_v26 = vor.u32 %v6041_v23, %v5054_v24  ;;  %1956 = vmatpush.bf16.msra.mxu2 %v4801_v25  ;;  %v5969_v27 = vld [vmem:[%s9390_s4 + $0x404] sm:$0xf]  ;;  %v4421_v23 = vor.u32 %v5886_v13, %v4420_v12  ;;  %v4964_v24 = vld [vmem:[%s9390_s4 + $0x588] sm:$0xf] }
  0x8f   :  { %v4766_v28 = vld [vmem:[%s9390_s4 + $0x420] sm:$0xf0]  ;;  %v6022_v25 = vld [vmem:[%s9390_s4 + $0x5a4] sm:$0xf0] }
  0x90   :  { %1970 = vmatpush.bf16.msra.mxu3 %v5057_v26  ;;  %v4769_v29 = vor.u32 %v5969_v27, %v4766_v28  ;;  %v6033_v30 = vld [vmem:[%s9390_s4 + $0x604] sm:$0xf]  ;;  %v5220_v26 = vld [vmem:[%s9390_s4 + $0x788] sm:$0xf]  ;;  %v4677_v28 = vor.u32 %v5950_v17, %v4676_v16 }
  0x91   :  { %v5022_v31 = vld [vmem:[%s9390_s4 + $0x620] sm:$0xf0]  ;;  %v5990_v11 = vld [vmem:[%s9390_s4 + $0x4a4] sm:$0xf0] }
  0x92   :  { %v5025_v32 = vor.u32 %v6033_v30, %v5022_v31  ;;  %1957 = vmatpush.bf16.msra.mxu2 %v4769_v29  ;;  %v6086_v29 = vld [vmem:[%s9390_s4 + $0x7a4] sm:$0xf0] }
  0x93   :  { %v4388_v30 = vld [vmem:[%s9390_s4 + $0x108] sm:$0xf] }
  0x94   :  { %1971 = vmatpush.bf16.msra.mxu3 %v5025_v32  ;;  %v5878_v31 = vld [vmem:[%s9390_s4 + $0x124] sm:$0xf0] }
  0x95   :  { %v4644_v32 = vld [vmem:[%s9390_s4 + $0x308] sm:$0xf] }
  0x96   :  { %v5092_v12 = vld [vmem:[%s9390_s4 + $0x688] sm:$0xf] }
  0x97   :  { %v4260_v16 = vld [vmem:[%s9390_s4 + $0x8] sm:$0xf] }
  0x98   :  { %v5846_v17 = vld [vmem:[%s9390_s4 + $0x24] sm:$0xf0] }
  0xa0   :  { %v254_v34 = vpop.f32.mrf.mxu0 }
  0xa1   :  { %v268_v36 = vpop.f32.mrf.mxu1  ;;  %v255_v38 = vadd.f32 %v254_v34, %v71_v35  ;;  %v4965_v34 = vor.u32 %v6022_v25, %v4964_v24  ;;  %v5962_v24 = vld [vmem:[%s9390_s4 + $0x3cc] sm:$0xf] }
  0xa2   :  { %v269_v39 = vadd.f32 %v268_v36, %v72_v37  ;;  %v4389_v36 = vor.u32 %v5878_v31, %v4388_v30  ;;  %v4742_v25 = vld [vmem:[%s9390_s4 + $0x3e8] sm:$0xf0]  ;;  %v4261_v30 = vor.u32 %v5846_v17, %v4260_v16 }
  0xa3   :  { %v301_v43 = vmax.f32 %v255_v38, 0.0  ;;  %v6014_v38 = vld [vmem:[%s9390_s4 + $0x564] sm:$0xf0]  ;;  %v5866_v16 = vld [vmem:[%s9390_s4 + $0xcc] sm:$0xf] }
  0xa4   :  { %v302_v48 = vmax.f32 %v269_v39, 0.0  ;;  %v4645_v39 = vor.u32 %v5942_v33, %v4644_v32  ;;  %v5060_v32 = vld [vmem:[%s9390_s4 + $0x648] sm:$0xf]  ;;  %v4358_v17 = vld [vmem:[%s9390_s4 + $0xe8] sm:$0xf0] }
  0xa5   :  { %v6046_v33 = vld [vmem:[%s9390_s4 + $0x664] sm:$0xf0] }
  0xa8   :  { %v282_v40 = vpop.f32.mrf.mxu2  ;;  %v256_v42 = vpop.f32.mrf.mxu0 }
  0xa9   :  { %v296_v41 = vpop.f32.mrf.mxu3  ;;  %v257_v44 = vadd.f32 %v256_v42, %v71_v35  ;;  %v270_v45 = vpop.f32.mrf.mxu1  ;;  %v283_v61 = vadd.f32 %v282_v40, %v73_v49  ;;  %v5221_v35 = vor.u32 %v6086_v29, %v5220_v26  ;;  %v5188_v40 = vld [vmem:[%s9390_s4 + $0x748] sm:$0xf] }
  0xaa   :  { %v271_v50 = vadd.f32 %v270_v45, %v72_v37  ;;  %v297_v1 = vadd.f32 %v296_v41, %v74_v53  ;;  %v4932_v37 = vld [vmem:[%s9390_s4 + $0x548] sm:$0xf] }
  0xab   :  { %v305_v54 = vmax.f32 %v257_v44, 0.0  ;;  %v303_v14 = vmax.f32 %v283_v61, 0.0  ;;  %v6078_v41 = vld [vmem:[%s9390_s4 + $0x764] sm:$0xf0]  ;;  %v4933_v46 = vor.u32 %v6014_v38, %v4932_v37  ;;  %v4454_v38 = vld [vmem:[%s9390_s4 + $0x1a8] sm:$0xf0] }
  0xac   :  { %v306_v55 = vmax.f32 %v271_v50, 0.0  ;;  %v304_v18 = vmax.f32 %v297_v1, 0.0  ;;  %v4356_v42 = vld [vmem:[%s9390_s4 + $0xc8] sm:$0xf]  ;;  %v5189_v47 = vor.u32 %v6078_v41, %v5188_v40  ;;  %v4710_v40 = vld [vmem:[%s9390_s4 + $0x3a8] sm:$0xf0]  ;;  %v5061_v41 = vor.u32 %v6046_v33, %v5060_v32 }
  0xad   :  { %v6974_v57 = vpack.c.bf16 %v305_v54, %v301_v43  ;;  %v5870_v43 = vld [vmem:[%s9390_s4 + $0xe4] sm:$0xf0]  ;;  %v5922_v32 = vld [vmem:[%s9390_s4 + $0x28c] sm:$0xf] }
  0xae   :  { %v6982_v62 = vpack.c.bf16 %v306_v55, %v302_v48  ;;  %v4612_v44 = vld [vmem:[%s9390_s4 + $0x2c8] sm:$0xf]  ;;  %v4357_v50 = vor.u32 %v5870_v43, %v4356_v42  ;;  %v4582_v33 = vld [vmem:[%s9390_s4 + $0x2a8] sm:$0xf0] }
  0xaf   :  { %1874 = vmatmul.bf16.vlgmr.msrb.gmra.mxu0 %v6974_v57  ;;  %v5934_v45 = vld [vmem:[%s9390_s4 + $0x2e4] sm:$0xf0] }
  0xb0   :  { %v284_v2 = vpop.f32.mrf.mxu2  ;;  %1888 = vmatmul.bf16.vlgmr.msrb.gmra.mxu1 %v6982_v62  ;;  %1978 = vmatpush.bf16.msrb.mxu0 %v4485_v56  ;;  %v4900_v48 = vld [vmem:[%s9390_s4 + $0x508] sm:$0xf]  ;;  %v4613_v51 = vor.u32 %v5934_v45, %v4612_v44 }
  0xb1   :  { %v285_v3 = vadd.f32 %v284_v2, %v73_v49  ;;  %v298_v4 = vpop.f32.mrf.mxu3  ;;  %1992 = vmatpush.bf16.msrb.mxu1 %v4741_v58  ;;  %v6006_v49 = vld [vmem:[%s9390_s4 + $0x524] sm:$0xf0] }
  0xb2   :  { %v299_v9 = vadd.f32 %v298_v4, %v74_v53  ;;  %v6070_v53 = vld [vmem:[%s9390_s4 + $0x724] sm:$0xf0]  ;;  %v4901_v59 = vor.u32 %v6006_v49, %v4900_v48 }
  0xb3   :  { %v307_v15 = vmax.f32 %v285_v3, 0.0  ;;  %v4324_v54 = vld [vmem:[%s9390_s4 + $0x88] sm:$0xf]  ;;  %v5157_v60 = vor.u32 %v6070_v53, %v5156_v52  ;;  %v5882_v52 = vld [vmem:[%s9390_s4 + $0x14c] sm:$0xf] }
  0xb4   :  { %v308_v19 = vmax.f32 %v299_v9, 0.0  ;;  %1979 = vmatpush.bf16.msrb.mxu0 %v4453_v5  ;;  %v5862_v55 = vld [vmem:[%s9390_s4 + $0xa4] sm:$0xf0] }
  0xb5   :  { %v7016_v21 = vpack.c.bf16 %v307_v15, %v303_v14  ;;  %1993 = vmatpush.bf16.msrb.mxu1 %v4709_v10  ;;  %v4580_v56 = vld [vmem:[%s9390_s4 + $0x288] sm:$0xf]  ;;  %v4325_v0 = vor.u32 %v5862_v55, %v4324_v54  ;;  %v4549_v14 = vor.u32 %v5918_v7, %v4548_v6  ;;  %v4422_v54 = vld [vmem:[%s9390_s4 + $0x168] sm:$0xf0] }
  0xb6   :  { %v7027_v27 = vpack.c.bf16 %v308_v19, %v304_v18  ;;  %v5926_v58 = vld [vmem:[%s9390_s4 + $0x2a4] sm:$0xf0]  ;;  %v5946_v55 = vld [vmem:[%s9390_s4 + $0x34c] sm:$0xf] }
  0xb7   :  { %1902 = vmatmul.bf16.vlgmr.msrb.gmra.mxu2 %v7016_v21  ;;  %v4868_v61 = vld [vmem:[%s9390_s4 + $0x4c8] sm:$0xf]  ;;  %v4581_v1 = vor.u32 %v5926_v58, %v4580_v56  ;;  %v4678_v56 = vld [vmem:[%s9390_s4 + $0x368] sm:$0xf0] }
  0xb8   :  { %1916 = vmatmul.bf16.vlgmr.msrb.gmra.mxu3 %v7027_v27  ;;  %2006 = vmatpush.bf16.msrb.mxu2 %v4997_v20  ;;  %v5124_v2 = vld [vmem:[%s9390_s4 + $0x6c8] sm:$0xf]  ;;  %v4869_v8 = vor.u32 %v5998_v63, %v4868_v61  ;;  %v5898_v20 = vld [vmem:[%s9390_s4 + $0x1cc] sm:$0xf] }
  0xb9   :  { %2020 = vmatpush.bf16.msrb.mxu3 %v5253_v22  ;;  %1980 = vmatpush.bf16.msrb.mxu0 %v4421_v23  ;;  %v6062_v3 = vld [vmem:[%s9390_s4 + $0x6e4] sm:$0xf0]  ;;  %v4486_v23 = vld [vmem:[%s9390_s4 + $0x1e8] sm:$0xf0] }
  0xba   :  { %1994 = vmatpush.bf16.msrb.mxu1 %v4677_v28  ;;  %v4292_v4 = vld [vmem:[%s9390_s4 + $0x48] sm:$0xf]  ;;  %v5125_v9 = vor.u32 %v6062_v3, %v5124_v2  ;;  %v6018_v61 = vld [vmem:[%s9390_s4 + $0x58c] sm:$0xf] }
  0xbb   :  { %v5854_v5 = vld [vmem:[%s9390_s4 + $0x64] sm:$0xf0]  ;;  %v4966_v63 = vld [vmem:[%s9390_s4 + $0x5a8] sm:$0xf0] }
  0xbc   :  { %2007 = vmatpush.bf16.msrb.mxu2 %v4965_v34  ;;  %v4836_v10 = vld [vmem:[%s9390_s4 + $0x488] sm:$0xf]  ;;  %v4293_v13 = vor.u32 %v5854_v5, %v4292_v4  ;;  %v4489_v34 = vor.u32 %v5898_v20, %v4486_v23  ;;  %v6082_v2 = vld [vmem:[%s9390_s4 + $0x78c] sm:$0xf] }
  0xbd   :  { %2021 = vmatpush.bf16.msrb.mxu3 %v5221_v35  ;;  %1981 = vmatpush.bf16.msrb.mxu0 %v4389_v36  ;;  %v6054_v15 = vld [vmem:[%s9390_s4 + $0x6a4] sm:$0xf0]  ;;  %v4837_v22 = vor.u32 %v5990_v11, %v4836_v10  ;;  %v4745_v35 = vor.u32 %v5962_v24, %v4742_v25  ;;  %v5890_v36 = vld [vmem:[%s9390_s4 + $0x18c] sm:$0xf]  ;;  %v4361_v25 = vor.u32 %v5866_v16, %v4358_v17 }
  0xbe   :  { %1995 = vmatpush.bf16.msrb.mxu1 %v4645_v39  ;;  %v4516_v18 = vld [vmem:[%s9390_s4 + $0x208] sm:$0xf]  ;;  %v5093_v26 = vor.u32 %v6054_v15, %v5092_v12  ;;  %v5954_v39 = vld [vmem:[%s9390_s4 + $0x38c] sm:$0xf]  ;;  %v4457_v48 = vor.u32 %v5890_v36, %v4454_v38 }
  0xbf   :  { %1930 = vmatmul.bf16.vlgmr.msra.gmra.mxu0 %v6974_v57  ;;  %v5910_v19 = vld [vmem:[%s9390_s4 + $0x224] sm:$0xf0]  ;;  %v4713_v49 = vor.u32 %v5954_v39, %v4710_v40  ;;  %v5222_v3 = vld [vmem:[%s9390_s4 + $0x7a8] sm:$0xf0]  ;;  %v4585_v39 = vor.u32 %v5922_v32, %v4582_v33  ;;  %v4684_v33 = vld [vmem:[%s9390_s4 + $0x350] sm:$0xf] }
  0xc0   :  { %2008 = vmatpush.bf16.msrb.mxu2 %v4933_v46  ;;  %1944 = vmatmul.bf16.vlgmr.msra.gmra.mxu1 %v6982_v62  ;;  %v4804_v28 = vld [vmem:[%s9390_s4 + $0x448] sm:$0xf]  ;;  %v4517_v31 = vor.u32 %v5910_v19, %v4516_v18  ;;  %v6026_v46 = vld [vmem:[%s9390_s4 + $0x5cc] sm:$0xf] }
  0xc1   :  { %2022 = vmatpush.bf16.msrb.mxu3 %v5189_v47  ;;  %1982 = vmatpush.bf16.msrb.mxu0 %v4357_v50  ;;  %v5982_v29 = vld [vmem:[%s9390_s4 + $0x464] sm:$0xf0]  ;;  %v4998_v47 = vld [vmem:[%s9390_s4 + $0x5e8] sm:$0xf0] }
  0xc2   :  { %1996 = vmatpush.bf16.msrb.mxu1 %v4613_v51  ;;  %v4805_v37 = vor.u32 %v5982_v29, %v4804_v28  ;;  %v4772_v42 = vld [vmem:[%s9390_s4 + $0x408] sm:$0xf]  ;;  %v6090_v50 = vld [vmem:[%s9390_s4 + $0x7cc] sm:$0xf] }
  0xc3   :  { %v5974_v43 = vld [vmem:[%s9390_s4 + $0x424] sm:$0xf0]  ;;  %v5254_v51 = vld [vmem:[%s9390_s4 + $0x7e8] sm:$0xf0] }
  0xc4   :  { %2009 = vmatpush.bf16.msrb.mxu2 %v4901_v59  ;;  %v5028_v44 = vld [vmem:[%s9390_s4 + $0x608] sm:$0xf]  ;;  %v4773_v53 = vor.u32 %v5974_v43, %v4772_v42  ;;  %v5001_v59 = vor.u32 %v6026_v46, %v4998_v47  ;;  %v5874_v4 = vld [vmem:[%s9390_s4 + $0x10c] sm:$0xf] }
  0xc5   :  { %2023 = vmatpush.bf16.msrb.mxu3 %v5157_v60  ;;  %1983 = vmatpush.bf16.msrb.mxu0 %v4325_v0  ;;  %v6038_v45 = vld [vmem:[%s9390_s4 + $0x624] sm:$0xf0]  ;;  %v5257_v60 = vor.u32 %v6090_v50, %v5254_v51  ;;  %v4425_v0 = vor.u32 %v5882_v52, %v4422_v54  ;;  %v4390_v5 = vld [vmem:[%s9390_s4 + $0x128] sm:$0xf0] }
  0xc6   :  { %1997 = vmatpush.bf16.msrb.mxu1 %v4581_v1  ;;  %v5029_v58 = vor.u32 %v6038_v45, %v5028_v44  ;;  %v4681_v1 = vor.u32 %v5946_v55, %v4678_v56  ;;  %v5938_v6 = vld [vmem:[%s9390_s4 + $0x30c] sm:$0xf]  ;;  %v4393_v12 = vor.u32 %v5874_v4, %v4390_v5 }
  0xc7   :  { %1958 = vmatmul.bf16.vlgmr.msra.gmra.mxu2 %v7016_v21  ;;  %v4646_v7 = vld [vmem:[%s9390_s4 + $0x328] sm:$0xf0] }
  0xc8   :  { %1972 = vmatmul.bf16.vlgmr.msra.gmra.mxu3 %v7027_v27  ;;  %2010 = vmatpush.bf16.msrb.mxu2 %v4869_v8  ;;  %v4969_v8 = vor.u32 %v6018_v61, %v4966_v63  ;;  %v6010_v10 = vld [vmem:[%s9390_s4 + $0x54c] sm:$0xf]  ;;  %v5903_v61 = vld [vmem:[%s9390_s4 + $0x1ec] sm:$0xf0] }
  0xc9   :  { %2024 = vmatpush.bf16.msrb.mxu3 %v5125_v9  ;;  %1984 = vmatpush.bf16.msrb.mxu0 %v4293_v13  ;;  %v5225_v9 = vor.u32 %v6082_v2, %v5222_v3  ;;  %v4934_v11 = vld [vmem:[%s9390_s4 + $0x568] sm:$0xf0]  ;;  %v4649_v13 = vor.u32 %v5938_v6, %v4646_v7  ;;  %v4748_v63 = vld [vmem:[%s9390_s4 + $0x3d0] sm:$0xf] }
  0xca   :  { %1998 = vmatpush.bf16.msrb.mxu1 %v4549_v14  ;;  %v6074_v14 = vld [vmem:[%s9390_s4 + $0x74c] sm:$0xf]  ;;  %v4937_v20 = vor.u32 %v6010_v10, %v4934_v11  ;;  %v4460_v10 = vld [vmem:[%s9390_s4 + $0x190] sm:$0xf] }
  0xcb   :  { %v5190_v15 = vld [vmem:[%s9390_s4 + $0x768] sm:$0xf0] }
  0xcc   :  { %2011 = vmatpush.bf16.msrb.mxu2 %v4837_v22  ;;  %v5930_v18 = vld [vmem:[%s9390_s4 + $0x2cc] sm:$0xf]  ;;  %v5193_v22 = vor.u32 %v6074_v14, %v5190_v15  ;;  %v5959_v14 = vld [vmem:[%s9390_s4 + $0x3ac] sm:$0xf0] }
  0xcd   :  { %2025 = vmatpush.bf16.msrb.mxu3 %v5093_v26  ;;  %1985 = vmatpush.bf16.msrb.mxu0 %v4261_v30  ;;  %v4614_v19 = vld [vmem:[%s9390_s4 + $0x2e8] sm:$0xf0] }
  0xce   :  { %1999 = vmatpush.bf16.msrb.mxu1 %v4517_v31  ;;  %v6002_v23 = vld [vmem:[%s9390_s4 + $0x50c] sm:$0xf]  ;;  %v4617_v26 = vor.u32 %v5930_v18, %v4614_v19 }
  0xcf   :  { %v4902_v24 = vld [vmem:[%s9390_s4 + $0x528] sm:$0xf0] }
  0xd0   :  { %2012 = vmatpush.bf16.msrb.mxu2 %v4805_v37  ;;  %1986 = vmatmul.bf16.vlgmr.msrb.gmra.mxu0 %v6974_v57  ;;  %v6066_v28 = vld [vmem:[%s9390_s4 + $0x70c] sm:$0xf] }
  0xd1   :  { %2034 = vmatpush.bf16.msra.mxu0 %v4489_v34  ;;  %2026 = vmatpush.bf16.msrb.mxu3 %v5061_v41  ;;  %v5158_v29 = vld [vmem:[%s9390_s4 + $0x728] sm:$0xf0]  ;;  %v4905_v34 = vor.u32 %v6002_v23, %v4902_v24 }
  0xd2   :  { %2048 = vmatpush.bf16.msra.mxu1 %v4745_v35  ;;  %v5858_v30 = vld [vmem:[%s9390_s4 + $0x8c] sm:$0xf]  ;;  %v5161_v35 = vor.u32 %v6066_v28, %v5158_v29  ;;  %v4428_v29 = vld [vmem:[%s9390_s4 + $0x150] sm:$0xf] }
  0xd3   :  { %2000 = vmatmul.bf16.vlgmr.msrb.gmra.mxu1 %v6982_v62  ;;  %v4326_v31 = vld [vmem:[%s9390_s4 + $0xa8] sm:$0xf0] }
  0xd4   :  { %2013 = vmatpush.bf16.msrb.mxu2 %v4773_v53  ;;  %v5994_v36 = vld [vmem:[%s9390_s4 + $0x4cc] sm:$0xf]  ;;  %v4329_v38 = vor.u32 %v5858_v30, %v4326_v31  ;;  %v5887_v30 = vld [vmem:[%s9390_s4 + $0x16c] sm:$0xf0] }
  0xd5   :  { %2035 = vmatpush.bf16.msra.mxu0 %v4457_v48  ;;  %2027 = vmatpush.bf16.msrb.mxu3 %v5029_v58  ;;  %v4870_v37 = vld [vmem:[%s9390_s4 + $0x4e8] sm:$0xf0] }
  0xd6   :  { %2049 = vmatpush.bf16.msra.mxu1 %v4713_v49  ;;  %v6058_v40 = vld [vmem:[%s9390_s4 + $0x6cc] sm:$0xf]  ;;  %v4873_v46 = vor.u32 %v5994_v36, %v4870_v37  ;;  %v4972_v36 = vld [vmem:[%s9390_s4 + $0x590] sm:$0xf] }
  0xd7   :  { %2014 = vmatmul.bf16.vlgmr.msrb.gmra.mxu2 %v7016_v21  ;;  %v5126_v41 = vld [vmem:[%s9390_s4 + $0x6e8] sm:$0xf0]  ;;  %v6023_v37 = vld [vmem:[%s9390_s4 + $0x5ac] sm:$0xf0] }
  0xd8   :  { %2062 = vmatpush.bf16.msra.mxu2 %v5001_v59  ;;  %2028 = vmatmul.bf16.vlgmr.msrb.gmra.mxu3 %v7027_v27  ;;  %v5850_v42 = vld [vmem:[%s9390_s4 + $0x4c] sm:$0xf]  ;;  %v5129_v47 = vor.u32 %v6058_v40, %v5126_v41  ;;  %v4492_v59 = vld [vmem:[%s9390_s4 + $0x1d0] sm:$0xf] }
  0xd9   :  { %2076 = vmatpush.bf16.msra.mxu3 %v5257_v60  ;;  %2036 = vmatpush.bf16.msra.mxu0 %v4425_v0  ;;  %v4294_v43 = vld [vmem:[%s9390_s4 + $0x68] sm:$0xf0]  ;;  %v5967_v0 = vld [vmem:[%s9390_s4 + $0x3ec] sm:$0xf0] }
  0xda   :  { %2050 = vmatpush.bf16.msra.mxu1 %v4681_v1  ;;  %v5914_v44 = vld [vmem:[%s9390_s4 + $0x24c] sm:$0xf]  ;;  %v4297_v51 = vor.u32 %v5850_v42, %v4294_v43  ;;  %v6087_v40 = vld [vmem:[%s9390_s4 + $0x7ac] sm:$0xf0] }
  0xdb   :  { %v4550_v45 = vld [vmem:[%s9390_s4 + $0x268] sm:$0xf0]  ;;  %v4396_v42 = vld [vmem:[%s9390_s4 + $0x110] sm:$0xf] }
  0xdc   :  { %2063 = vmatpush.bf16.msra.mxu2 %v4969_v8  ;;  %v5986_v48 = vld [vmem:[%s9390_s4 + $0x48c] sm:$0xf]  ;;  %v4553_v52 = vor.u32 %v5914_v44, %v4550_v45  ;;  %v4493_v8 = vor.u32 %v5903_v61, %v4492_v59  ;;  %v5879_v43 = vld [vmem:[%s9390_s4 + $0x12c] sm:$0xf0]  ;;  %v4973_v44 = vor.u32 %v6023_v37, %v4972_v36  ;;  %v4494_v36 = vld [vmem:[%s9390_s4 + $0x1f0] sm:$0xf0] }
  0xdd   :  { %2077 = vmatpush.bf16.msra.mxu3 %v5225_v9  ;;  %2037 = vmatpush.bf16.msra.mxu0 %v4393_v12  ;;  %v4838_v49 = vld [vmem:[%s9390_s4 + $0x4a8] sm:$0xf0]  ;;  %v4749_v9 = vor.u32 %v5967_v0, %v4748_v63  ;;  %v5895_v12 = vld [vmem:[%s9390_s4 + $0x1ac] sm:$0xf0]  ;;  %v5963_v37 = vld [vmem:[%s9390_s4 + $0x3d4] sm:$0xf] }
  0xde   :  { %2051 = vmatpush.bf16.msra.mxu1 %v4649_v13  ;;  %v6050_v50 = vld [vmem:[%s9390_s4 + $0x68c] sm:$0xf]  ;;  %v4841_v60 = vor.u32 %v5986_v48, %v4838_v49  ;;  %v4716_v13 = vld [vmem:[%s9390_s4 + $0x390] sm:$0xf]  ;;  %v4461_v23 = vor.u32 %v5895_v12, %v4460_v10 }
  0xdf   :  { %v5094_v53 = vld [vmem:[%s9390_s4 + $0x6a8] sm:$0xf0]  ;;  %v4717_v24 = vor.u32 %v5959_v14, %v4716_v13  ;;  %v4652_v45 = vld [vmem:[%s9390_s4 + $0x310] sm:$0xf] }
  0xe0   :  { %2064 = vmatpush.bf16.msra.mxu2 %v4937_v20  ;;  %v5842_v54 = vld [vmem:[%s9390_s4 + $0xc] sm:$0xf]  ;;  %v5097_v1 = vor.u32 %v6050_v50, %v5094_v53  ;;  %v5004_v20 = vld [vmem:[%s9390_s4 + $0x5d0] sm:$0xf]  ;;  %v4397_v50 = vor.u32 %v5879_v43, %v4396_v42 }
  0xe1   :  { %2078 = vmatpush.bf16.msra.mxu3 %v5193_v22  ;;  %2038 = vmatpush.bf16.msra.mxu0 %v4361_v25  ;;  %v4262_v55 = vld [vmem:[%s9390_s4 + $0x28] sm:$0xf0]  ;;  %v6031_v22 = vld [vmem:[%s9390_s4 + $0x5ec] sm:$0xf0] }
  0xe2   :  { %2052 = vmatpush.bf16.msra.mxu1 %v4617_v26  ;;  %v5906_v56 = vld [vmem:[%s9390_s4 + $0x20c] sm:$0xf]  ;;  %v4265_v4 = vor.u32 %v5842_v54, %v4262_v55  ;;  %v5260_v25 = vld [vmem:[%s9390_s4 + $0x7d0] sm:$0xf]  ;;  %v5005_v32 = vor.u32 %v6031_v22, %v5004_v20 }
  0xe3   :  { %v4518_v58 = vld [vmem:[%s9390_s4 + $0x228] sm:$0xf0]  ;;  %v6095_v26 = vld [vmem:[%s9390_s4 + $0x7ec] sm:$0xf0] }
  0xe4   :  { %2065 = vmatpush.bf16.msra.mxu2 %v4905_v34  ;;  %v5978_v2 = vld [vmem:[%s9390_s4 + $0x44c] sm:$0xf]  ;;  %v4521_v5 = vor.u32 %v5906_v56, %v4518_v58  ;;  %v5951_v34 = vld [vmem:[%s9390_s4 + $0x36c] sm:$0xf0] }
  0xe5   :  { %2079 = vmatpush.bf16.msra.mxu3 %v5161_v35  ;;  %2039 = vmatpush.bf16.msra.mxu0 %v4329_v38  ;;  %v4806_v3 = vld [vmem:[%s9390_s4 + $0x468] sm:$0xf0]  ;;  %v5261_v35 = vor.u32 %v6095_v26, %v5260_v25  ;;  %v4429_v38 = vor.u32 %v5887_v30, %v4428_v29  ;;  %v4685_v41 = vor.u32 %v5951_v34, %v4684_v33  ;;  %v4940_v48 = vld [vmem:[%s9390_s4 + $0x550] sm:$0xf] }
  0xe6   :  { %2053 = vmatpush.bf16.msra.mxu1 %v4585_v39  ;;  %v6042_v6 = vld [vmem:[%s9390_s4 + $0x64c] sm:$0xf]  ;;  %v4809_v11 = vor.u32 %v5978_v2, %v4806_v3  ;;  %v5228_v39 = vld [vmem:[%s9390_s4 + $0x790] sm:$0xf] }
  0xe7   :  { %v5062_v7 = vld [vmem:[%s9390_s4 + $0x668] sm:$0xf0]  ;;  %v6015_v49 = vld [vmem:[%s9390_s4 + $0x56c] sm:$0xf0] }
  0xe8   :  { %2066 = vmatpush.bf16.msra.mxu2 %v4873_v46  ;;  %v5065_v15 = vor.u32 %v6042_v6, %v5062_v7  ;;  %v5970_v16 = vld [vmem:[%s9390_s4 + $0x40c] sm:$0xf]  ;;  %v5943_v46 = vld [vmem:[%s9390_s4 + $0x32c] sm:$0xf0]  ;;  %v4941_v56 = vor.u32 %v6015_v49, %v4940_v48 }
  0xe9   :  { %2080 = vmatpush.bf16.msra.mxu3 %v5129_v47  ;;  %2040 = vmatpush.bf16.msra.mxu0 %v4297_v51  ;;  %v4774_v17 = vld [vmem:[%s9390_s4 + $0x428] sm:$0xf0]  ;;  %v5229_v47 = vor.u32 %v6087_v40, %v5228_v39  ;;  %v5196_v51 = vld [vmem:[%s9390_s4 + $0x750] sm:$0xf]  ;;  %v4653_v53 = vor.u32 %v5943_v46, %v4652_v45  ;;  %v4750_v39 = vld [vmem:[%s9390_s4 + $0x3f0] sm:$0xf0] }
  0xea   :  { %2054 = vmatpush.bf16.msra.mxu1 %v4553_v52  ;;  %v6034_v18 = vld [vmem:[%s9390_s4 + $0x60c] sm:$0xf]  ;;  %v4777_v28 = vor.u32 %v5970_v16, %v4774_v17  ;;  %v6079_v52 = vld [vmem:[%s9390_s4 + $0x76c] sm:$0xf0]  ;;  %v4753_v48 = vor.u32 %v5963_v37, %v4750_v39  ;;  %v4910_v37 = vld [vmem:[%s9390_s4 + $0x530] sm:$0xf0] }
  0xeb   :  { %v5030_v19 = vld [vmem:[%s9390_s4 + $0x628] sm:$0xf0]  ;;  %v4364_v54 = vld [vmem:[%s9390_s4 + $0xd0] sm:$0xf]  ;;  %v6067_v39 = vld [vmem:[%s9390_s4 + $0x714] sm:$0xf] }
  0xec   :  { %2067 = vmatpush.bf16.msra.mxu2 %v4841_v60  ;;  %v5033_v31 = vor.u32 %v6034_v18, %v5030_v19  ;;  %v5871_v55 = vld [vmem:[%s9390_s4 + $0xec] sm:$0xf0]  ;;  %v5197_v60 = vor.u32 %v6079_v52, %v5196_v51  ;;  %v5955_v51 = vld [vmem:[%s9390_s4 + $0x394] sm:$0xf] }
  0xed   :  { %2081 = vmatpush.bf16.msra.mxu3 %v5097_v1  ;;  %2041 = vmatpush.bf16.msra.mxu0 %v4265_v4  ;;  %v4620_v58 = vld [vmem:[%s9390_s4 + $0x2d0] sm:$0xf]  ;;  %v4365_v0 = vor.u32 %v5871_v55, %v4364_v54  ;;  %v4718_v52 = vld [vmem:[%s9390_s4 + $0x3b0] sm:$0xf0] }
  0xee   :  { %2055 = vmatpush.bf16.msra.mxu1 %v4521_v5  ;;  %v5935_v59 = vld [vmem:[%s9390_s4 + $0x2ec] sm:$0xf0] }
  0xef   :  { %v4908_v61 = vld [vmem:[%s9390_s4 + $0x510] sm:$0xf]  ;;  %v4621_v3 = vor.u32 %v5935_v59, %v4620_v58  ;;  %v6027_v59 = vld [vmem:[%s9390_s4 + $0x5d4] sm:$0xf] }
  0xf0   :  { %2068 = vmatpush.bf16.msra.mxu2 %v4809_v11  ;;  %2042 = vmatmul.bf16.vlgmr.msra.gmra.mxu0 %v6974_v57  ;;  %v6007_v63 = vld [vmem:[%s9390_s4 + $0x52c] sm:$0xf0] }
  0xf1   :  { %2090 = vmatpush.bf16.msrb.mxu0 %v4493_v8  ;;  %2082 = vmatpush.bf16.msra.mxu3 %v5065_v15  ;;  %v5164_v1 = vld [vmem:[%s9390_s4 + $0x710] sm:$0xf]  ;;  %v4909_v6 = vor.u32 %v6007_v63, %v4908_v61  ;;  %v6091_v63 = vld [vmem:[%s9390_s4 + $0x7d4] sm:$0xf] }
  0xf2   :  { %2104 = vmatpush.bf16.msrb.mxu1 %v4749_v9  ;;  %v6071_v2 = vld [vmem:[%s9390_s4 + $0x72c] sm:$0xf0] }
  0xf3   :  { %2056 = vmatmul.bf16.vlgmr.msra.gmra.mxu1 %v6982_v62  ;;  %v4332_v4 = vld [vmem:[%s9390_s4 + $0x90] sm:$0xf]  ;;  %v5165_v9 = vor.u32 %v6071_v2, %v5164_v1  ;;  %v4721_v1 = vor.u32 %v5955_v51, %v4718_v52  ;;  %v6059_v51 = vld [vmem:[%s9390_s4 + $0x6d4] sm:$0xf] }
  0xf4   :  { %2069 = vmatpush.bf16.msra.mxu2 %v4777_v28  ;;  %v5863_v5 = vld [vmem:[%s9390_s4 + $0xac] sm:$0xf0]  ;;  %v5134_v52 = vld [vmem:[%s9390_s4 + $0x6f0] sm:$0xf0] }
  0xf5   :  { %2091 = vmatpush.bf16.msrb.mxu0 %v4461_v23  ;;  %2083 = vmatpush.bf16.msra.mxu3 %v5033_v31  ;;  %v4588_v7 = vld [vmem:[%s9390_s4 + $0x290] sm:$0xf]  ;;  %v4333_v12 = vor.u32 %v5863_v5, %v4332_v4  ;;  %v4430_v4 = vld [vmem:[%s9390_s4 + $0x170] sm:$0xf0] }
  0xf6   :  { %2105 = vmatpush.bf16.msrb.mxu1 %v4717_v24  ;;  %v5927_v8 = vld [vmem:[%s9390_s4 + $0x2ac] sm:$0xf0] }
  0xf7   :  { %2070 = vmatmul.bf16.vlgmr.msra.gmra.mxu2 %v7016_v21  ;;  %v4876_v10 = vld [vmem:[%s9390_s4 + $0x4d0] sm:$0xf]  ;;  %v4589_v15 = vor.u32 %v5927_v8, %v4588_v7  ;;  %v5947_v7 = vld [vmem:[%s9390_s4 + $0x354] sm:$0xf] }
  0xf8   :  { %2118 = vmatpush.bf16.msrb.mxu2 %v5005_v32  ;;  %2084 = vmatmul.bf16.vlgmr.msra.gmra.mxu3 %v7027_v27  ;;  %v5999_v11 = vld [vmem:[%s9390_s4 + $0x4ec] sm:$0xf0]  ;;  %v4686_v8 = vld [vmem:[%s9390_s4 + $0x370] sm:$0xf0] }
  0xf9   :  { %2132 = vmatpush.bf16.msrb.mxu3 %v5261_v35  ;;  %2092 = vmatpush.bf16.msrb.mxu0 %v4429_v38  ;;  %v5132_v13 = vld [vmem:[%s9390_s4 + $0x6d0] sm:$0xf]  ;;  %v4877_v18 = vor.u32 %v5999_v11, %v4876_v10  ;;  %v5899_v35 = vld [vmem:[%s9390_s4 + $0x1d4] sm:$0xf] }
  0xfa   :  { %2106 = vmatpush.bf16.msrb.mxu1 %v4685_v41  ;;  %v6063_v14 = vld [vmem:[%s9390_s4 + $0x6ec] sm:$0xf0]  ;;  %v4497_v46 = vor.u32 %v5899_v35, %v4494_v36  ;;  %v6019_v10 = vld [vmem:[%s9390_s4 + $0x594] sm:$0xf] }
  0xfb   :  { %v4300_v16 = vld [vmem:[%s9390_s4 + $0x50] sm:$0xf]  ;;  %v5133_v22 = vor.u32 %v6063_v14, %v5132_v13  ;;  %v4974_v11 = vld [vmem:[%s9390_s4 + $0x5b0] sm:$0xf0] }
  0xfc   :  { %2119 = vmatpush.bf16.msrb.mxu2 %v4973_v44  ;;  %v5855_v17 = vld [vmem:[%s9390_s4 + $0x6c] sm:$0xf0]  ;;  %v6083_v13 = vld [vmem:[%s9390_s4 + $0x794] sm:$0xf] }
  0xfd   :  { %2133 = vmatpush.bf16.msrb.mxu3 %v5229_v47  ;;  %2093 = vmatpush.bf16.msrb.mxu0 %v4397_v50  ;;  %v4556_v19 = vld [vmem:[%s9390_s4 + $0x250] sm:$0xf]  ;;  %v4301_v25 = vor.u32 %v5855_v17, %v4300_v16  ;;  %v5891_v47 = vld [vmem:[%s9390_s4 + $0x194] sm:$0xf] }
  0xfe   :  { %2107 = vmatpush.bf16.msrb.mxu1 %v4653_v53  ;;  %v5919_v20 = vld [vmem:[%s9390_s4 + $0x26c] sm:$0xf0]  ;;  %v4462_v50 = vld [vmem:[%s9390_s4 + $0x1b0] sm:$0xf0] }
  0xff   :  { %v4844_v23 = vld [vmem:[%s9390_s4 + $0x490] sm:$0xf]  ;;  %v4557_v30 = vor.u32 %v5919_v20, %v4556_v19  ;;  %v4465_v61 = vor.u32 %v5891_v47, %v4462_v50  ;;  %v5230_v14 = vld [vmem:[%s9390_s4 + $0x7b0] sm:$0xf0] }
 0x100   :  { %2120 = vmatpush.bf16.msrb.mxu2 %v4941_v56  ;;  %v5991_v24 = vld [vmem:[%s9390_s4 + $0x4ac] sm:$0xf0]  ;;  %v5875_v16 = vld [vmem:[%s9390_s4 + $0x114] sm:$0xf] }
 0x101   :  { %2134 = vmatpush.bf16.msrb.mxu3 %v5197_v60  ;;  %2094 = vmatpush.bf16.msrb.mxu0 %v4365_v0  ;;  %v5100_v26 = vld [vmem:[%s9390_s4 + $0x690] sm:$0xf]  ;;  %v4845_v34 = vor.u32 %v5991_v24, %v4844_v23  ;;  %v5006_v60 = vld [vmem:[%s9390_s4 + $0x5f0] sm:$0xf0] }
 0x102   :  { %2108 = vmatpush.bf16.msrb.mxu1 %v4621_v3  ;;  %v6055_v28 = vld [vmem:[%s9390_s4 + $0x6ac] sm:$0xf0]  ;;  %v5262_v0 = vld [vmem:[%s9390_s4 + $0x7f0] sm:$0xf0] }
 0x103   :  { %v4268_v29 = vld [vmem:[%s9390_s4 + $0x10] sm:$0xf]  ;;  %v5101_v38 = vor.u32 %v6055_v28, %v5100_v26  ;;  %v5883_v3 = vld [vmem:[%s9390_s4 + $0x154] sm:$0xf] }
 0x104   :  { %2121 = vmatpush.bf16.msrb.mxu2 %v4909_v6  ;;  %v5847_v31 = vld [vmem:[%s9390_s4 + $0x2c] sm:$0xf0]  ;;  %v5009_v6 = vor.u32 %v6027_v59, %v5006_v60  ;;  %v4398_v17 = vld [vmem:[%s9390_s4 + $0x130] sm:$0xf0]  ;;  %v5137_v60 = vor.u32 %v6059_v51, %v5134_v52  ;;  %v5236_v51 = vld [vmem:[%s9390_s4 + $0x798] sm:$0xf] }
 0x105   :  { %2135 = vmatpush.bf16.msrb.mxu3 %v5165_v9  ;;  %2095 = vmatpush.bf16.msrb.mxu0 %v4333_v12  ;;  %v4524_v32 = vld [vmem:[%s9390_s4 + $0x210] sm:$0xf]  ;;  %v4269_v42 = vor.u32 %v5847_v31, %v4268_v29  ;;  %v5265_v9 = vor.u32 %v6091_v63, %v5262_v0  ;;  %v4433_v12 = vor.u32 %v5883_v3, %v4430_v4  ;;  %v5939_v19 = vld [vmem:[%s9390_s4 + $0x314] sm:$0xf]  ;;  %v6088_v52 = vld [vmem:[%s9390_s4 + $0x7b4] sm:$0xf0] }
 0x106   :  { %2109 = vmatpush.bf16.msrb.mxu1 %v4589_v15  ;;  %v5911_v33 = vld [vmem:[%s9390_s4 + $0x22c] sm:$0xf0]  ;;  %v4689_v15 = vor.u32 %v5947_v7, %v4686_v8  ;;  %v4654_v20 = vld [vmem:[%s9390_s4 + $0x330] sm:$0xf0] }
 0x107   :  { %v4812_v40 = vld [vmem:[%s9390_s4 + $0x450] sm:$0xf]  ;;  %v4525_v45 = vor.u32 %v5911_v33, %v4524_v32  ;;  %v6011_v23 = vld [vmem:[%s9390_s4 + $0x554] sm:$0xf]  ;;  %v4657_v29 = vor.u32 %v5939_v19, %v4654_v20 }
 0x108   :  { %2122 = vmatpush.bf16.msrb.mxu2 %v4877_v18  ;;  %v5983_v41 = vld [vmem:[%s9390_s4 + $0x46c] sm:$0xf0]  ;;  %v4977_v18 = vor.u32 %v6019_v10, %v4974_v11  ;;  %v4942_v24 = vld [vmem:[%s9390_s4 + $0x570] sm:$0xf0]  ;;  %v5904_v10 = vld [vmem:[%s9390_s4 + $0x1f4] sm:$0xf0] }
 0x109   :  { %2136 = vmatpush.bf16.msrb.mxu3 %v5133_v22  ;;  %2096 = vmatpush.bf16.msrb.mxu0 %v4301_v25  ;;  %v5068_v43 = vld [vmem:[%s9390_s4 + $0x650] sm:$0xf]  ;;  %v4813_v49 = vor.u32 %v5983_v41, %v4812_v40  ;;  %v5233_v22 = vor.u32 %v6083_v13, %v5230_v14  ;;  %v4401_v25 = vor.u32 %v5875_v16, %v4398_v17  ;;  %v6075_v26 = vld [vmem:[%s9390_s4 + $0x754] sm:$0xf]  ;;  %v4756_v11 = vld [vmem:[%s9390_s4 + $0x3d8] sm:$0xf] }
 0x10a   :  { %v6047_v44 = vld [vmem:[%s9390_s4 + $0x66c] sm:$0xf0]  ;;  %2110 = vmatpush.bf16.msrb.mxu1 %v4557_v30  ;;  %v5198_v28 = vld [vmem:[%s9390_s4 + $0x770] sm:$0xf0]  ;;  %v4945_v32 = vor.u32 %v6011_v23, %v4942_v24  ;;  %v5968_v13 = vld [vmem:[%s9390_s4 + $0x3f4] sm:$0xf0] }
 0x10b   :  { %v5069_v53 = vor.u32 %v6047_v44, %v5068_v43  ;;  %v4780_v54 = vld [vmem:[%s9390_s4 + $0x410] sm:$0xf]  ;;  %v5867_v30 = vld [vmem:[%s9390_s4 + $0xd4] sm:$0xf]  ;;  %v5201_v35 = vor.u32 %v6075_v26, %v5198_v28  ;;  %v4757_v23 = vor.u32 %v5968_v13, %v4756_v11  ;;  %v4724_v26 = vld [vmem:[%s9390_s4 + $0x398] sm:$0xf] }
 0x10c   :  { %2123 = vmatpush.bf16.msrb.mxu2 %v4845_v34  ;;  %v5975_v55 = vld [vmem:[%s9390_s4 + $0x42c] sm:$0xf0]  ;;  %v4366_v31 = vld [vmem:[%s9390_s4 + $0xf0] sm:$0xf0]  ;;  %v5960_v28 = vld [vmem:[%s9390_s4 + $0x3b4] sm:$0xf0] }
 0x10d   :  { %2137 = vmatpush.bf16.msrb.mxu3 %v5101_v38  ;;  %v5036_v56 = vld [vmem:[%s9390_s4 + $0x610] sm:$0xf]  ;;  %2097 = vmatpush.bf16.msrb.mxu0 %v4269_v42  ;;  %v4781_v2 = vor.u32 %v5975_v55, %v4780_v54  ;;  %v5931_v33 = vld [vmem:[%s9390_s4 + $0x2d4] sm:$0xf]  ;;  %v4369_v38 = vor.u32 %v5867_v30, %v4366_v31  ;;  %v6008_v11 = vld [vmem:[%s9390_s4 + $0x534] sm:$0xf0] }
 0x10e   :  { %v6039_v58 = vld [vmem:[%s9390_s4 + $0x62c] sm:$0xf0]  ;;  %2111 = vmatpush.bf16.msrb.mxu1 %v4525_v45  ;;  %v4622_v34 = vld [vmem:[%s9390_s4 + $0x2f0] sm:$0xf0]  ;;  %v5172_v13 = vld [vmem:[%s9390_s4 + $0x718] sm:$0xf] }
 0x10f   :  { %v5037_v5 = vor.u32 %v6039_v58, %v5036_v56  ;;  %v6003_v36 = vld [vmem:[%s9390_s4 + $0x514] sm:$0xf]  ;;  %v4625_v41 = vor.u32 %v5931_v33, %v4622_v34  ;;  %v5012_v34 = vld [vmem:[%s9390_s4 + $0x5d8] sm:$0xf] }
 0x110   :  { %2124 = vmatpush.bf16.msrb.mxu2 %v4813_v49  ;;  %2098 = vmatmul.bf16.vlgmr.msrb.gmra.mxu0 %v6974_v57  ;;  %v5166_v40 = vld [vmem:[%s9390_s4 + $0x730] sm:$0xf0]  ;;  %v4913_v44 = vor.u32 %v6003_v36, %v4910_v37  ;;  %v5268_v37 = vld [vmem:[%s9390_s4 + $0x7d8] sm:$0xf] }
 0x111   :  { %2146 = vmatpush.bf16.msra.mxu0 %v4497_v46  ;;  %2138 = vmatpush.bf16.msrb.mxu3 %v5069_v53  ;;  %v5859_v42 = vld [vmem:[%s9390_s4 + $0x94] sm:$0xf]  ;;  %v5169_v47 = vor.u32 %v6067_v39, %v5166_v40  ;;  %v4725_v39 = vor.u32 %v5960_v28, %v4724_v26  ;;  %v5140_v28 = vld [vmem:[%s9390_s4 + $0x6d8] sm:$0xf] }
 0x112   :  { %2160 = vmatpush.bf16.msra.mxu1 %v4753_v48  ;;  %v4334_v43 = vld [vmem:[%s9390_s4 + $0xb0] sm:$0xf0] }
 0x113   :  { %2112 = vmatmul.bf16.vlgmr.msrb.gmra.mxu1 %v6982_v62  ;;  %v5923_v45 = vld [vmem:[%s9390_s4 + $0x294] sm:$0xf]  ;;  %v4337_v50 = vor.u32 %v5859_v42, %v4334_v43  ;;  %v5888_v42 = vld [vmem:[%s9390_s4 + $0x174] sm:$0xf0] }
 0x114   :  { %2125 = vmatpush.bf16.msrb.mxu2 %v4781_v2  ;;  %v4590_v46 = vld [vmem:[%s9390_s4 + $0x2b0] sm:$0xf0] }
 0x115   :  { %2147 = vmatpush.bf16.msra.mxu0 %v4465_v61  ;;  %2139 = vmatpush.bf16.msrb.mxu3 %v5037_v5  ;;  %v5995_v48 = vld [vmem:[%s9390_s4 + $0x4d4] sm:$0xf]  ;;  %v4593_v53 = vor.u32 %v5923_v45, %v4590_v46  ;;  %v4692_v45 = vld [vmem:[%s9390_s4 + $0x358] sm:$0xf] }
 0x116   :  { %2161 = vmatpush.bf16.msra.mxu1 %v4721_v1  ;;  %v4878_v49 = vld [vmem:[%s9390_s4 + $0x4f0] sm:$0xf0]  ;;  %v5952_v46 = vld [vmem:[%s9390_s4 + $0x374] sm:$0xf0] }
 0x117   :  { %2126 = vmatmul.bf16.vlgmr.msrb.gmra.mxu2 %v7016_v21  ;;  %v5851_v54 = vld [vmem:[%s9390_s4 + $0x54] sm:$0xf]  ;;  %v4881_v56 = vor.u32 %v5995_v48, %v4878_v49  ;;  %v4980_v48 = vld [vmem:[%s9390_s4 + $0x598] sm:$0xf] }
 0x118   :  { %2174 = vmatpush.bf16.msra.mxu2 %v5009_v6  ;;  %2140 = vmatmul.bf16.vlgmr.msrb.gmra.mxu3 %v7027_v27  ;;  %v4302_v55 = vld [vmem:[%s9390_s4 + $0x70] sm:$0xf0]  ;;  %v6024_v49 = vld [vmem:[%s9390_s4 + $0x5b4] sm:$0xf0] }
 0x119   :  { %2188 = vmatpush.bf16.msra.mxu3 %v5265_v9  ;;  %2148 = vmatpush.bf16.msra.mxu0 %v4433_v12  ;;  %v5915_v58 = vld [vmem:[%s9390_s4 + $0x254] sm:$0xf]  ;;  %v4305_v0 = vor.u32 %v5851_v54, %v4302_v55  ;;  %v4500_v9 = vld [vmem:[%s9390_s4 + $0x1d8] sm:$0xf] }
 0x11a   :  { %2162 = vmatpush.bf16.msra.mxu1 %v4689_v15  ;;  %v4558_v59 = vld [vmem:[%s9390_s4 + $0x270] sm:$0xf0]  ;;  %v4501_v20 = vor.u32 %v5904_v10, %v4500_v9  ;;  %v4404_v54 = vld [vmem:[%s9390_s4 + $0x118] sm:$0xf] }
 0x11b   :  { %v5987_v61 = vld [vmem:[%s9390_s4 + $0x494] sm:$0xf]  ;;  %v4561_v4 = vor.u32 %v5915_v58, %v4558_v59  ;;  %v5880_v55 = vld [vmem:[%s9390_s4 + $0x134] sm:$0xf0] }
 0x11c   :  { %2175 = vmatpush.bf16.msra.mxu2 %v4977_v18  ;;  %v4846_v63 = vld [vmem:[%s9390_s4 + $0x4b0] sm:$0xf0]  ;;  %v4660_v58 = vld [vmem:[%s9390_s4 + $0x318] sm:$0xf] }
 0x11d   :  { %2189 = vmatpush.bf16.msra.mxu3 %v5233_v22  ;;  %2149 = vmatpush.bf16.msra.mxu0 %v4401_v25  ;;  %v6051_v1 = vld [vmem:[%s9390_s4 + $0x694] sm:$0xf]  ;;  %v4849_v8 = vor.u32 %v5987_v61, %v4846_v63  ;;  %v4468_v22 = vld [vmem:[%s9390_s4 + $0x198] sm:$0xf] }
 0x11e   :  { %2163 = vmatpush.bf16.msra.mxu1 %v4657_v29  ;;  %v5102_v2 = vld [vmem:[%s9390_s4 + $0x6b0] sm:$0xf0]  ;;  %v5896_v25 = vld [vmem:[%s9390_s4 + $0x1b4] sm:$0xf0] }
 0x11f   :  { %v5843_v3 = vld [vmem:[%s9390_s4 + $0x14] sm:$0xf]  ;;  %v5105_v12 = vor.u32 %v6051_v1, %v5102_v2  ;;  %v4469_v36 = vor.u32 %v5896_v25, %v4468_v22  ;;  %v5944_v59 = vld [vmem:[%s9390_s4 + $0x334] sm:$0xf0] }
 0x120   :  { %2176 = vmatpush.bf16.msra.mxu2 %v4945_v32  ;;  %v4270_v5 = vld [vmem:[%s9390_s4 + $0x30] sm:$0xf0]  ;;  %v4948_v61 = vld [vmem:[%s9390_s4 + $0x558] sm:$0xf] }
 0x121   :  { %2190 = vmatpush.bf16.msra.mxu3 %v5201_v35  ;;  %2150 = vmatpush.bf16.msra.mxu0 %v4369_v38  ;;  %v5907_v6 = vld [vmem:[%s9390_s4 + $0x214] sm:$0xf]  ;;  %v4273_v16 = vor.u32 %v5843_v3, %v4270_v5  ;;  %v6032_v35 = vld [vmem:[%s9390_s4 + $0x5f4] sm:$0xf0]  ;;  %v4661_v3 = vor.u32 %v5944_v59, %v4660_v58 }
 0x122   :  { %2164 = vmatpush.bf16.msra.mxu1 %v4625_v41  ;;  %v4526_v7 = vld [vmem:[%s9390_s4 + $0x230] sm:$0xf0]  ;;  %v6096_v38 = vld [vmem:[%s9390_s4 + $0x7f4] sm:$0xf0] }
 0x123   :  { %v5979_v14 = vld [vmem:[%s9390_s4 + $0x454] sm:$0xf]  ;;  %v4529_v19 = vor.u32 %v5907_v6, %v4526_v7  ;;  %v4436_v41 = vld [vmem:[%s9390_s4 + $0x158] sm:$0xf] }
 0x124   :  { %2177 = vmatpush.bf16.msra.mxu2 %v4913_v44  ;;  %v4814_v15 = vld [vmem:[%s9390_s4 + $0x470] sm:$0xf0]  ;;  %v5013_v44 = vor.u32 %v6032_v35, %v5012_v34  ;;  %v6016_v63 = vld [vmem:[%s9390_s4 + $0x574] sm:$0xf0] }
 0x125   :  { %2191 = vmatpush.bf16.msra.mxu3 %v5169_v47  ;;  %2151 = vmatpush.bf16.msra.mxu0 %v4337_v50  ;;  %v6043_v17 = vld [vmem:[%s9390_s4 + $0x654] sm:$0xf]  ;;  %v4817_v24 = vor.u32 %v5979_v14, %v4814_v15  ;;  %v5269_v47 = vor.u32 %v6096_v38, %v5268_v37  ;;  %v4437_v50 = vor.u32 %v5888_v42, %v4436_v41  ;;  %v5204_v1 = vld [vmem:[%s9390_s4 + $0x758] sm:$0xf] }
 0x126   :  { %2165 = vmatpush.bf16.msra.mxu1 %v4593_v53  ;;  %v5070_v18 = vld [vmem:[%s9390_s4 + $0x670] sm:$0xf0]  ;;  %v4693_v53 = vor.u32 %v5952_v46, %v4692_v45  ;;  %v6080_v2 = vld [vmem:[%s9390_s4 + $0x774] sm:$0xf0]  ;;  %v4949_v6 = vor.u32 %v6016_v63, %v4948_v61 }
 0x127   :  { %v5073_v29 = vor.u32 %v6043_v17, %v5070_v18  ;;  %v5971_v30 = vld [vmem:[%s9390_s4 + $0x414] sm:$0xf]  ;;  %v5872_v5 = vld [vmem:[%s9390_s4 + $0xf4] sm:$0xf0]  ;;  %v5205_v9 = vor.u32 %v6080_v2, %v5204_v1  ;;  %v5892_v2 = vld [vmem:[%s9390_s4 + $0x19c] sm:$0xf] }
 0x128   :  { %2178 = vmatpush.bf16.msra.mxu2 %v4881_v56  ;;  %v4782_v31 = vld [vmem:[%s9390_s4 + $0x430] sm:$0xf0]  ;;  %v4981_v56 = vor.u32 %v6024_v49, %v4980_v48  ;;  %v4628_v7 = vld [vmem:[%s9390_s4 + $0x2d8] sm:$0xf]  ;;  %v5900_v49 = vld [vmem:[%s9390_s4 + $0x1dc] sm:$0xf] }
 0x129   :  { %2192 = vmatpush.bf16.msra.mxu3 %v5137_v60  ;;  %2152 = vmatpush.bf16.msra.mxu0 %v4305_v0  ;;  %v6035_v32 = vld [vmem:[%s9390_s4 + $0x614] sm:$0xf]  ;;  %v4785_v40 = vor.u32 %v5971_v30, %v4782_v31  ;;  %v5237_v60 = vor.u32 %v6088_v52, %v5236_v51  ;;  %v4405_v0 = vor.u32 %v5880_v55, %v4404_v54  ;;  %v4916_v10 = vld [vmem:[%s9390_s4 + $0x518] sm:$0xf]  ;;  %v5964_v51 = vld [vmem:[%s9390_s4 + $0x3dc] sm:$0xf] }
 0x12a   :  { %2166 = vmatpush.bf16.msra.mxu1 %v4561_v4  ;;  %v5038_v33 = vld [vmem:[%s9390_s4 + $0x630] sm:$0xf0]  ;;  %v4372_v4 = vld [vmem:[%s9390_s4 + $0xd8] sm:$0xf]  ;;  %v4758_v55 = vld [vmem:[%s9390_s4 + $0x3f8] sm:$0xf0] }
 0x12b   :  { %v5041_v43 = vor.u32 %v6035_v32, %v5038_v33  ;;  %v6072_v14 = vld [vmem:[%s9390_s4 + $0x734] sm:$0xf0] }
 0x12c   :  { %2179 = vmatpush.bf16.msra.mxu2 %v4849_v8  ;;  %v5936_v8 = vld [vmem:[%s9390_s4 + $0x2f4] sm:$0xf0]  ;;  %v7870_v15 = vpop.f32.mrf.mxu0 }
 0x12d   :  { %2193 = vmatpush.bf16.msra.mxu3 %v5105_v12  ;;  %2153 = vmatpush.bf16.msra.mxu0 %v4273_v16  ;;  %v4373_v12 = vor.u32 %v5872_v5, %v4372_v4  ;;  %v4629_v16 = vor.u32 %v5936_v8, %v4628_v7  ;;  %v4340_v17 = vld [vmem:[%s9390_s4 + $0x98] sm:$0xf]  ;;  %v4470_v5 = vld [vmem:[%s9390_s4 + $0x1b8] sm:$0xf0] }
 0x12e   :  { %2167 = vmatpush.bf16.msra.mxu1 %v4529_v19  ;;  %v5864_v18 = vld [vmem:[%s9390_s4 + $0xb4] sm:$0xf0]  ;;  %v4917_v19 = vor.u32 %v6008_v11, %v4916_v10  ;;  %v4726_v7 = vld [vmem:[%s9390_s4 + $0x3b8] sm:$0xf0] }
 0x12f   :  { %v5928_v22 = vld [vmem:[%s9390_s4 + $0x2b4] sm:$0xf0]  ;;  %v4341_v26 = vor.u32 %v5864_v18, %v4340_v17  ;;  %v4473_v17 = vor.u32 %v5892_v2, %v4470_v5  ;;  %v6092_v18 = vld [vmem:[%s9390_s4 + $0x7dc] sm:$0xf] }
 0x130   :  { %2180 = vmatpush.bf16.msra.mxu2 %v4817_v24  ;;  %2154 = vmatmul.bf16.vlgmr.msra.gmra.mxu0 %v6974_v57  ;;  %v4884_v24 = vld [vmem:[%s9390_s4 + $0x4d8] sm:$0xf]  ;;  %v4918_v2 = vld [vmem:[%s9390_s4 + $0x538] sm:$0xf0] }
 0x131   :  { %2202 = vmatpush.bf16.msrb.mxu0 %v4501_v20  ;;  %2194 = vmatpush.bf16.msra.mxu3 %v5073_v29  ;;  %v4596_v20 = vld [vmem:[%s9390_s4 + $0x298] sm:$0xf]  ;;  %v5174_v5 = vld [vmem:[%s9390_s4 + $0x738] sm:$0xf0] }
 0x132   :  { %2216 = vmatpush.bf16.msrb.mxu1 %v4757_v23  ;;  %v5173_v23 = vor.u32 %v6072_v14, %v5172_v13  ;;  %v6000_v25 = vld [vmem:[%s9390_s4 + $0x4f4] sm:$0xf0]  ;;  %v4597_v30 = vor.u32 %v5928_v22, %v4596_v20  ;;  %v6028_v13 = vld [vmem:[%s9390_s4 + $0x5dc] sm:$0xf] }
 0x133   :  { %2168 = vmatmul.bf16.vlgmr.msra.gmra.mxu1 %v6982_v62  ;;  %v6064_v29 = vld [vmem:[%s9390_s4 + $0x6f4] sm:$0xf0]  ;;  %v4885_v33 = vor.u32 %v6000_v25, %v4884_v24  ;;  %v5014_v14 = vld [vmem:[%s9390_s4 + $0x5f8] sm:$0xf0] }
 0x134   :  { %2181 = vmatpush.bf16.msra.mxu2 %v4785_v40  ;;  %v4308_v31 = vld [vmem:[%s9390_s4 + $0x58] sm:$0xf]  ;;  %v5141_v37 = vor.u32 %v6064_v29, %v5140_v28  ;;  %v7943_v52 = vpop.f32.mrf.mxu0  ;;  %v4438_v24 = vld [vmem:[%s9390_s4 + $0x178] sm:$0xf0] }
 0x135   :  { %2203 = vmatpush.bf16.msrb.mxu0 %v4469_v36  ;;  %2195 = vmatpush.bf16.msra.mxu3 %v5041_v43  ;;  %v5856_v32 = vld [vmem:[%s9390_s4 + $0x74] sm:$0xf0]  ;;  %v7908_v36 = vpop.f32.mrf.mxu1  ;;  %v5948_v28 = vld [vmem:[%s9390_s4 + $0x35c] sm:$0xf] }
 0x136   :  { %2217 = vmatpush.bf16.msrb.mxu1 %v4725_v39  ;;  %v4564_v34 = vld [vmem:[%s9390_s4 + $0x258] sm:$0xf]  ;;  %v4309_v40 = vor.u32 %v5856_v32, %v4308_v31  ;;  %v4694_v29 = vld [vmem:[%s9390_s4 + $0x378] sm:$0xf0] }
 0x137   :  { %2182 = vmatmul.bf16.vlgmr.msra.gmra.mxu2 %v7016_v21  ;;  %v5920_v35 = vld [vmem:[%s9390_s4 + $0x274] sm:$0xf0]  ;;  %v6020_v31 = vld [vmem:[%s9390_s4 + $0x59c] sm:$0xf] }
 0x138   :  { %2230 = vmatpush.bf16.msrb.mxu2 %v5013_v44  ;;  %2196 = vmatmul.bf16.vlgmr.msra.gmra.mxu3 %v7027_v27  ;;  %v4852_v38 = vld [vmem:[%s9390_s4 + $0x498] sm:$0xf]  ;;  %v4565_v44 = vor.u32 %v5920_v35, %v4564_v34  ;;  %v4982_v32 = vld [vmem:[%s9390_s4 + $0x5b8] sm:$0xf0] }
 0x139   :  { %2244 = vmatpush.bf16.msrb.mxu3 %v5269_v47  ;;  %2204 = vmatpush.bf16.msrb.mxu0 %v4437_v50  ;;  %v5992_v39 = vld [vmem:[%s9390_s4 + $0x4b4] sm:$0xf0]  ;;  %v4502_v50 = vld [vmem:[%s9390_s4 + $0x1f8] sm:$0xf0] }
 0x13a   :  { %2218 = vmatpush.bf16.msrb.mxu1 %v4693_v53  ;;  %v5108_v41 = vld [vmem:[%s9390_s4 + $0x698] sm:$0xf]  ;;  %v4853_v48 = vor.u32 %v5992_v39, %v4852_v38  ;;  %v7945_v53 = vpop.f32.mrf.mxu2  ;;  %v4505_v1 = vor.u32 %v5900_v49, %v4502_v50  ;;  %v5238_v38 = vld [vmem:[%s9390_s4 + $0x7b8] sm:$0xf0] }
 0x13b   :  { %v6056_v42 = vld [vmem:[%s9390_s4 + $0x6b4] sm:$0xf0]  ;;  %v7956_v59 = vpop.f32.mrf.mxu3  ;;  %v6076_v50 = vld [vmem:[%s9390_s4 + $0x75c] sm:$0xf] }
 0x13c   :  { %2231 = vmatpush.bf16.msrb.mxu2 %v4981_v56  ;;  %v4276_v43 = vld [vmem:[%s9390_s4 + $0x18] sm:$0xf]  ;;  %v5109_v54 = vor.u32 %v6056_v42, %v5108_v41  ;;  %v5876_v41 = vld [vmem:[%s9390_s4 + $0x11c] sm:$0xf] }
 0x13d   :  { %2245 = vmatpush.bf16.msrb.mxu3 %v5237_v60  ;;  %2205 = vmatpush.bf16.msrb.mxu0 %v4405_v0  ;;  %v5848_v45 = vld [vmem:[%s9390_s4 + $0x34] sm:$0xf0]  ;;  %v4406_v42 = vld [vmem:[%s9390_s4 + $0x138] sm:$0xf0] }
 0x13e   :  { %2219 = vmatpush.bf16.msrb.mxu1 %v4661_v3  ;;  %v4532_v46 = vld [vmem:[%s9390_s4 + $0x218] sm:$0xf]  ;;  %v4277_v60 = vor.u32 %v5848_v45, %v4276_v43  ;;  %v4761_v3 = vor.u32 %v5964_v51, %v4758_v55  ;;  %v4985_v43 = vor.u32 %v6020_v31, %v4982_v32  ;;  %v4662_v45 = vld [vmem:[%s9390_s4 + $0x338] sm:$0xf0]  ;;  %v4409_v49 = vor.u32 %v5876_v41, %v4406_v42 }
 0x13f   :  { %v5912_v47 = vld [vmem:[%s9390_s4 + $0x234] sm:$0xf0]  ;;  %v5206_v51 = vld [vmem:[%s9390_s4 + $0x778] sm:$0xf0] }
 0x140   :  { %2232 = vmatpush.bf16.msrb.mxu2 %v4949_v6  ;;  %v4820_v56 = vld [vmem:[%s9390_s4 + $0x458] sm:$0xf]  ;;  %v4533_v0 = vor.u32 %v5912_v47, %v4532_v46  ;;  %v5956_v6 = vld [vmem:[%s9390_s4 + $0x39c] sm:$0xf] }
 0x141   :  { %2246 = vmatpush.bf16.msrb.mxu3 %v5205_v9  ;;  %2206 = vmatpush.bf16.msrb.mxu0 %v4373_v12  ;;  %v5984_v58 = vld [vmem:[%s9390_s4 + $0x474] sm:$0xf0]  ;;  %v4729_v20 = vor.u32 %v5956_v6, %v4726_v7  ;;  %v6012_v47 = vld [vmem:[%s9390_s4 + $0x55c] sm:$0xf] }
 0x142   :  { %2220 = vmatpush.bf16.msrb.mxu1 %v4629_v16  ;;  %v5076_v61 = vld [vmem:[%s9390_s4 + $0x658] sm:$0xf]  ;;  %v4821_v4 = vor.u32 %v5984_v58, %v4820_v56  ;;  %v7994_v16 = vpop.f32.mrf.mxu1  ;;  %v8024_v34 = vpop.f32.mrf.mxu2  ;;  %v5868_v55 = vld [vmem:[%s9390_s4 + $0xdc] sm:$0xf] }
 0x143   :  { %v6048_v63 = vld [vmem:[%s9390_s4 + $0x674] sm:$0xf0]  ;;  %v8032_v39 = vpop.f32.mrf.mxu3  ;;  %v4374_v56 = vld [vmem:[%s9390_s4 + $0xf8] sm:$0xf0] }
 0x144   :  { %2233 = vmatpush.bf16.msrb.mxu2 %v4917_v19  ;;  %v5077_v8 = vor.u32 %v6048_v63, %v5076_v61  ;;  %v4788_v9 = vld [vmem:[%s9390_s4 + $0x418] sm:$0xf]  ;;  %v5270_v19 = vld [vmem:[%s9390_s4 + $0x7f8] sm:$0xf0] }
 0x145   :  { %2247 = vmatpush.bf16.msrb.mxu3 %v5173_v23  ;;  %2207 = vmatpush.bf16.msrb.mxu0 %v4341_v26  ;;  %v5976_v10 = vld [vmem:[%s9390_s4 + $0x434] sm:$0xf0]  ;;  %v5884_v23 = vld [vmem:[%s9390_s4 + $0x15c] sm:$0xf]  ;;  %v5017_v26 = vor.u32 %v6028_v13, %v5014_v14 }
 0x146   :  { %2221 = vmatpush.bf16.msrb.mxu1 %v4597_v30  ;;  %v5044_v11 = vld [vmem:[%s9390_s4 + $0x618] sm:$0xf]  ;;  %v4789_v22 = vor.u32 %v5976_v10, %v4788_v9  ;;  %v5273_v30 = vor.u32 %v6092_v18, %v5270_v19  ;;  %v4441_v35 = vor.u32 %v5884_v23, %v4438_v24  ;;  %v5932_v61 = vld [vmem:[%s9390_s4 + $0x2dc] sm:$0xf] }
 0x147   :  { %v6040_v12 = vld [vmem:[%s9390_s4 + $0x634] sm:$0xf0]  ;;  %v4630_v63 = vld [vmem:[%s9390_s4 + $0x2f8] sm:$0xf0] }
 0x148   :  { %2234 = vmatpush.bf16.msrb.mxu2 %v4885_v33  ;;  %v5045_v25 = vor.u32 %v6040_v12, %v5044_v11  ;;  %v8022_v33 = vpop.f32.mrf.mxu0  ;;  %v4633_v6 = vor.u32 %v5932_v61, %v4630_v63  ;;  %v5860_v7 = vld [vmem:[%s9390_s4 + $0x9c] sm:$0xf] }
 0x149   :  { %2248 = vmatpush.bf16.msrb.mxu3 %v5141_v37  ;;  %2208 = vmatpush.bf16.msrb.mxu0 %v4309_v40  ;;  %v6084_v37 = vld [vmem:[%s9390_s4 + $0x79c] sm:$0xf]  ;;  %v4697_v40 = vor.u32 %v5948_v28, %v4694_v29 }
 0x14a   :  { %2222 = vmatpush.bf16.msrb.mxu1 %v4565_v44  ;;  %v5940_v44 = vld [vmem:[%s9390_s4 + $0x31c] sm:$0xf]  ;;  %v5241_v46 = vor.u32 %v6084_v37, %v5238_v38  ;;  %v8066_v58 = vpop.f32.mrf.mxu1  ;;  %v8094_v10 = vpop.f32.mrf.mxu2 }
 0x14b   :  { %v5924_v12 = vld [vmem:[%s9390_s4 + $0x29c] sm:$0xf]  ;;  %v8102_v14 = vpop.f32.mrf.mxu3 }
 0x14c   :  { %2235 = vmatpush.bf16.msrb.mxu2 %v4853_v48  ;;  %v4950_v48 = vld [vmem:[%s9390_s4 + $0x578] sm:$0xf0] }
 0x14d   :  { %2249 = vmatpush.bf16.msrb.mxu3 %v5109_v54  ;;  %2209 = vmatpush.bf16.msrb.mxu0 %v4277_v60  ;;  %v4665_v54 = vor.u32 %v5940_v44, %v4662_v45  ;;  %v4953_v60 = vor.u32 %v6012_v47, %v4950_v48  ;;  %v4598_v13 = vld [vmem:[%s9390_s4 + $0x2b8] sm:$0xf0]  ;;  %v5332_v48 = vld [vmem:[%s9391_s5 + $0x70] sm:$0xf] }
 0x14e   :  { %2223 = vmatpush.bf16.msrb.mxu1 %v4533_v0  ;;  %v5209_v0 = vor.u32 %v6076_v50, %v5206_v51  ;;  %v5996_v18 = vld [vmem:[%s9390_s4 + $0x4dc] sm:$0xf]  ;;  %v4601_v24 = vor.u32 %v5924_v12, %v4598_v13  ;;  %v5396_v50 = vld [vmem:[%s9391_s5 + $0xf0] sm:$0xf]  ;;  %v5388_v12 = vld [vmem:[%s9391_s5 + $0xe0] sm:$0xf] }
 0x14f   :  { %v4886_v19 = vld [vmem:[%s9390_s4 + $0x4f8] sm:$0xf0]  ;;  %v6126_v13 = vld [vmem:[%s9391_s5 + $0xe4] sm:$0xf0] }
 0x150   :  { %2236 = vmatpush.bf16.msrb.mxu2 %v4821_v4  ;;  %2210 = vmatmul.bf16.vlgmr.msrb.gmra.mxu0 %v6974_v57  ;;  %v6068_v4 = vld [vmem:[%s9390_s4 + $0x71c] sm:$0xf]  ;;  %v8092_v9 = vpop.f32.mrf.mxu0  ;;  %v4889_v28 = vor.u32 %v5996_v18, %v4886_v19 }
 0x151   :  { %2258 = vmatpush.bf16.msra.mxu0 %v4505_v1  ;;  %2250 = vmatpush.bf16.msrb.mxu3 %v5077_v8  ;;  %v6004_v1 = vld [vmem:[%s9390_s4 + $0x51c] sm:$0xf] }
 0x152   :  { %2272 = vmatpush.bf16.msra.mxu1 %v4761_v3  ;;  %v4377_v3 = vor.u32 %v5868_v55, %v4374_v56  ;;  %v4342_v8 = vld [vmem:[%s9390_s4 + $0xb8] sm:$0xf0]  ;;  %v4921_v11 = vor.u32 %v6004_v1, %v4918_v2  ;;  %v8134_v37 = vpop.f32.mrf.mxu1  ;;  %v8174_v61 = vpop.f32.mrf.mxu2  ;;  %v8185_v2 = vld [vmem:[%s9392_s6 + $0x4] sm:$0xff] }
 0x153   :  { %2224 = vmatmul.bf16.vlgmr.msrb.gmra.mxu1 %v6982_v62  ;;  %v5142_v23 = vld [vmem:[%s9390_s4 + $0x6f8] sm:$0xf0] }
 0x154   :  { %2237 = vmatpush.bf16.msrb.mxu2 %v4789_v22  ;;  %v6060_v22 = vld [vmem:[%s9390_s4 + $0x6dc] sm:$0xf] }
 0x155   :  { %2259 = vmatpush.bf16.msra.mxu0 %v4473_v17  ;;  %2251 = vmatpush.bf16.msrb.mxu3 %v5045_v25  ;;  %v5177_v17 = vor.u32 %v6068_v4, %v5174_v5  ;;  %v5852_v25 = vld [vmem:[%s9390_s4 + $0x5c] sm:$0xf]  ;;  %v5145_v31 = vor.u32 %v6060_v22, %v5142_v23  ;;  %v5460_v23 = vld [vmem:[%s9391_s5 + $0x170] sm:$0xf] }
 0x156   :  { %2273 = vmatpush.bf16.msra.mxu1 %v4729_v20  ;;  %v4345_v20 = vor.u32 %v5860_v7, %v4342_v8  ;;  %v5916_v29 = vld [vmem:[%s9390_s4 + $0x25c] sm:$0xf] }
 0x157   :  { %2238 = vmatmul.bf16.vlgmr.msrb.gmra.mxu2 %v7016_v21  ;;  %v5988_v32 = vld [vmem:[%s9390_s4 + $0x49c] sm:$0xf] }
 0x158   :  { %2286 = vmatpush.bf16.msra.mxu2 %v5017_v26  ;;  %2252 = vmatmul.bf16.vlgmr.msrb.gmra.mxu3 %v7027_v27  ;;  %v4310_v26 = vld [vmem:[%s9390_s4 + $0x78] sm:$0xf0] }
 0x159   :  { %2300 = vmatpush.bf16.msra.mxu3 %v5273_v30  ;;  %2260 = vmatpush.bf16.msra.mxu0 %v4441_v35  ;;  %v4566_v30 = vld [vmem:[%s9390_s4 + $0x278] sm:$0xf0]  ;;  %v4313_v38 = vor.u32 %v5852_v25, %v4310_v26  ;;  %v5524_v26 = vld [vmem:[%s9391_s5 + $0x1f0] sm:$0xf] }
 0x15a   :  { %2274 = vmatpush.bf16.msra.mxu1 %v4697_v40  ;;  %v4854_v35 = vld [vmem:[%s9390_s4 + $0x4b8] sm:$0xf0] }
 0x15b   :  { %v6052_v40 = vld [vmem:[%s9390_s4 + $0x69c] sm:$0xf]  ;;  %v4857_v47 = vor.u32 %v5988_v32, %v4854_v35  ;;  %v5316_v35 = vld [vmem:[%s9391_s5 + $0x50] sm:$0xf] }
 0x15c   :  { %2287 = vmatpush.bf16.msra.mxu2 %v4985_v43  ;;  %v5110_v41 = vld [vmem:[%s9390_s4 + $0x6b8] sm:$0xf0]  ;;  %v4569_v43 = vor.u32 %v5916_v29, %v4566_v30  ;;  %v570_v29 = vperm.slane %v8185_v2, 0  ;;  %v8226_v30 = vpop.f32.mrf.mxu1 }
 0x15d   :  { %2301 = vmatpush.bf16.msra.mxu3 %v5241_v46  ;;  %2261 = vmatpush.bf16.msra.mxu0 %v4409_v49  ;;  %v5844_v42 = vld [vmem:[%s9390_s4 + $0x1c] sm:$0xf]  ;;  %v6112_v49 = vld [vmem:[%s9391_s5 + $0x74] sm:$0xf0]  ;;  %v5113_v51 = vor.u32 %v6052_v40, %v5110_v41 }
 0x15e   :  { %2275 = vmatpush.bf16.msra.mxu1 %v4665_v54  ;;  %v4278_v44 = vld [vmem:[%s9390_s4 + $0x38] sm:$0xf0]  ;;  %v6128_v54 = vld [vmem:[%s9391_s5 + $0xf4] sm:$0xf0]  ;;  %v5333_v5 = vor.u32 %v6112_v49, %v5332_v48  ;;  %v6158_v48 = vld [vmem:[%s9391_s5 + $0x1e4] sm:$0xf0] }
 0x15f   :  { %v5908_v45 = vld [vmem:[%s9390_s4 + $0x21c] sm:$0xf]  ;;  %v4281_v63 = vor.u32 %v5844_v42, %v4278_v44  ;;  %v5397_v7 = vor.u32 %v6128_v54, %v5396_v50  ;;  %v5380_v42 = vld [vmem:[%s9391_s5 + $0xd0] sm:$0xf]  ;;  %v8257_v50 = vpop.f32.mrf.mxu2  ;;  %v5308_v54 = vld [vmem:[%s9391_s5 + $0x40] sm:$0xf] }
 0x160   :  { %2288 = vmatpush.bf16.msra.mxu2 %v4953_v60  ;;  %v4534_v46 = vld [vmem:[%s9390_s4 + $0x238] sm:$0xf0]  ;;  %v8172_v60 = vpop.f32.mrf.mxu0 }
 0x161   :  { %2302 = vmatpush.bf16.msra.mxu3 %v5209_v0  ;;  %2262 = vmatpush.bf16.msra.mxu0 %v4377_v3  ;;  %v5980_v55 = vld [vmem:[%s9390_s4 + $0x45c] sm:$0xf]  ;;  %v8187_v3 = vpop.f32.mrf.mxu3  ;;  %v4537_v4 = vor.u32 %v5908_v45, %v4534_v46  ;;  %v5452_v45 = vld [vmem:[%s9391_s5 + $0x160] sm:$0xf] }
 0x162   :  { %2276 = vmatpush.bf16.msra.mxu1 %v4633_v6  ;;  %v4822_v56 = vld [vmem:[%s9390_s4 + $0x478] sm:$0xf0]  ;;  %v5324_v6 = vld [vmem:[%s9391_s5 + $0x60] sm:$0xf] }
 0x163   :  { %v6044_v0 = vld [vmem:[%s9390_s4 + $0x65c] sm:$0xf]  ;;  %v4825_v8 = vor.u32 %v5980_v55, %v4822_v56  ;;  %v6106_v55 = vld [vmem:[%s9391_s5 + $0x44] sm:$0xf0]  ;;  %v571_v56 = vperm.slane %v8185_v2, 1 }
 0x164   :  { %2289 = vmatpush.bf16.msra.mxu2 %v4921_v11  ;;  %v5078_v1 = vld [vmem:[%s9390_s4 + $0x678] sm:$0xf0]  ;;  %v6110_v11 = vld [vmem:[%s9391_s5 + $0x64] sm:$0xf0] }
 0x165   :  { %2303 = vmatpush.bf16.msra.mxu3 %v5177_v17  ;;  %2263 = vmatpush.bf16.msra.mxu0 %v4345_v20  ;;  %v5081_v17 = vor.u32 %v6044_v0, %v5078_v1  ;;  %v5972_v18 = vld [vmem:[%s9390_s4 + $0x41c] sm:$0xf]  ;;  %v5325_v25 = vor.u32 %v6110_v11, %v5324_v6  ;;  %v5372_v0 = vld [vmem:[%s9391_s5 + $0xc0] sm:$0xf]  ;;  %v6122_v1 = vld [vmem:[%s9391_s5 + $0xc4] sm:$0xf0] }
 0x166   :  { %2277 = vmatpush.bf16.msra.mxu1 %v4601_v24  ;;  %v4790_v19 = vld [vmem:[%s9390_s4 + $0x438] sm:$0xf0]  ;;  %v6144_v24 = vld [vmem:[%s9391_s5 + $0x174] sm:$0xf0] }
 0x167   :  { %v6036_v20 = vld [vmem:[%s9390_s4 + $0x61c] sm:$0xf]  ;;  %v4793_v32 = vor.u32 %v5972_v18, %v4790_v19  ;;  %v5461_v41 = vor.u32 %v6144_v24, %v5460_v23  ;;  %v6140_v6 = vld [vmem:[%s9391_s5 + $0x154] sm:$0xf0]  ;;  %v1878_v18 = vadd.f32 %v7943_v52, %v570_v29  ;;  %v1932_v19 = vadd.f32 %v8022_v33, %v571_v56  ;;  %v2003_v24 = vpop.f32.mrf.mxu1  ;;  %v5436_v52 = vld [vmem:[%s9391_s5 + $0x140] sm:$0xf] }
 0x168   :  { %2290 = vmatpush.bf16.msra.mxu2 %v4889_v28  ;;  %v5046_v22 = vld [vmem:[%s9390_s4 + $0x638] sm:$0xf0]  ;;  %v6160_v28 = vld [vmem:[%s9391_s5 + $0x1f4] sm:$0xf0]  ;;  %v8255_v49 = vpop.f32.mrf.mxu0  ;;  %v1934_v23 = vadd.f32 %v8092_v9, %v571_v56  ;;  %v6138_v33 = vld [vmem:[%s9391_s5 + $0x144] sm:$0xf0] }
 0x169   :  { %2304 = vmatpush.bf16.msra.mxu3 %v5145_v31  ;;  %2264 = vmatpush.bf16.msra.mxu0 %v4313_v38  ;;  %v5389_v31 = vor.u32 %v6126_v13, %v5388_v12  ;;  %v6108_v38 = vld [vmem:[%s9391_s5 + $0x54] sm:$0xf0]  ;;  %v5049_v40 = vor.u32 %v6036_v20, %v5046_v22  ;;  %v5525_v44 = vor.u32 %v6160_v28, %v5524_v26  ;;  %v5500_v28 = vld [vmem:[%s9391_s5 + $0x1c0] sm:$0xf] }
 0x16a   :  { %2278 = vmatpush.bf16.msra.mxu1 %v4569_v43  ;;  %v6124_v43 = vld [vmem:[%s9391_s5 + $0xd4] sm:$0xf0]  ;;  %v5317_v46 = vor.u32 %v6108_v38, %v5316_v35  ;;  %v5373_v13 = vor.u32 %v6122_v1, %v5372_v0  ;;  %v1892_v35 = vadd.f32 %v7994_v16, %v1878_v18  ;;  %v1946_v38 = vadd.f32 %v8066_v58, %v1932_v19  ;;  %v2017_v16 = vpop.f32.mrf.mxu2 }
 0x16b   :  { %v6156_v11 = vld [vmem:[%s9391_s5 + $0x1d4] sm:$0xf0] }
 0x16c   :  { %2291 = vmatpush.bf16.msra.mxu2 %v4857_v47  ;;  %v5516_v47 = vld [vmem:[%s9391_s5 + $0x1e0] sm:$0xf]  ;;  %v6100_v56 = vld [vmem:[%s9391_s5 + $0x14] sm:$0xf0] }
 0x16d   :  { %2305 = vmatpush.bf16.msra.mxu3 %v5113_v51  ;;  %2265 = vmatpush.bf16.msra.mxu0 %v4281_v63  ;;  %v5381_v51 = vor.u32 %v6124_v43, %v5380_v42  ;;  %v8266_v63 = vpop.f32.mrf.mxu3  ;;  %v6118_v42 = vld [vmem:[%s9391_s5 + $0xa4] sm:$0xf0] }
 0x16e   :  { %2279 = vmatpush.bf16.msra.mxu1 %v4537_v4  ;;  %v5517_v4 = vor.u32 %v6158_v48, %v5516_v47  ;;  %v1906_v47 = vadd.f32 %v8024_v34, %v1892_v35 }
 0x170   :  { %2292 = vmatpush.bf16.msra.mxu2 %v4825_v8  ;;  %2266 = vmatmul.bf16.vlgmr.msra.gmra.mxu0 %v6974_v57  ;;  %v6142_v57 = vld [vmem:[%s9391_s5 + $0x164] sm:$0xf0]  ;;  %v5508_v8 = vld [vmem:[%s9391_s5 + $0x1d0] sm:$0xf]  ;;  %v2043_v9 = vpop.f32.mrf.mxu0 }
 0x171   :  { %3111 = vmatpush.bf16.msrb.mxu0 %v5333_v5  ;;  %2306 = vmatpush.bf16.msra.mxu3 %v5081_v17  ;;  %v5444_v5 = vld [vmem:[%s9391_s5 + $0x150] sm:$0xf]  ;;  %v6104_v17 = vld [vmem:[%s9391_s5 + $0x34] sm:$0xf0] }
 0x172   :  { %3125 = vmatpush.bf16.msrb.mxu1 %v5397_v7  ;;  %v5309_v7 = vor.u32 %v6106_v55, %v5308_v54  ;;  %v5445_v20 = vor.u32 %v6140_v6, %v5444_v5  ;;  %v2057_v5 = vpop.f32.mrf.mxu1 }
 0x173   :  { %2280 = vmatmul.bf16.vlgmr.msra.gmra.mxu1 %v6982_v62  ;;  %v1876_v62 = vadd.f32 %v7870_v15, %v570_v29  ;;  %v5453_v15 = vor.u32 %v6142_v57, %v5452_v45  ;;  %v572_v45 = vperm.slane %v8185_v2, 2  ;;  %v5428_v57 = vld [vmem:[%s9391_s5 + $0x130] sm:$0xf] }
 0x174   :  { %2293 = vmatpush.bf16.msra.mxu2 %v4793_v32  ;;  %v6102_v32 = vld [vmem:[%s9391_s5 + $0x24] sm:$0xf0] }
 0x175   :  { %3112 = vmatpush.bf16.msrb.mxu0 %v5325_v25  ;;  %2307 = vmatpush.bf16.msra.mxu3 %v5049_v40  ;;  %v1890_v12 = vadd.f32 %v7908_v36, %v1876_v62  ;;  %v6120_v36 = vld [vmem:[%s9391_s5 + $0xb4] sm:$0xf0]  ;;  %v5509_v25 = vor.u32 %v6156_v11, %v5508_v8  ;;  %v5437_v40 = vor.u32 %v6138_v33, %v5436_v52  ;;  %v8344_v48 = vpop.f32.mrf.mxu3  ;;  %v5492_v62 = vld [vmem:[%s9391_s5 + $0x1b0] sm:$0xf]  ;;  %v6134_v8 = vld [vmem:[%s9391_s5 + $0x124] sm:$0xf0] }
 0x176   :  { %3126 = vmatpush.bf16.msrb.mxu1 %v5389_v31  ;;  %v5292_v31 = vld [vmem:[%s9391_s5 + $0x20] sm:$0xf]  ;;  %v1990_v55 = vadd.f32 %v8255_v49, %v572_v45  ;;  %v6116_v49 = vld [vmem:[%s9391_s5 + $0x94] sm:$0xf0]  ;;  %v1920_v11 = vadd.f32 %v8032_v39, %v1906_v47 }
 0x177   :  { %2294 = vmatmul.bf16.vlgmr.msra.gmra.mxu2 %v7016_v21  ;;  %v5300_v21 = vld [vmem:[%s9391_s5 + $0x30] sm:$0xf]  ;;  %v1904_v22 = vadd.f32 %v7945_v53, %v1890_v12  ;;  %v6154_v53 = vld [vmem:[%s9391_s5 + $0x1c4] sm:$0xf0]  ;;  %v5404_v47 = vld [vmem:[%s9391_s5 + $0x100] sm:$0xf] }
 0x178   :  { %3139 = vmatpush.bf16.msrb.mxu2 %v5461_v41  ;;  %2308 = vmatmul.bf16.vlgmr.msra.gmra.mxu3 %v7027_v27  ;;  %v5364_v27 = vld [vmem:[%s9391_s5 + $0xb0] sm:$0xf]  ;;  %v5301_v26 = vor.u32 %v6104_v17, %v5300_v21  ;;  %v5356_v41 = vld [vmem:[%s9391_s5 + $0xa0] sm:$0xf]  ;;  %v5501_v58 = vor.u32 %v6154_v53, %v5500_v28  ;;  %v6150_v17 = vld [vmem:[%s9391_s5 + $0x1a4] sm:$0xf0]  ;;  %v2004_v19 = vadd.f32 %v2003_v24, %v1990_v55  ;;  %v2045_v33 = vpop.f32.mrf.mxu0 }
 0x179   :  { %3153 = vmatpush.bf16.msrb.mxu3 %v5525_v44  ;;  %3113 = vmatpush.bf16.msrb.mxu0 %v5317_v46  ;;  %v5365_v29 = vor.u32 %v6120_v36, %v5364_v27  ;;  %v8332_v43 = vadd.f32 %v7956_v59, %v1904_v22  ;;  %v1948_v44 = vadd.f32 %v8134_v37, %v1934_v23  ;;  %v6136_v46 = vld [vmem:[%s9391_s5 + $0x134] sm:$0xf0]  ;;  %v5484_v21 = vld [vmem:[%s9391_s5 + $0x1a0] sm:$0xf]  ;;  %v6114_v27 = vld [vmem:[%s9391_s5 + $0x84] sm:$0xf0] }
 0x17a   :  { %3127 = vmatpush.bf16.msrb.mxu1 %v5381_v51  ;;  %v1960_v59 = vadd.f32 %v8094_v10, %v1946_v38  ;;  %v5293_v37 = vor.u32 %v6102_v32, %v5292_v31  ;;  %v6152_v51 = vld [vmem:[%s9391_s5 + $0x1b4] sm:$0xf0]  ;;  %v5357_v34 = vor.u32 %v6118_v42, %v5356_v41  ;;  %v5284_v10 = vld [vmem:[%s9391_s5 + $0x10] sm:$0xf]  ;;  %v5429_v0 = vor.u32 %v6136_v46, %v5428_v57  ;;  %v5580_v57 = vld [vmem:[%s9391_s5 + $0x260] sm:$0xf] }
 0x17b   :  { %v1962_v54 = vadd.f32 %v8174_v61, %v1948_v44  ;;  %v5348_v61 = vld [vmem:[%s9391_s5 + $0x90] sm:$0xf]  ;;  %v2314_v1 = vmax.f32 %v8332_v43, 0.0  ;;  %v5493_v6 = vor.u32 %v6152_v51, %v5492_v62  ;;  %v6176_v23 = vld [vmem:[%s9391_s5 + $0x274] sm:$0xf0]  ;;  %v2018_v52 = vadd.f32 %v2017_v16, %v2004_v19 }
 0x17c   :  { %3140 = vmatpush.bf16.msrb.mxu2 %v5453_v15  ;;  %v573_v15 = vperm.slane %v8185_v2, 3  ;;  %v1974_v12 = vadd.f32 %v8102_v14, %v1960_v59  ;;  %v5349_v39 = vor.u32 %v6116_v49, %v5348_v61  ;;  %v6098_v14 = vld [vmem:[%s9391_s5 + $0x4] sm:$0xf0]  ;;  %v5412_v24 = vld [vmem:[%s9391_s5 + $0x110] sm:$0xf]  ;;  %v5485_v28 = vor.u32 %v6150_v17, %v5484_v21 }
 0x17d   :  { %3154 = vmatpush.bf16.msrb.mxu3 %v5517_v4  ;;  %3114 = vmatpush.bf16.msrb.mxu0 %v5309_v7  ;;  %v1988_v4 = vadd.f32 %v8172_v60, %v572_v45  ;;  %v5420_v7 = vld [vmem:[%s9391_s5 + $0x120] sm:$0xf]  ;;  %v1976_v18 = vadd.f32 %v8187_v3, %v1962_v54  ;;  %v5588_v3 = vld [vmem:[%s9391_s5 + $0x270] sm:$0xf]  ;;  %v6132_v53 = vld [vmem:[%s9391_s5 + $0x114] sm:$0xf0]  ;;  %v2032_v59 = vadd.f32 %v8344_v48, %v2018_v52 }
 0x17e   :  { %3128 = vmatpush.bf16.msrb.mxu1 %v5373_v13  ;;  %v5285_v13 = vor.u32 %v6100_v56, %v5284_v10  ;;  %v5276_v60 = vld [vmem:[%s9391_s5] sm:$0xf]  ;;  %v2044_v36 = vadd.f32 %v2043_v9, %v573_v15  ;;  %v5421_v22 = vor.u32 %v6134_v8, %v5420_v7  ;;  %v5652_v9 = vld [vmem:[%s9391_s5 + $0x2f0] sm:$0xf]  ;;  %v2322_v31 = vmax.f32 %v1920_v11, 0.0 }
 0x17f   :  { %v2315_v32 = vmax.f32 %v1974_v12, 0.0  ;;  %v5277_v35 = vor.u32 %v6098_v14, %v5276_v60  ;;  %v5476_v38 = vld [vmem:[%s9391_s5 + $0x190] sm:$0xf]  ;;  %v2323_v41 = vmax.f32 %v1976_v18, 0.0  ;;  %v5589_v44 = vor.u32 %v6176_v23, %v5588_v3  ;;  %v6174_v46 = vld [vmem:[%s9391_s5 + $0x264] sm:$0xf0] }
 0x180   :  { %3141 = vmatpush.bf16.msrb.mxu2 %v5445_v20  ;;  %v5340_v20 = vld [vmem:[%s9391_s5 + $0x80] sm:$0xf]  ;;  %v2058_v45 = vadd.f32 %v2057_v5, %v2044_v36  ;;  %v2046_v16 = vadd.f32 %v2045_v33, %v573_v15  ;;  %v6130_v62 = vld [vmem:[%s9391_s5 + $0x104] sm:$0xf0]  ;;  %v8441_v55 = vpack.c.bf16 %v2322_v31, %v2314_v1  ;;  %v5581_v61 = vor.u32 %v6174_v46, %v5580_v57  ;;  %v6172_v5 = vld [vmem:[%s9391_s5 + $0x254] sm:$0xf0] }
 0x181   :  { %3155 = vmatpush.bf16.msrb.mxu3 %v5509_v25  ;;  %3115 = vmatpush.bf16.msrb.mxu0 %v5301_v26  ;;  %v2002_v25 = vadd.f32 %v8226_v30, %v1988_v4  ;;  %v2071_v26 = vpop.f32.mrf.mxu2  ;;  %v2085_v30 = vpop.f32.mrf.mxu3  ;;  %v5341_v43 = vor.u32 %v6114_v27, %v5340_v20  ;;  %v5644_v51 = vld [vmem:[%s9391_s5 + $0x2e0] sm:$0xf]  ;;  %v6190_v54 = vld [vmem:[%s9391_s5 + $0x2e4] sm:$0xf0]  ;;  %v8449_v56 = vpack.c.bf16 %v2323_v41, %v2315_v32  ;;  %v5572_v4 = vld [vmem:[%s9391_s5 + $0x250] sm:$0xf] }
 0x182   :  { %3129 = vmatpush.bf16.msrb.mxu1 %v5365_v29  ;;  %v6192_v29 = vld [vmem:[%s9391_s5 + $0x2f4] sm:$0xf0]  ;;  %v5468_v48 = vld [vmem:[%s9391_s5 + $0x180] sm:$0xf]  ;;  %v6146_v10 = vld [vmem:[%s9391_s5 + $0x184] sm:$0xf0]  ;;  %v5405_v1 = vor.u32 %v6130_v62, %v5404_v47  ;;  %v5573_v18 = vor.u32 %v6172_v5, %v5572_v4 }
 0x183   :  { %v2016_v42 = vadd.f32 %v8257_v50, %v2002_v25  ;;  %v5653_v50 = vor.u32 %v6192_v29, %v5652_v9  ;;  %v2324_v7 = vmax.f32 %v2032_v59, 0.0  ;;  %v5636_v11 = vld [vmem:[%s9391_s5 + $0x2d0] sm:$0xf]  ;;  %v6188_v12 = vld [vmem:[%s9391_s5 + $0x2d4] sm:$0xf0]  ;;  %v574_v62 = vperm.slane %v8185_v2, 4 }
 0x184   :  { %3142 = vmatpush.bf16.msrb.mxu2 %v5437_v40  ;;  %v6148_v40 = vld [vmem:[%s9391_s5 + $0x194] sm:$0xf0]  ;;  %v6170_v14 = vld [vmem:[%s9391_s5 + $0x244] sm:$0xf0]  ;;  %v5637_v20 = vor.u32 %v6188_v12, %v5636_v11  ;;  %v5628_v36 = vld [vmem:[%s9391_s5 + $0x2c0] sm:$0xf] }
 0x185   :  { %3156 = vmatpush.bf16.msrb.mxu3 %v5501_v58  ;;  %3116 = vmatpush.bf16.msrb.mxu0 %v5293_v37  ;;  %v5413_v58 = vor.u32 %v6132_v53, %v5412_v24  ;;  %v5477_v37 = vor.u32 %v6148_v40, %v5476_v38  ;;  %v2030_v15 = vadd.f32 %v8266_v63, %v2016_v42  ;;  %v5716_v24 = vld [vmem:[%s9391_s5 + $0x370] sm:$0xf]  ;;  %v6208_v25 = vld [vmem:[%s9391_s5 + $0x374] sm:$0xf0]  ;;  %v5708_v32 = vld [vmem:[%s9391_s5 + $0x360] sm:$0xf] }
 0x186   :  { %3130 = vmatpush.bf16.msrb.mxu1 %v5357_v34  ;;  %v2072_v34 = vadd.f32 %v2071_v26, %v2058_v45  ;;  %v5469_v63 = vor.u32 %v6146_v10, %v5468_v48  ;;  %v5717_v33 = vor.u32 %v6208_v25, %v5716_v24  ;;  %v6168_v53 = vld [vmem:[%s9391_s5 + $0x234] sm:$0xf0]  ;;  %v5620_v29 = vld [vmem:[%s9391_s5 + $0x2b0] sm:$0xf]  ;;  %v5548_v41 = vld [vmem:[%s9391_s5 + $0x220] sm:$0xf] }
 0x187   :  { %v2316_v21 = vmax.f32 %v2030_v15, 0.0  ;;  %v6184_v31 = vld [vmem:[%s9391_s5 + $0x2b4] sm:$0xf0]  ;;  %v6166_v42 = vld [vmem:[%s9391_s5 + $0x224] sm:$0xf0] }
 0x188   :  { %3143 = vmatpush.bf16.msrb.mxu2 %v5429_v0  ;;  %v2059_v0 = vpop.f32.mrf.mxu1  ;;  %v5612_v45 = vld [vmem:[%s9391_s5 + $0x2a0] sm:$0xf]  ;;  %v6204_v57 = vld [vmem:[%s9391_s5 + $0x354] sm:$0xf0]  ;;  %v5549_v46 = vor.u32 %v6166_v42, %v5548_v41  ;;  %v6202_v10 = vld [vmem:[%s9391_s5 + $0x344] sm:$0xf0] }
 0x189   :  { %3157 = vmatpush.bf16.msrb.mxu3 %v5493_v6  ;;  %3117 = vmatpush.bf16.msrb.mxu0 %v5285_v13  ;;  %v2060_v49 = vadd.f32 %v2059_v0, %v2046_v16  ;;  %v5645_v6 = vor.u32 %v6190_v54, %v5644_v51  ;;  %v2073_v8 = vpop.f32.mrf.mxu2  ;;  %v2086_v13 = vadd.f32 %v2085_v30, %v2072_v34  ;;  %v2087_v17 = vpop.f32.mrf.mxu3  ;;  %v6206_v30 = vld [vmem:[%s9391_s5 + $0x364] sm:$0xf0]  ;;  %v6164_v59 = vld [vmem:[%s9391_s5 + $0x214] sm:$0xf0]  ;;  %v5604_v51 = vld [vmem:[%s9391_s5 + $0x290] sm:$0xf] }
 0x18a   :  { %3131 = vmatpush.bf16.msrb.mxu1 %v5349_v39  ;;  %v5564_v39 = vld [vmem:[%s9391_s5 + $0x240] sm:$0xf]  ;;  %v8472_v27 = vpack.c.bf16 %v2324_v7, %v2316_v21  ;;  %v5709_v38 = vor.u32 %v6206_v30, %v5708_v32  ;;  %v6182_v16 = vld [vmem:[%s9391_s5 + $0x2a4] sm:$0xf0]  ;;  %v6180_v54 = vld [vmem:[%s9391_s5 + $0x294] sm:$0xf0] }
 0x18b   :  { %v2074_v60 = vadd.f32 %v2073_v8, %v2060_v49  ;;  %v2317_v3 = vmax.f32 %v2086_v13, 0.0  ;;  %v5565_v52 = vor.u32 %v6170_v14, %v5564_v39  ;;  %v5692_v48 = vld [vmem:[%s9391_s5 + $0x340] sm:$0xf]  ;;  %v5334_v4 = vld [vmem:[%s9391_s5 + $0x78] sm:$0xf0]  ;;  %v5605_v5 = vor.u32 %v6180_v54, %v5604_v51 }
 0x18c   :  { %3144 = vmatpush.bf16.msrb.mxu2 %v5421_v22  ;;  %v6186_v22 = vld [vmem:[%s9391_s5 + $0x2c4] sm:$0xf0]  ;;  %v5532_v0 = vld [vmem:[%s9391_s5 + $0x200] sm:$0xf]  ;;  %v5693_v49 = vor.u32 %v6202_v10, %v5692_v48  ;;  %v5398_v11 = vld [vmem:[%s9391_s5 + $0xf8] sm:$0xf0] }
 0x18d   :  { %3158 = vmatpush.bf16.msrb.mxu3 %v5485_v28  ;;  %3118 = vmatpush.bf16.msrb.mxu0 %v5277_v35  ;;  %v2088_v19 = vadd.f32 %v2087_v17, %v2074_v60  ;;  %v5556_v28 = vld [vmem:[%s9391_s5 + $0x230] sm:$0xf]  ;;  %v5629_v9 = vor.u32 %v6186_v22, %v5628_v36  ;;  %v2099_v40 = vpop.f32.mrf.mxu0  ;;  %v6178_v8 = vld [vmem:[%s9391_s5 + $0x284] sm:$0xf0]  ;;  %v6200_v17 = vld [vmem:[%s9391_s5 + $0x334] sm:$0xf0] }
 0x18e   :  { %3132 = vmatpush.bf16.msrb.mxu1 %v5341_v43  ;;  %v5557_v35 = vor.u32 %v6168_v53, %v5556_v28  ;;  %v5621_v43 = vor.u32 %v6184_v31, %v5620_v29  ;;  %v2100_v7 = vadd.f32 %v2099_v40, %v574_v62  ;;  %v8579_v60 = vld [vmem:[%s9387_s1 + $0x8] sm:$0xff]  ;;  %v5684_v21 = vld [vmem:[%s9391_s5 + $0x330] sm:$0xf]  ;;  %v6125_v25 = vld [vmem:[%s9391_s5 + $0xe4] sm:$0xf] }
 0x18f   :  { %v2325_v23 = vmax.f32 %v2088_v19, 0.0  ;;  %v5685_v39 = vor.u32 %v6200_v17, %v5684_v21  ;;  %v6198_v28 = vld [vmem:[%s9391_s5 + $0x324] sm:$0xf0]  ;;  %v6107_v30 = vld [vmem:[%s9391_s5 + $0x54] sm:$0xf] }
 0x190   :  { %3145 = vmatpush.bf16.msrb.mxu2 %v5413_v58  ;;  %3119 = vmatmul.bf16.vlgmr.msrb.gmra.mxu0 %v8441_v55  ;;  %v5700_v58 = vld [vmem:[%s9391_s5 + $0x350] sm:$0xf]  ;;  %v2113_v34 = vpop.f32.mrf.mxu1  ;;  %v6123_v40 = vld [vmem:[%s9391_s5 + $0xd4] sm:$0xf]  ;;  %v5382_v42 = vld [vmem:[%s9391_s5 + $0xd8] sm:$0xf0] }
 0x191   :  { %3167 = vmatpush.bf16.msra.mxu0 %v5589_v44  ;;  %3159 = vmatpush.bf16.msrb.mxu3 %v5477_v37  ;;  %v8487_v26 = vpack.c.bf16 %v2325_v23, %v2317_v3  ;;  %v8517_v44 = vld [vmem:[%s9387_s1] sm:$0xff]  ;;  %v5701_v47 = vor.u32 %v6204_v57, %v5700_v58  ;;  %v5613_v37 = vor.u32 %v6182_v16, %v5612_v45  ;;  %v5326_v23 = vld [vmem:[%s9391_s5 + $0x68] sm:$0xf0]  ;;  %v6196_v45 = vld [vmem:[%s9391_s5 + $0x314] sm:$0xf0]  ;;  %s6325_s1 = smov 64  }
 0x192   :  { %3181 = vmatpush.bf16.msra.mxu1 %v5653_v50  ;;  %3505 = vrot.lane.b32.xlu0 %v8517_v44, %s6324_s23  ;;  %v5540_v50 = vld [vmem:[%s9391_s5 + $0x210] sm:$0xf]  ;;  %v2114_v36 = vadd.f32 %v2113_v34, %v2100_v7  ;;  %v6109_v3 = vld [vmem:[%s9391_s5 + $0x64] sm:$0xf]  ;;  %v5374_v54 = vld [vmem:[%s9391_s5 + $0xc8] sm:$0xf0] }
 0x193   :  { %3133 = vmatmul.bf16.vlgmr.msrb.gmra.mxu1 %v8449_v56  ;;  %v5541_v15 = vor.u32 %v6164_v59, %v5540_v50  ;;  %v5329_v31 = vor.u32 %v6109_v3, %v5326_v23  ;;  %v6105_v59 = vld [vmem:[%s9391_s5 + $0x44] sm:$0xf]  ;;  %v5660_v34 = vld [vmem:[%s9391_s5 + $0x300] sm:$0xf]  ;;  %v6194_v48 = vld [vmem:[%s9391_s5 + $0x304] sm:$0xf0] }
 0x194   :  { %3146 = vmatpush.bf16.msrb.mxu2 %v5405_v1  ;;  %v6111_v1 = vld [vmem:[%s9391_s5 + $0x74] sm:$0xf]  ;;  %v6121_v51 = vld [vmem:[%s9391_s5 + $0xc4] sm:$0xf]  ;;  %v5302_v7 = vld [vmem:[%s9391_s5 + $0x38] sm:$0xf0] }
 0x195   :  { %3168 = vmatpush.bf16.msra.mxu0 %v5581_v61  ;;  %3160 = vmatpush.bf16.msrb.mxu3 %v5469_v63  ;;  %v6162_v61 = vld [vmem:[%s9391_s5 + $0x204] sm:$0xf0]  ;;  %v6127_v63 = vld [vmem:[%s9391_s5 + $0xf4] sm:$0xf]  ;;  %v2101_v12 = vpop.f32.mrf.mxu0  ;;  %v5337_v14 = vor.u32 %v6111_v1, %v5334_v4  ;;  %v6224_v1 = vld [vmem:[%s9391_s5 + $0x3f4] sm:$0xf0] }
 0x196   :  { %3182 = vmatpush.bf16.msra.mxu1 %v5645_v6  ;;  %v5596_v6 = vld [vmem:[%s9391_s5 + $0x280] sm:$0xf]  ;;  %v5533_v19 = vor.u32 %v6162_v61, %v5532_v0  ;;  %v2102_v22 = vadd.f32 %v2101_v12, %v574_v62  ;;  %v5401_v24 = vor.u32 %v6127_v63, %v5398_v11  ;;  %v5385_v62 = vor.u32 %v6123_v40, %v5382_v42  ;;  %v6143_v4 = vld [vmem:[%s9391_s5 + $0x174] sm:$0xf]  ;;  %v5462_v11 = vld [vmem:[%s9391_s5 + $0x178] sm:$0xf0] }
 0x197   :  { %3147 = vmatmul.bf16.vlgmr.msrb.gmra.mxu2 %v8472_v27  ;;  %v5661_v0 = vor.u32 %v6194_v48, %v5660_v34  ;;  %v6119_v12 = vld [vmem:[%s9391_s5 + $0xb4] sm:$0xf]  ;;  %v5465_v21 = vor.u32 %v6143_v4, %v5462_v11  ;;  %v5772_v17 = vld [vmem:[%s9391_s5 + $0x3e0] sm:$0xf]  ;;  %v5294_v3 = vld [vmem:[%s9391_s5 + $0x28] sm:$0xf0] }
 0x198   :  { %3195 = vmatpush.bf16.msra.mxu2 %v5717_v33  ;;  %3161 = vmatmul.bf16.vlgmr.msrb.gmra.mxu3 %v8487_v26  ;;  %v5676_v33 = vld [vmem:[%s9391_s5 + $0x320] sm:$0xf]  ;;  %v2115_v29 = vpop.f32.mrf.mxu1  ;;  %v575_v40 = vperm.slane %v8185_v2, 5  ;;  %v5350_v42 = vld [vmem:[%s9391_s5 + $0x98] sm:$0xf0] }
 0x199   :  { %3169 = vmatpush.bf16.msra.mxu0 %v5573_v18  ;;  %v2116_v32 = vadd.f32 %v2115_v29, %v2102_v22  ;;  %v6101_v22 = vld [vmem:[%s9391_s5 + $0x24] sm:$0xf]  ;;  %v5342_v48 = vld [vmem:[%s9391_s5 + $0x88] sm:$0xf0] }
 0x19a   :  { %3183 = vmatpush.bf16.msra.mxu1 %v5637_v20  ;;  %v2127_v13 = vpop.f32.mrf.mxu2  ;;  %3507 = vrot.lane.b32.xlu0 %v8579_v60, %s6324_s23  ;;  %v5597_v20 = vor.u32 %v6178_v8, %v5596_v6  ;;  %v6103_v6 = vld [vmem:[%s9391_s5 + $0x34] sm:$0xf]  ;;  %v5377_v8 = vor.u32 %v6121_v51, %v5374_v54  ;;  %v6137_v2 = vld [vmem:[%s9391_s5 + $0x144] sm:$0xf]  ;;  %v5590_v54 = vld [vmem:[%s9391_s5 + $0x278] sm:$0xf0] }
 0x19b   :  { %v2141_v18 = vpop.f32.mrf.mxu3  ;;  %v2128_v53 = vadd.f32 %v2127_v13, %v2114_v36  ;;  %v5366_v13 = vld [vmem:[%s9391_s5 + $0xb8] sm:$0xf0]  ;;  %v6113_v34 = vld [vmem:[%s9391_s5 + $0x84] sm:$0xf] }
 0x19c   :  { %3196 = vmatpush.bf16.msra.mxu2 %v5709_v38  ;;  %v5369_v23 = vor.u32 %v6119_v12, %v5366_v13 }
 0x19d   :  { %3170 = vmatpush.bf16.msra.mxu0 %v5565_v52  ;;  %v5390_v52 = vld [vmem:[%s9391_s5 + $0xe8] sm:$0xf0]  ;;  %v2142_v16 = vadd.f32 %v2141_v18, %v2128_v53  ;;  %v6222_v18 = vld [vmem:[%s9391_s5 + $0x3e4] sm:$0xf0]  ;;  %v6139_v53 = vld [vmem:[%s9391_s5 + $0x154] sm:$0xf] }
 0x19e   :  { %3184 = vmatpush.bf16.msra.mxu1 %v5629_v9  ;;  %v5677_v9 = vor.u32 %v6198_v28, %v5676_v33  ;;  %v5393_v38 = vor.u32 %v6125_v25, %v5390_v52  ;;  %v6117_v25 = vld [vmem:[%s9391_s5 + $0xa4] sm:$0xf]  ;;  %v5358_v52 = vld [vmem:[%s9391_s5 + $0xa8] sm:$0xf0]  ;;  %v5764_v33 = vld [vmem:[%s9391_s5 + $0x3d0] sm:$0xf] }
 0x19f   :  { %v2318_v10 = vmax.f32 %v2142_v16, 0.0  ;;  %v6220_v28 = vld [vmem:[%s9391_s5 + $0x3d4] sm:$0xf0]  ;;  %v6218_v16 = vld [vmem:[%s9391_s5 + $0x3c4] sm:$0xf0] }
 0x1a0   :  { %3197 = vmatpush.bf16.msra.mxu2 %v5701_v47  ;;  %v5765_v29 = vor.u32 %v6220_v28, %v5764_v33  ;;  %v5732_v28 = vld [vmem:[%s9391_s5 + $0x390] sm:$0xf] }
 0x1a1   :  { %3171 = vmatpush.bf16.msra.mxu0 %v5557_v35  ;;  %v5318_v35 = vld [vmem:[%s9391_s5 + $0x58] sm:$0xf0] }
 0x1a2   :  { %3185 = vmatpush.bf16.msra.mxu1 %v5621_v43  ;;  %v2129_v41 = vpop.f32.mrf.mxu2  ;;  %v5668_v43 = vld [vmem:[%s9391_s5 + $0x310] sm:$0xf]  ;;  %v5321_v47 = vor.u32 %v6107_v30, %v5318_v35  ;;  %v5286_v30 = vld [vmem:[%s9391_s5 + $0x18] sm:$0xf0]  ;;  %v5361_v35 = vor.u32 %v6117_v25, %v5358_v52  ;;  %v6171_v25 = vld [vmem:[%s9391_s5 + $0x254] sm:$0xf] }
 0x1a3   :  { %v2130_v58 = vadd.f32 %v2129_v41, %v2116_v32  ;;  %v5669_v57 = vor.u32 %v6196_v45, %v5668_v43  ;;  %v6099_v32 = vld [vmem:[%s9391_s5 + $0x14] sm:$0xf]  ;;  %v5756_v45 = vld [vmem:[%s9391_s5 + $0x3c0] sm:$0xf]  ;;  %v5574_v52 = vld [vmem:[%s9391_s5 + $0x258] sm:$0xf0] }
 0x1a4   :  { %3198 = vmatpush.bf16.msra.mxu2 %v5693_v49  ;;  %v5780_v49 = vld [vmem:[%s9391_s5 + $0x3f0] sm:$0xf]  ;;  %v6115_v41 = vld [vmem:[%s9391_s5 + $0x94] sm:$0xf] }
 0x1a5   :  { %3172 = vmatpush.bf16.msra.mxu0 %v5549_v46  ;;  %v2143_v46 = vpop.f32.mrf.mxu3  ;;  %v5781_v63 = vor.u32 %v6224_v1, %v5780_v49  ;;  %v6135_v49 = vld [vmem:[%s9391_s5 + $0x134] sm:$0xf] }
 0x1a6   :  { %3186 = vmatpush.bf16.msra.mxu1 %v5613_v37  ;;  %v2144_v50 = vadd.f32 %v2143_v46, %v2130_v58  ;;  %v5310_v37 = vld [vmem:[%s9391_s5 + $0x48] sm:$0xf0]  ;;  %v5289_v58 = vor.u32 %v6099_v32, %v5286_v30 }
 0x1a7   :  { %v5313_v61 = vor.u32 %v6105_v59, %v5310_v37  ;;  %3209 = vmatpush.bf16.msra.mxu3 %v5781_v63  ;;  %v5438_v46 = vld [vmem:[%s9391_s5 + $0x148] sm:$0xf0]  ;;  %v6175_v59 = vld [vmem:[%s9391_s5 + $0x274] sm:$0xf]  ;;  %v5353_v37 = vor.u32 %v6115_v41, %v5350_v42  ;;  %v5345_v63 = vor.u32 %v6113_v34, %v5342_v48 }
 0x1a8   :  { %3199 = vmatpush.bf16.msra.mxu2 %v5685_v39  ;;  %v5305_v39 = vor.u32 %v6103_v6, %v5302_v7  ;;  %v5430_v7 = vld [vmem:[%s9391_s5 + $0x138] sm:$0xf0]  ;;  %v5566_v42 = vld [vmem:[%s9391_s5 + $0x248] sm:$0xf0]  ;;  %v6159_v34 = vld [vmem:[%s9391_s5 + $0x1f4] sm:$0xf] }
 0x1a9   :  { %3173 = vmatpush.bf16.msra.mxu0 %v5541_v15  ;;  %v2326_v15 = vmax.f32 %v2144_v50, 0.0  ;;  %v5278_v50 = vld [vmem:[%s9391_s5 + $0x8] sm:$0xf0]  ;;  %v5433_v11 = vor.u32 %v6135_v49, %v5430_v7  ;;  %v6157_v49 = vld [vmem:[%s9391_s5 + $0x1e4] sm:$0xf] }
 0x1aa   :  { %3187 = vmatpush.bf16.msra.mxu1 %v5605_v5  ;;  %v6165_v7 = vld [vmem:[%s9391_s5 + $0x224] sm:$0xf] }
 0x1ab   :  { %v8652_v5 = vpack.c.bf16 %v2326_v15, %v2318_v10 }
 0x1ac   :  { %3200 = vmatpush.bf16.msra.mxu2 %v5677_v9  ;;  %v5297_v9 = vor.u32 %v6101_v22, %v5294_v3 }
 0x1ad   :  { %3174 = vmatpush.bf16.msra.mxu0 %v5533_v19  ;;  %v6141_v19 = vld [vmem:[%s9391_s5 + $0x164] sm:$0xf]  ;;  %v2155_v36 = vpop.f32.mrf.mxu0 }
 0x1ae   :  { %3188 = vmatpush.bf16.msra.mxu1 %v5597_v20  ;;  %v5454_v20 = vld [vmem:[%s9391_s5 + $0x168] sm:$0xf0]  ;;  %v2156_v51 = vadd.f32 %v2155_v36, %v575_v40 }
 0x1af   :  { %v5422_v36 = vld [vmem:[%s9391_s5 + $0x128] sm:$0xf0] }
 0x1b0   :  { %3201 = vmatpush.bf16.msra.mxu2 %v5669_v57  ;;  %3175 = vmatmul.bf16.vlgmr.msra.gmra.mxu0 %v8652_v5  ;;  %v2169_v43 = vpop.f32.mrf.mxu1  ;;  %v5757_v57 = vor.u32 %v6218_v16, %v5756_v45  ;;  %v5654_v45 = vld [vmem:[%s9391_s5 + $0x2f8] sm:$0xf0]  ;;  %v5724_v16 = vld [vmem:[%s9391_s5 + $0x380] sm:$0xf] }
 0x1b1   :  { %3223 = vmatpush.bf16.msrb.mxu0 %v5337_v14  ;;  %v5773_v14 = vor.u32 %v6222_v18, %v5772_v17  ;;  %v2170_v12 = vadd.f32 %v2169_v43, %v2156_v51  ;;  %v5582_v17 = vld [vmem:[%s9391_s5 + $0x268] sm:$0xf0]  ;;  %v5740_v18 = vld [vmem:[%s9391_s5 + $0x3a0] sm:$0xf]  ;;  %v6191_v43 = vld [vmem:[%s9391_s5 + $0x2f4] sm:$0xf] }
 0x1b2   :  { %3237 = vmatpush.bf16.msrb.mxu1 %v5401_v24  ;;  %v5457_v24 = vor.u32 %v6141_v19, %v5454_v20  ;;  %v6214_v19 = vld [vmem:[%s9391_s5 + $0x3a4] sm:$0xf0]  ;;  %v5558_v51 = vld [vmem:[%s9391_s5 + $0x238] sm:$0xf0] }
 0x1b3   :  { %3210 = vmatpush.bf16.msra.mxu3 %v5773_v14  ;;  %v5741_v20 = vor.u32 %v6214_v19, %v5740_v18 }
 0x1b4   :  { %3202 = vmatpush.bf16.msra.mxu2 %v5661_v0  ;;  %v5748_v0 = vld [vmem:[%s9391_s5 + $0x3b0] sm:$0xf] }
 0x1b5   :  { %3224 = vmatpush.bf16.msrb.mxu0 %v5329_v31  ;;  %v5446_v31 = vld [vmem:[%s9391_s5 + $0x158] sm:$0xf0]  ;;  %v2157_v10 = vpop.f32.mrf.mxu0 }
 0x1b6   :  { %3238 = vmatpush.bf16.msrb.mxu1 %v5393_v38  ;;  %v5449_v38 = vor.u32 %v6139_v53, %v5446_v31  ;;  %v2158_v13 = vadd.f32 %v2157_v10, %v575_v40  ;;  %v6212_v53 = vld [vmem:[%s9391_s5 + $0x394] sm:$0xf0]  ;;  %v6189_v10 = vld [vmem:[%s9391_s5 + $0x2e4] sm:$0xf] }
 0x1b7   :  { %3211 = vmatpush.bf16.msra.mxu3 %v5765_v29  ;;  %v5733_v32 = vor.u32 %v6212_v53, %v5732_v28  ;;  %v6161_v53 = vld [vmem:[%s9391_s5 + $0x204] sm:$0xf] }
 0x1b8   :  { %3251 = vmatpush.bf16.msrb.mxu2 %v5465_v21  ;;  %v6173_v21 = vld [vmem:[%s9391_s5 + $0x264] sm:$0xf]  ;;  %v2171_v22 = vpop.f32.mrf.mxu1 }
 0x1b9   :  { %3225 = vmatpush.bf16.msrb.mxu0 %v5321_v47  ;;  %v6097_v47 = vld [vmem:[%s9391_s5 + $0x4] sm:$0xf]  ;;  %v5585_v3 = vor.u32 %v6173_v21, %v5582_v17  ;;  %v6155_v21 = vld [vmem:[%s9391_s5 + $0x1d4] sm:$0xf]  ;;  %v5510_v17 = vld [vmem:[%s9391_s5 + $0x1d8] sm:$0xf0] }
 0x1ba   :  { %3239 = vmatpush.bf16.msrb.mxu1 %v5385_v62  ;;  %v5441_v62 = vor.u32 %v6137_v2, %v5438_v46  ;;  %v2183_v15 = vpop.f32.mrf.mxu2  ;;  %v5281_v4 = vor.u32 %v6097_v47, %v5278_v50  ;;  %v6210_v2 = vld [vmem:[%s9391_s5 + $0x384] sm:$0xf0]  ;;  %v6129_v47 = vld [vmem:[%s9391_s5 + $0x104] sm:$0xf]  ;;  %v5406_v50 = vld [vmem:[%s9391_s5 + $0x108] sm:$0xf0] }
 0x1bb   :  { %3212 = vmatpush.bf16.msra.mxu3 %v5757_v57  ;;  %v2197_v1 = vpop.f32.mrf.mxu3  ;;  %v2184_v14 = vadd.f32 %v2183_v15, %v2170_v12  ;;  %v5725_v46 = vor.u32 %v6210_v2, %v5724_v16  ;;  %v5646_v15 = vld [vmem:[%s9391_s5 + $0x2e8] sm:$0xf0]  ;;  %v5638_v12 = vld [vmem:[%s9391_s5 + $0x2d8] sm:$0xf0] }
 0x1bc   :  { %3252 = vmatpush.bf16.msrb.mxu2 %v5457_v24  ;;  %v2172_v24 = vadd.f32 %v2171_v22, %v2158_v13  ;;  %v5513_v22 = vor.u32 %v6155_v21, %v5510_v17  ;;  %v5614_v16 = vld [vmem:[%s9391_s5 + $0x2a8] sm:$0xf0] }
 0x1bd   :  { %3226 = vmatpush.bf16.msrb.mxu0 %v5313_v61  ;;  %v6216_v61 = vld [vmem:[%s9391_s5 + $0x3b4] sm:$0xf0]  ;;  %v2198_v29 = vadd.f32 %v2197_v1, %v2184_v14  ;;  %v5518_v1 = vld [vmem:[%s9391_s5 + $0x1e8] sm:$0xf0]  ;;  %v5542_v14 = vld [vmem:[%s9391_s5 + $0x218] sm:$0xf0] }
 0x1be   :  { %3240 = vmatpush.bf16.msrb.mxu1 %v5377_v8  ;;  %v5749_v6 = vor.u32 %v6216_v61, %v5748_v0  ;;  %v5593_v8 = vor.u32 %v6175_v59, %v5590_v54  ;;  %v5409_v54 = vor.u32 %v6129_v47, %v5406_v50  ;;  %v5526_v0 = vld [vmem:[%s9391_s5 + $0x1f8] sm:$0xf0]  ;;  %v5521_v13 = vor.u32 %v6157_v49, %v5518_v1  ;;  %v5486_v47 = vld [vmem:[%s9391_s5 + $0x1a8] sm:$0xf0] }
 0x1bf   :  { %v5529_v61 = vor.u32 %v6159_v34, %v5526_v0 }
 0x1c0   :  { %3253 = vmatpush.bf16.msrb.mxu2 %v5449_v38  ;;  %3213 = vmatpush.bf16.msra.mxu3 %v5749_v6  ;;  %v6169_v38 = vld [vmem:[%s9391_s5 + $0x244] sm:$0xf]  ;;  %v5649_v6 = vor.u32 %v6189_v10, %v5646_v15  ;;  %v6147_v10 = vld [vmem:[%s9391_s5 + $0x194] sm:$0xf]  ;;  %v5478_v15 = vld [vmem:[%s9391_s5 + $0x198] sm:$0xf0] }
 0x1c1   :  { %3227 = vmatpush.bf16.msrb.mxu0 %v5305_v39  ;;  %v6133_v39 = vld [vmem:[%s9391_s5 + $0x124] sm:$0xf]  ;;  %v5569_v59 = vor.u32 %v6169_v38, %v5566_v42  ;;  %v6151_v38 = vld [vmem:[%s9391_s5 + $0x1b4] sm:$0xf] }
 0x1c2   :  { %3241 = vmatpush.bf16.msrb.mxu1 %v5369_v23  ;;  %v5425_v23 = vor.u32 %v6133_v39, %v5422_v36  ;;  %v2185_v33 = vpop.f32.mrf.mxu2  ;;  %v6163_v39 = vld [vmem:[%s9391_s5 + $0x214] sm:$0xf]  ;;  %v5630_v36 = vld [vmem:[%s9391_s5 + $0x2c8] sm:$0xf0] }
 0x1c3   :  { %v2186_v31 = vadd.f32 %v2185_v33, %v2172_v24  ;;  %v2199_v30 = vpop.f32.mrf.mxu3  ;;  %v5545_v33 = vor.u32 %v6163_v39, %v5542_v14  ;;  %v6205_v14 = vld [vmem:[%s9391_s5 + $0x364] sm:$0xf] }
 0x1c4   :  { %3254 = vmatpush.bf16.msrb.mxu2 %v5441_v62  ;;  %3214 = vmatpush.bf16.msra.mxu3 %v5741_v20  ;;  %v6167_v62 = vld [vmem:[%s9391_s5 + $0x234] sm:$0xf]  ;;  %v6185_v20 = vld [vmem:[%s9391_s5 + $0x2c4] sm:$0xf] }
 0x1c5   :  { %3228 = vmatpush.bf16.msrb.mxu0 %v5297_v9  ;;  %v6131_v9 = vld [vmem:[%s9391_s5 + $0x114] sm:$0xf]  ;;  %v2200_v41 = vadd.f32 %v2199_v30, %v2186_v31  ;;  %v5633_v28 = vor.u32 %v6185_v20, %v5630_v36  ;;  %v5622_v31 = vld [vmem:[%s9391_s5 + $0x2b8] sm:$0xf0]  ;;  %v5710_v20 = vld [vmem:[%s9391_s5 + $0x368] sm:$0xf0] }
 0x1c6   :  { %3242 = vmatpush.bf16.msrb.mxu1 %v5361_v35  ;;  %v5577_v35 = vor.u32 %v6171_v25, %v5574_v52  ;;  %v6153_v25 = vld [vmem:[%s9391_s5 + $0x1c4] sm:$0xf]  ;;  %v5502_v52 = vld [vmem:[%s9391_s5 + $0x1c8] sm:$0xf0]  ;;  %v5713_v36 = vor.u32 %v6205_v14, %v5710_v20  ;;  %v6211_v20 = vld [vmem:[%s9391_s5 + $0x394] sm:$0xf] }
 0x1c7   :  { %v2327_v57 = vmax.f32 %v2200_v41, 0.0 }
 0x1c8   :  { %3255 = vmatpush.bf16.msrb.mxu2 %v5433_v11  ;;  %3215 = vmatpush.bf16.msra.mxu3 %v5733_v32  ;;  %v6187_v11 = vld [vmem:[%s9391_s5 + $0x2d4] sm:$0xf]  ;;  %v5505_v32 = vor.u32 %v6153_v25, %v5502_v52  ;;  %v6201_v52 = vld [vmem:[%s9391_s5 + $0x344] sm:$0xf] }
 0x1c9   :  { %3229 = vmatpush.bf16.msrb.mxu0 %v5289_v58  ;;  %v2319_v58 = vmax.f32 %v2198_v29, 0.0  ;;  %v5641_v19 = vor.u32 %v6187_v11, %v5638_v12  ;;  %v6183_v29 = vld [vmem:[%s9391_s5 + $0x2b4] sm:$0xf]  ;;  %v6145_v11 = vld [vmem:[%s9391_s5 + $0x184] sm:$0xf] }
 0x1ca   :  { %3243 = vmatpush.bf16.msrb.mxu1 %v5353_v37  ;;  %v5657_v37 = vor.u32 %v6191_v43, %v5654_v45  ;;  %v5625_v43 = vor.u32 %v6183_v29, %v5622_v31  ;;  %v6181_v45 = vld [vmem:[%s9391_s5 + $0x2a4] sm:$0xf]  ;;  %v5470_v12 = vld [vmem:[%s9391_s5 + $0x188] sm:$0xf0]  ;;  %v6199_v29 = vld [vmem:[%s9391_s5 + $0x334] sm:$0xf] }
 0x1cb   :  { %v8831_v48 = vpack.c.bf16 %v2327_v57, %v2319_v58 }
 0x1cc   :  { %3256 = vmatpush.bf16.msrb.mxu2 %v5425_v23  ;;  %3216 = vmatpush.bf16.msra.mxu3 %v5725_v46  ;;  %v6149_v46 = vld [vmem:[%s9391_s5 + $0x1a4] sm:$0xf] }
 0x1cd   :  { %3230 = vmatpush.bf16.msrb.mxu0 %v5281_v4  ;;  %3189 = vmatmul.bf16.vlgmr.msra.gmra.mxu1 %v8831_v48  ;;  %v5561_v4 = vor.u32 %v6167_v62, %v5558_v51  ;;  %v6179_v62 = vld [vmem:[%s9391_s5 + $0x294] sm:$0xf]  ;;  %v5489_v51 = vor.u32 %v6149_v46, %v5486_v47 }
 0x1ce   :  { %3244 = vmatpush.bf16.msrb.mxu1 %v5345_v63  ;;  %v5550_v63 = vld [vmem:[%s9391_s5 + $0x228] sm:$0xf0] }
 0x1cf   :  { %v5553_v18 = vor.u32 %v6165_v7, %v5550_v63  ;;  %v5718_v63 = vld [vmem:[%s9391_s5 + $0x378] sm:$0xf0] }
 0x1d0   :  { %3231 = vmatmul.bf16.vlgmr.msrb.gmra.mxu0 %v8441_v55  ;;  %v5414_v55 = vld [vmem:[%s9391_s5 + $0x118] sm:$0xf0]  ;;  %3265 = vmatpush.bf16.msrb.mxu3 %v5529_v61  ;;  %v2225_v24 = vpop.f32.mrf.mxu1 }
 0x1d1   :  { %3279 = vmatpush.bf16.msra.mxu0 %v5593_v8  ;;  %v5417_v40 = vor.u32 %v6131_v9, %v5414_v55  ;;  %v2211_v8 = vpop.f32.mrf.mxu0  ;;  %v5534_v9 = vld [vmem:[%s9391_s5 + $0x208] sm:$0xf0] }
 0x1d2   :  { %3293 = vmatpush.bf16.msra.mxu1 %v5657_v37  ;;  %v5537_v42 = vor.u32 %v6161_v53, %v5534_v9 }
 0x1d3   :  { %3257 = vmatpush.bf16.msrb.mxu2 %v5417_v40  ;;  %v5494_v40 = vld [vmem:[%s9391_s5 + $0x1b8] sm:$0xf0] }
 0x1d4   :  { %3266 = vmatpush.bf16.msrb.mxu3 %v5521_v13  ;;  %v5497_v2 = vor.u32 %v6151_v38, %v5494_v40  ;;  %v5678_v38 = vld [vmem:[%s9391_s5 + $0x328] sm:$0xf0] }
 0x1d5   :  { %3280 = vmatpush.bf16.msra.mxu0 %v5585_v3  ;;  %v8882_v3 = vld [vmem:[%s9392_s6 + $0x4] sm:$0xff] }
 0x1d6   :  { %3294 = vmatpush.bf16.msra.mxu1 %v5649_v6  ;;  %v576_v23 = vperm.slane %v8882_v3, 6  ;;  %v5481_v6 = vor.u32 %v6147_v10, %v5478_v15 }
 0x1d7   :  { %3258 = vmatpush.bf16.msrb.mxu2 %v5409_v54 }
 0x1d8   :  { %3267 = vmatpush.bf16.msrb.mxu3 %v5513_v22  ;;  %v2212_v55 = vadd.f32 %v2211_v8, %v576_v23  ;;  %v2227_v37 = vpop.f32.mrf.mxu1  ;;  %v6207_v8 = vld [vmem:[%s9391_s5 + $0x374] sm:$0xf] }
 0x1d9   :  { %3281 = vmatpush.bf16.msra.mxu0 %v5577_v35  ;;  %v2213_v30 = vpop.f32.mrf.mxu0 }
 0x1da   :  { %3295 = vmatpush.bf16.msra.mxu1 %v5641_v19  ;;  %v2239_v35 = vpop.f32.mrf.mxu2  ;;  %v2226_v58 = vadd.f32 %v2225_v24, %v2212_v55  ;;  %v2214_v57 = vadd.f32 %v2213_v30, %v576_v23  ;;  %v5473_v19 = vor.u32 %v6145_v11, %v5470_v12  ;;  %v6203_v23 = vld [vmem:[%s9391_s5 + $0x354] sm:$0xf]  ;;  %v5702_v24 = vld [vmem:[%s9391_s5 + $0x358] sm:$0xf0]  ;;  %v6217_v11 = vld [vmem:[%s9391_s5 + $0x3c4] sm:$0xf] }
 0x1db   :  { %v2253_v41 = vpop.f32.mrf.mxu3  ;;  %v5705_v25 = vor.u32 %v6203_v23, %v5702_v24  ;;  %v5758_v12 = vld [vmem:[%s9391_s5 + $0x3c8] sm:$0xf0] }
 0x1dc   :  { %3268 = vmatpush.bf16.msrb.mxu3 %v5505_v32  ;;  %v2240_v50 = vadd.f32 %v2239_v35, %v2226_v58  ;;  %v2228_v54 = vadd.f32 %v2227_v37, %v2214_v57  ;;  %v5662_v37 = vld [vmem:[%s9391_s5 + $0x308] sm:$0xf0] }
 0x1dd   :  { %3282 = vmatpush.bf16.msra.mxu0 %v5569_v59  ;;  %3245 = vmatmul.bf16.vlgmr.msrb.gmra.mxu1 %v8449_v56  ;;  %v5617_v59 = vor.u32 %v6181_v45, %v5614_v16  ;;  %v5606_v56 = vld [vmem:[%s9391_s5 + $0x298] sm:$0xf0]  ;;  %v6195_v16 = vld [vmem:[%s9391_s5 + $0x314] sm:$0xf]  ;;  %v5726_v23 = vld [vmem:[%s9391_s5 + $0x388] sm:$0xf0] }
 0x1de   :  { %3296 = vmatpush.bf16.msra.mxu1 %v5633_v28  ;;  %v2254_v0 = vadd.f32 %v2253_v41, %v2240_v50  ;;  %v5609_v49 = vor.u32 %v6179_v62, %v5606_v56  ;;  %v577_v28 = vperm.slane %v8882_v3, 7  ;;  %v6197_v3 = vld [vmem:[%s9391_s5 + $0x324] sm:$0xf]  ;;  %v6223_v56 = vld [vmem:[%s9391_s5 + $0x3f4] sm:$0xf] }
 0x1e0   :  { %3269 = vmatpush.bf16.msrb.mxu3 %v5497_v2  ;;  %v2320_v13 = vmax.f32 %v2254_v0, 0.0  ;;  %v5670_v2 = vld [vmem:[%s9391_s5 + $0x318] sm:$0xf0] }
 0x1e1   :  { %3283 = vmatpush.bf16.msra.mxu0 %v5561_v4  ;;  %v6177_v4 = vld [vmem:[%s9391_s5 + $0x284] sm:$0xf]  ;;  %v5673_v50 = vor.u32 %v6195_v16, %v5670_v2  ;;  %v3341_v2 = vld [vmem:[%s9393_s7 + $0x10] sm:$0xff] }
 0x1e2   :  { %3297 = vmatpush.bf16.msra.mxu1 %v5625_v43  ;;  %v2241_v34 = vpop.f32.mrf.mxu2  ;;  %v5681_v43 = vor.u32 %v6197_v3, %v5678_v38  ;;  %v3472_v38 = vld [vmem:[%s9393_s7 + $0x188] sm:$0xff] }
 0x1e3   :  { %v2242_v61 = vadd.f32 %v2241_v34, %v2228_v54  ;;  %v2255_v1 = vpop.f32.mrf.mxu3 }
 0x1e4   :  { %3270 = vmatpush.bf16.msrb.mxu3 %v5489_v51  ;;  %v5782_v51 = vld [vmem:[%s9391_s5 + $0x3f8] sm:$0xf0] }
 0x1e5   :  { %3284 = vmatpush.bf16.msra.mxu0 %v5553_v18  ;;  %v2256_v7 = vadd.f32 %v2255_v1, %v2242_v61  ;;  %v5721_v18 = vor.u32 %v6207_v8, %v5718_v63  ;;  %v5785_v15 = vor.u32 %v6223_v56, %v5782_v51  ;;  %v3423_v61 = vld [vmem:[%s9393_s7 + $0x108] sm:$0xff]  ;;  %v3501_v8 = vld [vmem:[%s9393_s7 + $0x1a0] sm:$0xff] }
 0x1e6   :  { %3298 = vmatpush.bf16.msra.mxu1 %v5617_v59  ;;  %v5774_v1 = vld [vmem:[%s9391_s5 + $0x3e8] sm:$0xf0] }
 0x1e7   :  { %v2328_v21 = vmax.f32 %v2256_v7, 0.0  ;;  %v5766_v7 = vld [vmem:[%s9391_s5 + $0x3d8] sm:$0xf0] }
 0x1e8   :  { %3271 = vmatpush.bf16.msrb.mxu3 %v5481_v6  ;;  %v6219_v6 = vld [vmem:[%s9391_s5 + $0x3d4] sm:$0xf] }
 0x1e9   :  { %3285 = vmatpush.bf16.msra.mxu0 %v5545_v33  ;;  %v8953_v39 = vpack.c.bf16 %v2328_v21, %v2320_v13  ;;  %v5694_v33 = vld [vmem:[%s9391_s5 + $0x348] sm:$0xf0]  ;;  %v5769_v63 = vor.u32 %v6219_v6, %v5766_v7  ;;  %v5761_v13 = vor.u32 %v6217_v11, %v5758_v12  ;;  %v6215_v21 = vld [vmem:[%s9391_s5 + $0x3b4] sm:$0xf] }
 0x1ea   :  { %3299 = vmatpush.bf16.msra.mxu1 %v5609_v49  ;;  %v5697_v9 = vor.u32 %v6201_v52, %v5694_v33  ;;  %v6221_v49 = vld [vmem:[%s9391_s5 + $0x3e4] sm:$0xf]  ;;  %v3354_v52 = vld [vmem:[%s9393_s7 + $0x78] sm:$0xff]  ;;  %v3353_v33 = vld [vmem:[%s9393_s7 + $0x70] sm:$0xff] }
 0x1eb   :  { %3203 = vmatmul.bf16.vlgmr.msra.gmra.mxu2 %v8953_v39  ;;  %v3365_v11 = vld [vmem:[%s9393_s7 + $0xd0] sm:$0xff] }
 0x1ec   :  { %3307 = vmatpush.bf16.msra.mxu2 %v5721_v18  ;;  %3272 = vmatpush.bf16.msrb.mxu3 %v5473_v19  ;;  %v6213_v19 = vld [vmem:[%s9391_s5 + $0x3a4] sm:$0xf]  ;;  %v3461_v12 = vld [vmem:[%s9393_s7 + $0x130] sm:$0xff] }
 0x1ed   :  { %3286 = vmatpush.bf16.msra.mxu0 %v5537_v42  ;;  %v2267_v22 = vpop.f32.mrf.mxu0 }
 0x1ee   :  { %v2268_v31 = vadd.f32 %v2267_v22, %v577_v28 }
 0x1f0   :  { %3287 = vmatmul.bf16.vlgmr.msra.gmra.mxu0 %v8652_v5  ;;  %v5598_v5 = vld [vmem:[%s9391_s5 + $0x288] sm:$0xf0]  ;;  %3308 = vmatpush.bf16.msra.mxu2 %v5713_v36  ;;  %v2281_v53 = vpop.f32.mrf.mxu1  ;;  %v5734_v36 = vld [vmem:[%s9391_s5 + $0x398] sm:$0xf0] }
 0x1f1   :  { %v5601_v17 = vor.u32 %v6177_v4, %v5598_v5  ;;  %v2282_v40 = vadd.f32 %v2281_v53, %v2268_v31  ;;  %v5777_v4 = vor.u32 %v6221_v49, %v5774_v1  ;;  %v3502_v5 = vld [vmem:[%s9393_s7 + $0x1a8] sm:$0xff]  ;;  %v5737_v22 = vor.u32 %v6211_v20, %v5734_v36  ;;  %3373 = vmatpush.msrb.mxu0 %v3354_v52  ;;  %v3350_v53 = vld [vmem:[%s9393_s7 + $0x58] sm:$0xff]  ;;  %v3347_v31 = vld [vmem:[%s9393_s7 + $0x40] sm:$0xff] }
 0x1f2   :  { %v3367_v49 = vld [vmem:[%s9393_s7 + $0xe0] sm:$0xff]  ;;  %v3362_v20 = vld [vmem:[%s9393_s7 + $0xb8] sm:$0xff] }
 0x1f3   :  { %3300 = vmatpush.bf16.msra.mxu1 %v5601_v17  ;;  %v5750_v17 = vld [vmem:[%s9391_s5 + $0x3b8] sm:$0xf0]  ;;  %3374 = vmatpush.msrb.mxu0 %v3353_v33  ;;  %v3463_v1 = vld [vmem:[%s9393_s7 + $0x140] sm:$0xff]  ;;  %v3360_v33 = vld [vmem:[%s9393_s7 + $0xa8] sm:$0xff] }
 0x1f4   :  { %3309 = vmatpush.bf16.msra.mxu2 %v5705_v25  ;;  %v5753_v18 = vor.u32 %v6215_v21, %v5750_v17  ;;  %v3458_v36 = vld [vmem:[%s9393_s7 + $0x118] sm:$0xff] }
 0x1f5   :  { %v2269_v32 = vpop.f32.mrf.mxu0 }
 0x1f6   :  { %3301 = vmatmul.bf16.vlgmr.msra.gmra.mxu1 %v8831_v48  ;;  %v5686_v48 = vld [vmem:[%s9391_s5 + $0x338] sm:$0xf0]  ;;  %v2270_v41 = vadd.f32 %v2269_v32, %v577_v28  ;;  %v3351_v28 = vld [vmem:[%s9393_s7 + $0x60] sm:$0xff] }
 0x1f7   :  { %v5689_v35 = vor.u32 %v6199_v29, %v5686_v48  ;;  %v3348_v29 = vld [vmem:[%s9393_s7 + $0x48] sm:$0xff]  ;;  %v3346_v32 = vld [vmem:[%s9393_s7 + $0x38] sm:$0xff] }
 0x1f8   :  { %3310 = vmatpush.bf16.msra.mxu2 %v5697_v9  ;;  %v2283_v45 = vpop.f32.mrf.mxu1  ;;  %v3349_v9 = vld [vmem:[%s9393_s7 + $0x50] sm:$0xff] }
 0x1f9   :  { %v2284_v58 = vadd.f32 %v2283_v45, %v2270_v41  ;;  %v3471_v41 = vld [vmem:[%s9393_s7 + $0x180] sm:$0xff] }
 0x1fa   :  { %v2295_v55 = vpop.f32.mrf.mxu2 }
 0x1fb   :  { %v2309_v30 = vpop.f32.mrf.mxu3  ;;  %3259 = vmatmul.bf16.vlgmr.msrb.gmra.mxu2 %v8472_v27  ;;  %v2296_v42 = vadd.f32 %v2295_v55, %v2282_v40  ;;  %v6193_v27 = vld [vmem:[%s9391_s5 + $0x304] sm:$0xf]  ;;  %v3473_v55 = vld [vmem:[%s9393_s7 + $0x190] sm:$0xff] }
 0x1fc   :  { %3311 = vmatpush.bf16.msra.mxu2 %v5689_v35  ;;  %v5665_v10 = vor.u32 %v6193_v27, %v5662_v37  ;;  %v3344_v35 = vld [vmem:[%s9393_s7 + $0x28] sm:$0xff]  ;;  %v3343_v40 = vld [vmem:[%s9393_s7 + $0x20] sm:$0xff]  ;;  %v3370_v27 = vld [vmem:[%s9393_s7 + $0xf8] sm:$0xff] }
 0x1fd   :  { %v2310_v46 = vadd.f32 %v2309_v30, %v2296_v42  ;;  %v3345_v30 = vld [vmem:[%s9393_s7 + $0x30] sm:$0xff]  ;;  %v3342_v42 = vld [vmem:[%s9393_s7 + $0x18] sm:$0xff]  ;;  %3396 = vmatpush.msrb.mxu1 %v3370_v27 }
 0x1fe   :  { %v3466_v37 = vld [vmem:[%s9393_s7 + $0x158] sm:$0xff] }
 0x1ff   :  { %v2321_v54 = vmax.f32 %v2310_v46, 0.0  ;;  %v3539_v27 = vld [vmem:[%s9393_s7 + $0x1b8] sm:$0xff] }
 0x200   :  { %3312 = vmatpush.bf16.msra.mxu2 %v5681_v43  ;;  %v3470_v43 = vld [vmem:[%s9393_s7 + $0x178] sm:$0xff] }
 0x202   :  { %v2297_v57 = vpop.f32.mrf.mxu2 }
 0x203   :  { %v2298_v47 = vadd.f32 %v2297_v57, %v2284_v58  ;;  %v2311_v59 = vpop.f32.mrf.mxu3  ;;  %v3469_v58 = vld [vmem:[%s9393_s7 + $0x170] sm:$0xff]  ;;  %v3340_v57 = vld [vmem:[%s9393_s7 + $0x8] sm:$0xff] }
 0x204   :  { %3313 = vmatpush.bf16.msra.mxu2 %v5673_v50  ;;  %v3506_v25 = vpop.permute.xlu0 %3505  ;;  %v3339_v50 = vld [vmem:[%s9393_s7] sm:$0xff] }
 0x205   :  { %v2312_v62 = vadd.f32 %v2311_v59, %v2298_v47  ;;  %v3468_v47 = vld [vmem:[%s9393_s7 + $0x168] sm:$0xff]  ;;  %v3467_v59 = vld [vmem:[%s9393_s7 + $0x160] sm:$0xff] }
 0x207   :  { %v2329_v34 = vmax.f32 %v2312_v62, 0.0  ;;  %v9150_v62 = vld [vmem:[%s9392_s6 + $0xc] sm:$0x3] }
 0x208   :  { %3314 = vmatpush.bf16.msra.mxu2 %v5665_v10  ;;  %v3368_v10 = vld [vmem:[%s9393_s7 + $0xe8] sm:$0xff] }
 0x209   :  { %v2337_v0 = vpack.c.bf16 %v2329_v34, %v2321_v54  ;;  %v3369_v54 = vld [vmem:[%s9393_s7 + $0xf0] sm:$0xff] }
 0x20a   :  { %3397 = vmatpush.msrb.mxu1 %v3369_v54  ;;  %v3465_v34 = vld [vmem:[%s9393_s7 + $0x150] sm:$0xff] }
 0x20b   :  { %3217 = vmatmul.bf16.vlgmr.msra.gmra.mxu3 %v2337_v0  ;;  %3315 = vmatmul.bf16.vlgmr.msra.gmra.mxu2 %v8953_v39  ;;  %v5742_v39 = vld [vmem:[%s9391_s5 + $0x3a8] sm:$0xf0] }
 0x20c   :  { %3321 = vmatpush.bf16.msra.mxu3 %v5785_v15  ;;  %3448 = vmatpush.msrb.mxu2 %v3423_v61  ;;  %v5745_v14 = vor.u32 %v6213_v19, %v5742_v39  ;;  %v2467_v15 = vperm.slane %v9150_v62, 0  ;;  %v3464_v61 = vld [vmem:[%s9393_s7 + $0x148] sm:$0xff]  ;;  %v3363_v19 = vld [vmem:[%s9393_s7 + $0xc0] sm:$0xff] }
 0x20d   :  { %v3120_v45 = vpop.f32.mrf.mxu0  ;;  %3398 = vmatpush.msrb.mxu1 %v3368_v10 }
 0x20e   :  { %3528 = vmatpush.msra.mxu2 %v3502_v5  ;;  %v3462_v5 = vld [vmem:[%s9393_s7 + $0x138] sm:$0xff]  ;;  %v3121_v7 = vadd.f32 %v3120_v45, %v2467_v15  ;;  %v3356_v45 = vld [vmem:[%s9393_s7 + $0x88] sm:$0xff] }
 0x20f   :  { %3399 = vmatpush.msrb.mxu1 %v3367_v49 }
 0x210   :  { %3322 = vmatpush.bf16.msra.mxu3 %v5777_v4  ;;  %3529 = vmatpush.msra.mxu2 %v3501_v8  ;;  %v3134_v16 = vpop.f32.mrf.mxu1  ;;  %v3366_v4 = vld [vmem:[%s9393_s7 + $0xd8] sm:$0xff] }
 0x211   :  { %3400 = vmatpush.msrb.mxu1 %v3366_v4  ;;  %v3135_v21 = vadd.f32 %v3134_v16, %v3121_v7 }
 0x213   :  { %3401 = vmatpush.msrb.mxu1 %v3365_v11 }
 0x214   :  { %3323 = vmatpush.bf16.msra.mxu3 %v5769_v63 }
 0x215   :  { %v3122_v56 = vpop.f32.mrf.mxu0 }
 0x218   :  { %3324 = vmatpush.bf16.msra.mxu3 %v5761_v13  ;;  %v3136_v51 = vpop.f32.mrf.mxu1  ;;  %v3364_v13 = vld [vmem:[%s9393_s7 + $0xc8] sm:$0xff] }
 0x219   :  { %3402 = vmatpush.msrb.mxu1 %v3364_v13 }
 0x21a   :  { %v9087_v48 = vpop.f32.mrf.mxu2 }
 0x21b   :  { %3273 = vmatmul.bf16.vlgmr.msrb.gmra.mxu3 %v8487_v26  ;;  %5786 = vmatmul.msk.f32.vlgmr.msrb.gmra.mxu2 %vm3426_vm0, %v8517_v44  ;;  %v6209_v26 = vld [vmem:[%s9391_s5 + $0x384] sm:$0xf]  ;;  %v3508_v44 = vpop.permute.xlu0 %3507  ;;  %v3162_v6 = vpop.f32.mrf.mxu3  ;;  %v3149_v39 = vadd.f32 %v9087_v48, %v3135_v21 }
 0x21c   :  { %3325 = vmatpush.bf16.msra.mxu3 %v5753_v18  ;;  %v5729_v24 = vor.u32 %v6209_v26, %v5726_v23  ;;  %v3460_v18 = vld [vmem:[%s9393_s7 + $0x128] sm:$0xff]  ;;  %3403 = vmatpush.msrb.mxu1 %v3363_v19  ;;  %v3361_v23 = vld [vmem:[%s9393_s7 + $0xb0] sm:$0xff] }
 0x21e   :  { %3404 = vmatpush.msrb.mxu1 %v3362_v20 }
 0x220   :  { %3326 = vmatpush.bf16.msra.mxu3 %v5745_v14  ;;  %v3459_v14 = vld [vmem:[%s9393_s7 + $0x120] sm:$0xff]  ;;  %3405 = vmatpush.msrb.mxu1 %v3361_v23 }
 0x222   :  { %v9104_v3 = vpop.f32.mrf.mxu2  ;;  %3406 = vmatpush.msrb.mxu1 %v3360_v33 }
 0x223   :  { %5787 = vmatmul.msk.f32.gmra.mxu2 %vm3426_vm0, %v8579_v60  ;;  %v3352_v60 = vld [vmem:[%s9393_s7 + $0x68] sm:$0xff]  ;;  %v3164_v26 = vpop.f32.mrf.mxu3 }
 0x224   :  { %3327 = vmatpush.bf16.msra.mxu3 %v5737_v22  ;;  %3375 = vmatpush.msrb.mxu0 %v3352_v60  ;;  %v3123_v22 = vadd.f32 %v3122_v56, %v2467_v15 }
 0x226   :  { %3376 = vmatpush.msrb.mxu0 %v3351_v28  ;;  %v3137_v60 = vadd.f32 %v3136_v51, %v3123_v22  ;;  %v2468_v51 = vperm.slane %v9150_v62, 1 }
 0x228   :  { %3328 = vmatpush.bf16.msra.mxu3 %v5729_v24  ;;  %3377 = vmatpush.msrb.mxu0 %v3350_v53  ;;  %v3163_v24 = vadd.f32 %v3162_v6, %v3149_v39  ;;  %v3151_v48 = vadd.f32 %v9104_v3, %v3137_v60  ;;  %v3357_v3 = vld [vmem:[%s9393_s7 + $0x90] sm:$0xff] }
 0x22a   :  { %3378 = vmatpush.msrb.mxu0 %v3349_v9  ;;  %v3545_v9 = vld [vmem:[%s9393_s7 + $0x1e8] sm:$0xff] }
 0x22b   :  { %3329 = vmatmul.bf16.vlgmr.msra.gmra.mxu3 %v2337_v0  ;;  %5788 = vmatmul.msk.f32.vlgmr.msra.gmra.mxu2 %vm3509_vm1, %v3506_v25  ;;  %v3546_v25 = vld [vmem:[%s9393_s7 + $0x1f0] sm:$0xff] }
 0x22c   :  { %3379 = vmatpush.msrb.mxu0 %v3348_v29  ;;  %3476 = vmatpush.msrb.mxu3 %v3473_v55  ;;  %v3359_v29 = vld [vmem:[%s9393_s7 + $0xa0] sm:$0xff]  ;;  %v3358_v55 = vld [vmem:[%s9393_s7 + $0x98] sm:$0xff] }
 0x22d   :  { %v3176_v8 = vpop.f32.mrf.mxu0  ;;  %3407 = vmatpush.msrb.mxu1 %v3359_v29 }
 0x22e   :  { %3380 = vmatpush.msrb.mxu0 %v3347_v31  ;;  %3477 = vmatpush.msrb.mxu3 %v3472_v38  ;;  %v3177_v28 = vadd.f32 %v3176_v8, %v3163_v24 }
 0x22f   :  { %3408 = vmatpush.msrb.mxu1 %v3358_v55 }
 0x230   :  { %3381 = vmatpush.msrb.mxu0 %v3346_v32  ;;  %3478 = vmatpush.msrb.mxu3 %v3471_v41  ;;  %v3544_v32 = vld [vmem:[%s9393_s7 + $0x1e0] sm:$0xff] }
 0x231   :  { %3409 = vmatpush.msrb.mxu1 %v3357_v3  ;;  %v3582_v3 = vld [vmem:[%s9393_s7 + $0x208] sm:$0xff] }
 0x232   :  { %3382 = vmatpush.msrb.mxu0 %v3345_v30  ;;  %3479 = vmatpush.msrb.mxu3 %v3470_v43  ;;  %v3543_v30 = vld [vmem:[%s9393_s7 + $0x1d8] sm:$0xff] }
 0x233   :  { %5789 = vmatmul.msk.f32.gmra.mxu2 %vm3509_vm1, %v3508_v44  ;;  %3410 = vmatpush.msrb.mxu1 %v3356_v45  ;;  %v3680_v45 = vld [vmem:[%s9393_s7 + $0x230] sm:$0xff] }
 0x234   :  { %3383 = vmatpush.msrb.mxu0 %v3344_v35  ;;  %3480 = vmatpush.msrb.mxu3 %v3469_v58 }
 0x235   :  { %v3178_v44 = vpop.f32.mrf.mxu0  ;;  %3633 = vmatpush.msrb.mxu2 %v3582_v3 }
 0x236   :  { %3384 = vmatpush.msrb.mxu0 %v3343_v40  ;;  %3481 = vmatpush.msrb.mxu3 %v3468_v47  ;;  %v3165_v40 = vadd.f32 %v3164_v26, %v3151_v48  ;;  %v3355_v47 = vld [vmem:[%s9393_s7 + $0x80] sm:$0xff] }
 0x237   :  { %3411 = vmatpush.msrb.mxu1 %v3355_v47 }
 0x238   :  { %3385 = vmatpush.msrb.mxu0 %v3342_v42  ;;  %3482 = vmatpush.msrb.mxu3 %v3467_v59  ;;  %v3542_v42 = vld [vmem:[%s9393_s7 + $0x1d0] sm:$0xff]  ;;  %v3179_v16 = vadd.f32 %v3178_v44, %v3165_v40  ;;  %v3540_v59 = vld [vmem:[%s9393_s7 + $0x1c0] sm:$0xff]  ;;  %v3642_v40 = vld [vmem:[%s9393_s7 + $0x218] sm:$0xff] }
 0x239   :  { %v6232_v44 = vld [vmem:[%s9393_s7 + $0x1b0] ss:$0 sm:$0xff] }
 0x23a   :  { %3386 = vmatpush.msrb.mxu0 %v3341_v2  ;;  %3483 = vmatpush.msrb.mxu3 %v3466_v37 }
 0x23c   :  { %3387 = vmatpush.msrb.mxu0 %v3340_v57  ;;  %3484 = vmatpush.msrb.mxu3 %v3465_v34  ;;  %v3541_v57 = vld [vmem:[%s9393_s7 + $0x1c8] sm:$0xff] }
 0x23e   :  { %3388 = vmatpush.msrb.mxu0 %v3339_v50  ;;  %3485 = vmatpush.msrb.mxu3 %v3464_v61 }
 0x240   :  { %3486 = vmatpush.msrb.mxu3 %v3463_v1  ;;  %3564 = vmatpush.msra.mxu0 %v3546_v25 }
 0x242   :  { %3487 = vmatpush.msrb.mxu3 %v3462_v5  ;;  %3565 = vmatpush.msra.mxu0 %v3545_v9  ;;  %v6231_v5 = vld [vmem:[%s9393_s7 + $0x110] ss:$0 sm:$0xff] }
 0x244   :  { %3488 = vmatpush.msrb.mxu3 %v3461_v12  ;;  %3566 = vmatpush.msra.mxu0 %v3544_v32 }
 0x246   :  { %3489 = vmatpush.msrb.mxu3 %v3460_v18  ;;  %3567 = vmatpush.msra.mxu0 %v3543_v30 }
 0x248   :  { %3490 = vmatpush.msrb.mxu3 %v3459_v14  ;;  %3568 = vmatpush.msra.mxu0 %v3542_v42  ;;  %v3581_v42 = vld [vmem:[%s9393_s7 + $0x200] sm:$0xff] }
 0x249   :  { %3634 = vmatpush.msrb.mxu2 %v3581_v42 }
 0x24a   :  { %v3190_v63 = vpop.f32.mrf.mxu1  ;;  %3491 = vmatpush.msrb.mxu3 %v3458_v36  ;;  %3569 = vmatpush.msra.mxu0 %v3541_v57 }
 0x24b   :  { %v3191_v31 = vadd.f32 %v3190_v63, %v3177_v28 }
 0x24c   :  { %3570 = vmatpush.msra.mxu0 %v3540_v59  ;;  %3664 = vmatpush.msra.mxu3 %v3642_v40  ;;  %v6233_v59 = vld [vmem:[%s9393_s7 + $0x100] ss:$0 sm:$0xff] }
 0x24d   :  { %v3232_v43 = vpop.f32.mrf.mxu0 }
 0x24e   :  { %3571 = vmatpush.msra.mxu0 %v3539_v27  ;;  %v3233_v61 = vadd.f32 %v3232_v43, %v2468_v51  ;;  %v3681_v43 = vld [vmem:[%s9393_s7 + $0x238] sm:$0xff] }
 0x24f   :  { %3838 = vmatpush.msra.mxu2 %v3681_v43 }
 0x251   :  { %3839 = vmatpush.msra.mxu2 %v3680_v45 }
 0x252   :  { %v3192_v52 = vpop.f32.mrf.mxu1 }
 0x253   :  { %v3193_v50 = vadd.f32 %v3192_v52, %v3179_v16  ;;  %v3679_v16 = vld [vmem:[%s9393_s7 + $0x228] sm:$0xff] }
 0x254   :  { %3840 = vmatpush.msra.mxu2 %v3679_v16 }
 0x255   :  { %v3234_v15 = vpop.f32.mrf.mxu0 }
 0x256   :  { %v3235_v11 = vadd.f32 %v3234_v15, %v2468_v51 }
 0x26d   :  { %v3288_v8 = vpop.f32.mrf.mxu0 }
 0x26e   :  { %v9130_v46 = vpop.f32.mrf.mxu2 }
 0x26f   :  { %v3205_v35 = vadd.f32 %v9130_v46, %v3191_v31  ;;  %v3246_v46 = vpop.f32.mrf.mxu1 }
 0x270   :  { %v3247_v1 = vadd.f32 %v3246_v46, %v3233_v61  ;;  %v6234_v46 = vld [vmem:[%s9393_s7 + $0x198] ss:$0 sm:$0xff] }
 0x275   :  { %v3290_v22 = vpop.f32.mrf.mxu0 }
 0x276   :  { %v9162_v0 = vpop.f32.mrf.mxu2 }
 0x277   :  { %v3207_v37 = vadd.f32 %v9162_v0, %v3193_v50  ;;  %v3248_v49 = vpop.f32.mrf.mxu1  ;;  %v9263_v0 = vld [vmem:[%s9388_s2] sm:$0xf]  ;;  %s6327_s2 = smov 124  }
 0x278   :  { %3684 = vrot.lane.b32.xlu1 %v9263_v0, %s6324_s23  ;;  %v3249_v13 = vadd.f32 %v3248_v49, %v3235_v11 }
 0x27e   :  { %v9188_v17 = vpop.f32.mrf.mxu2 }
 0x27f   :  { %v3261_v62 = vadd.f32 %v9188_v17, %v3247_v1  ;;  %v3302_v18 = vpop.f32.mrf.mxu1 }
 0x286   :  { %v9215_v53 = vpop.f32.mrf.mxu2 }
 0x287   :  { %v3263_v39 = vadd.f32 %v9215_v53, %v3249_v13  ;;  %v3304_v33 = vpop.f32.mrf.mxu1 }
 0x28e   :  { %v3218_v38 = vpop.f32.mrf.mxu3  ;;  %v3316_v58 = vpop.f32.mrf.mxu2 }
 0x28f   :  { %v3219_v41 = vadd.f32 %v3218_v38, %v3205_v35 }
 0x291   :  { %v3335_v2 = vmax.f32 %v3219_v41, 0.0  ;;  %v3583_v41 = vld [vmem:[%s9393_s7 + $0x210] sm:$0xff] }
 0x292   :  { %3605 = vmatpush.msra.mxu1 %v3583_v41 }
 0x293   :  { %3389 = vmatmul.f32.vlgmr.msrb.gmra.mxu0 %v3335_v2  ;;  %v3678_v2 = vld [vmem:[%s9393_s7 + $0x220] sm:$0xff] }
 0x294   :  { %3701 = vmatpush.msrb.mxu0 %v3681_v43  ;;  %3841 = vmatpush.msra.mxu2 %v3678_v2 }
 0x296   :  { %v3220_v56 = vpop.f32.mrf.mxu3  ;;  %v3318_v10 = vpop.f32.mrf.mxu2  ;;  %3702 = vmatpush.msrb.mxu0 %v3680_v45 }
 0x297   :  { %v3221_v54 = vadd.f32 %v3220_v56, %v3207_v37 }
 0x298   :  { %3703 = vmatpush.msrb.mxu0 %v3679_v16 }
 0x299   :  { %v3337_v34 = vmax.f32 %v3221_v54, 0.0  ;;  %v6235_v54 = vld [vmem:[%s9393_s7 + $0x1f8] ss:$0 sm:$0xff] }
 0x29a   :  { %3704 = vmatpush.msrb.mxu0 %v3678_v2 }
 0x29b   :  { %3392 = vmatmul.f32.gmra.mxu0 %v3337_v34 }
 0x29e   :  { %v3274_v4 = vpop.f32.mrf.mxu3  ;;  %v3450_v7 = vpop.f32.mrf.mxu2 }
 0x29f   :  { %v3275_v6 = vadd.f32 %v3274_v4, %v3261_v62  ;;  %v3451_v63 = vadd.f32 %v6231_v5, %v3450_v7 }
 0x2a1   :  { %v3456_v12 = vmax.f32 %v3451_v63, 0.0  ;;  %v3289_v21 = vadd.f32 %v3288_v8, %v3275_v6 }
 0x2a3   :  { %3492 = vmatmul.f32.vlgmr.msrb.gmra.mxu3 %v3456_v12  ;;  %v3303_v36 = vadd.f32 %v3302_v18, %v3289_v21 }
 0x2a4   :  { %3905 = vmatpush.msrb.mxu3 %v3681_v43 }
 0x2a5   :  { %v3317_v24 = vadd.f32 %v3316_v58, %v3303_v36 }
 0x2a6   :  { %v3276_v19 = vpop.f32.mrf.mxu3  ;;  %v3453_v20 = vpop.f32.mrf.mxu2  ;;  %3906 = vmatpush.msrb.mxu3 %v3680_v45 }
 0x2a7   :  { %v3277_v14 = vadd.f32 %v3276_v19, %v3263_v39  ;;  %v3454_v17 = vadd.f32 %v6231_v5, %v3453_v20  ;;  %v9318_v19 = vld [vmem:[%s9393_s7 + $0x240] ss:$0 sm:$0xff] }
 0x2a8   :  { %3907 = vmatpush.msrb.mxu3 %v3679_v16 }
 0x2a9   :  { %v3457_v26 = vmax.f32 %v3454_v17, 0.0  ;;  %v3291_v23 = vadd.f32 %v3290_v22, %v3277_v14 }
 0x2aa   :  { %3908 = vmatpush.msrb.mxu3 %v3678_v2 }
 0x2ab   :  { %3495 = vmatmul.f32.gmra.mxu3 %v3457_v26  ;;  %v3305_v9 = vadd.f32 %v3304_v33, %v3291_v23 }
 0x2ad   :  { %v3319_v48 = vadd.f32 %v3318_v10, %v3305_v9 }
 0x2ae   :  { %v3330_v25 = vpop.f32.mrf.mxu3  ;;  %v3531_v28 = vpop.f32.mrf.mxu2 }
 0x2af   :  { %v3331_v52 = vadd.f32 %v3330_v25, %v3317_v24  ;;  %v3532_v53 = vadd.f32 %v6232_v44, %v3531_v28 }
 0x2b1   :  { %v3336_v60 = vmax.f32 %v3331_v52, 0.0  ;;  %v3537_v29 = vmax.f32 %v3532_v53, 0.0 }
 0x2b3   :  { %3412 = vmatmul.f32.vlgmr.msrb.gmra.mxu1 %v3336_v60  ;;  %5790 = vmatmul.msk.f32.vlgmr.msra.gmra.mxu0 %vm3549_vm2, %v3537_v29 }
 0x2b4   :  { %3766 = vmatpush.msrb.mxu1 %v3681_v43 }
 0x2b6   :  { %v3332_v31 = vpop.f32.mrf.mxu3  ;;  %v3534_v30 = vpop.f32.mrf.mxu2  ;;  %3767 = vmatpush.msrb.mxu1 %v3680_v45 }
 0x2b7   :  { %v3333_v32 = vadd.f32 %v3332_v31, %v3319_v48  ;;  %v3535_v35 = vadd.f32 %v6232_v44, %v3534_v30 }
 0x2b8   :  { %3768 = vmatpush.msrb.mxu1 %v3679_v16 }
 0x2b9   :  { %v3338_v55 = vmax.f32 %v3333_v32, 0.0  ;;  %v3538_v38 = vmax.f32 %v3535_v35, 0.0 }
 0x2ba   :  { %3769 = vmatpush.msrb.mxu1 %v3678_v2 }
 0x2bb   :  { %3415 = vmatmul.f32.gmra.mxu1 %v3338_v55  ;;  %5791 = vmatmul.msk.f32.gmra.mxu0 %vm3549_vm2, %v3538_v38 }
 0x2ea   :  { %v9296_v58 = vpop.permute.xlu1 %3684 }
 0x2eb   :  { %5798 = vmatmul.msk.f32.vlgmr.msrb.gmra.mxu0 %vm3686_vm3, %v9296_v58 }
 0x310   :  { %v3390_v57 = vpop.f32.mrf.mxu0 }
 0x311   :  { %v3391_v56 = vadd.f32 %v6233_v59, %v3390_v57 }
 0x318   :  { %v3393_v27 = vpop.f32.mrf.mxu0 }
 0x319   :  { %v3394_v62 = vadd.f32 %v6233_v59, %v3393_v27 }
 0x326   :  { %v3493_v47 = vpop.f32.mrf.mxu3 }
 0x327   :  { %v3494_v50 = vadd.f32 %v6234_v46, %v3493_v47 }
 0x329   :  { %v3499_v37 = vmax.f32 %v3494_v50, 0.0 }
 0x32b   :  { %5792 = vmatmul.msk.f32.vlgmr.msra.gmra.mxu1 %vm3426_vm0, %v3499_v37 }
 0x32e   :  { %v3496_v10 = vpop.f32.mrf.mxu3 }
 0x32f   :  { %v3497_v15 = vadd.f32 %v6234_v46, %v3496_v10 }
 0x330   :  { %v3413_v51 = vpop.f32.mrf.mxu1  ;;  %v3573_v49 = vpop.f32.mrf.mxu0 }
 0x331   :  { %v3414_v34 = vadd.f32 %v3413_v51, %v3391_v56  ;;  %v3500_v1 = vmax.f32 %v3497_v15, 0.0  ;;  %v3574_v4 = vadd.f32 %v6235_v54, %v3573_v49 }
 0x333   :  { %v3419_v61 = vmax.f32 %v3414_v34, 0.0  ;;  %v3579_v5 = vmax.f32 %v3574_v4, 0.0  ;;  %5793 = vmatmul.msk.f32.gmra.mxu1 %vm3426_vm0, %v3500_v1 }
 0x335   :  { %5794 = vmatmul.msk.f32.vlgmr.msrb.gmra.mxu2 %vm3509_vm1, %v3419_v61  ;;  %5796 = vmatmul.msk.f32.vlgmr.msra.gmra.mxu3 %vm3426_vm0, %v3579_v5 }
 0x338   :  { %v3416_v6 = vpop.f32.mrf.mxu1  ;;  %v3576_v63 = vpop.f32.mrf.mxu0 }
 0x339   :  { %v3417_v7 = vadd.f32 %v3416_v6, %v3394_v62  ;;  %v3577_v11 = vadd.f32 %v6235_v54, %v3576_v63 }
 0x33b   :  { %v3420_v8 = vmax.f32 %v3417_v7, 0.0  ;;  %v3580_v12 = vmax.f32 %v3577_v11, 0.0 }
 0x33d   :  { %5795 = vmatmul.msk.f32.gmra.mxu2 %vm3509_vm1, %v3420_v8  ;;  %5797 = vmatmul.msk.f32.gmra.mxu3 %vm3426_vm0, %v3580_v12 }
 0x368   :  { %v3706_v20 = vpop.f32.mrf.mxu0 }
 0x3a8   :  { %v3607_v13 = vpop.f32.mrf.mxu1 }
 0x3b0   :  { %v3610_v43 = vpop.f32.mrf.mxu1 }
 0x3b8   :  { %v3636_v21 = vpop.f32.mrf.mxu2  ;;  %v3666_v39 = vpop.f32.mrf.mxu3 }
 0x3b9   :  { %v3637_v18 = vadd.f32 %v3636_v21, %v3607_v13 }
 0x3bb   :  { %v3672_v14 = vadd.f32 %v3666_v39, %v3637_v18 }
 0x3bd   :  { %v3676_v36 = vadd.f32 %v9318_v19, %v3672_v14 }
 0x3bf   :  { %v3709_v17 = vadd.f32 %v3706_v20, %v3676_v36 }
 0x3c0   :  { %v3639_v13 = vpop.f32.mrf.mxu2  ;;  %v3669_v18 = vpop.f32.mrf.mxu3 }
 0x3c1   :  { %6239 = vtanh.f32 %v3709_v17  ;;  %v3710_v26 = vsub.f32 0.0, %v3709_v17  ;;  %v3640_v21 = vadd.f32 %v3639_v13, %v3610_v43  ;;  %v3962_v13 = vld [vmem:[%s9393_s7 + $0x250] sm:$0xff] }
 0x3c3   :  { %v3711_v23 = vmul.f32 1.442695, %v3710_v26  ;;  %v3673_v39 = vadd.f32 %v3669_v18, %v3640_v21  ;;  %v3961_v21 = vld [vmem:[%s9393_s7 + $0x248] sm:$0xff] }
 0x3c5   :  { %6241 = vpow2.f32 %v3711_v23  ;;  %v3677_v14 = vadd.f32 %v9318_v19, %v3673_v39 }
 0x3c7   :  { %v6240_v22 = vpop.eup %6239 }
 0x3c8   :  { %3733 = vrot.lane.b32.xlu1 %v6240_v22, %s6325_s1 }
 0x3cb   :  { %v6242_v24 = vpop.eup %6241 }
 0x3cc   :  { %v3713_v25 = vadd.f32 1.0, %v6242_v24 }
 0x3ce   :  { %6243 = vrcp.f32 %v3713_v25  ;;  %v3725_v9 = vand.u32 2147483648, %v3713_v25  ;;  %vm3719_vm5 = vweird.f32 %v3713_v25  ;;  %v3723_v53 = vand.u32 2147483647, %v3713_v25 }
 0x3d0   :  { %v3726_v48 = vor.u32 1.1754944e-38, %v3725_v9  ;;  %vm3724_vm7 = vcmp.eq.f32.partialorder %v3723_v53, 8.507059e+37 }
 0x3d4   :  { %v6244_v44 = vpop.eup %6243 }
 0x3d5   :  { %v3715_v52 = vmul.f32 %v6244_v44, %v3713_v25  ;;  %vm3720_vm4 = vweird.f32 %v6244_v44 }
 0x3d6   :  { %vm3721_vm6 = vmor %vm3719_vm5, %vm3720_vm4 }
 0x3d7   :  { %v3716_v33 = vsub.f32 1.0, %v3715_v52 }
 0x3d9   :  { %v3717_v60 = vmul.f32 %v6244_v44, %v3716_v33 }
 0x3db   :  { %v3718_v28 = vadd.f32 %v6244_v44, %v3717_v60 }
 0x3dd   :  { %v3722_v29 = vsel %vm3721_vm6, %v6244_v44, %v3718_v28  ;;  %vm3969_vm6 = vcmask 1043456  }
 0x3de   :  { %v3727_v32 = vsel %vm3724_vm7, %v3726_v48, %v3722_v29  ;;  %vm3966_vm7 = vcmask 31744  }
 0x3df   :  { %v3731_v30 = vmul.f32 %v3727_v32, %v9296_v58 }
 0x43a   :  { %v3734_v31 = vpop.permute.xlu1 %3733 }
 0x43b   :  { %v3736_v55 = vmul.f32 %v3734_v31, %v3727_v32 }
 0x43d   :  { %3738 = vrot.lane.b32.xlu2 %v3736_v55, %s6326_s16 }
 0x497   :  { %v3739_v35 = vpop.permute.xlu2 %3738 }
 0x498   :  { %v3741_v38 = vadd.f32 %v3739_v35, %v3731_v30 }
 0x49a   :  { %6245 = vtanh.f32 %v3741_v38  ;;  %v3799_v4 = vrot.slane %v3741_v38, 4 }
 0x4a0   :  { %v6246_v3 = vpop.eup %6245 }
 0x4a1   :  { %3744 = vrot.lane.b32.xlu2 %v6246_v3, %s6325_s1 }
 0x4fb   :  { %v3745_v40 = vpop.permute.xlu2 %3744 }
 0x4fc   :  { %v9325_v41 = vmul.f32 %v3745_v40, %v3727_v32 }
 0x4fe   :  { %3750 = vrot.lane.b32.xlu0 %v9325_v41, %s6326_s16 }
 0x570   :  { %v3751_v42 = vpop.permute.xlu0 %3750 }
 0x571   :  { %5799 = vmatmul.msk.f32.vlgmr.msrb.gmra.mxu1 %vm3686_vm3, %v3751_v42 }
 0x5ee   :  { %v3771_v45 = vpop.f32.mrf.mxu1 }
 0x5ef   :  { %v3775_v16 = vrot.slane %v3771_v45, 4 }
 0x5f1   :  { %v3777_v2 = vadd.f32 %v3775_v16, %v3676_v36 }
 0x5f3   :  { %6247 = vtanh.f32 %v3777_v2  ;;  %v3778_v57 = vsub.f32 0.0, %v3777_v2 }
 0x5f5   :  { %v3779_v46 = vmul.f32 1.442695, %v3778_v57 }
 0x5f7   :  { %6249 = vpow2.f32 %v3779_v46 }
 0x5f9   :  { %v6248_v58 = vpop.eup %6247 }
 0x5fa   :  { %3803 = vrot.lane.b32.xlu1 %v6248_v58, %s6325_s1 }
 0x5fd   :  { %v6250_v47 = vpop.eup %6249 }
 0x5fe   :  { %v3781_v50 = vadd.f32 1.0, %v6250_v47 }
 0x600   :  { %6251 = vrcp.f32 %v3781_v50  ;;  %v3793_v54 = vand.u32 2147483648, %v3781_v50  ;;  %vm3787_vm9 = vweird.f32 %v3781_v50  ;;  %v3791_v34 = vand.u32 2147483647, %v3781_v50 }
 0x602   :  { %v3794_v15 = vor.u32 1.1754944e-38, %v3793_v54  ;;  %vm3792_vm11 = vcmp.eq.f32.partialorder %v3791_v34, 8.507059e+37 }
 0x606   :  { %v6252_v59 = vpop.eup %6251 }
 0x607   :  { %v3783_v27 = vmul.f32 %v6252_v59, %v3781_v50  ;;  %vm3788_vm8 = vweird.f32 %v6252_v59 }
 0x608   :  { %vm3789_vm10 = vmor %vm3787_vm9, %vm3788_vm8 }
 0x609   :  { %v3784_v37 = vsub.f32 1.0, %v3783_v27 }
 0x60b   :  { %v3785_v56 = vmul.f32 %v6252_v59, %v3784_v37 }
 0x60d   :  { %v3786_v51 = vadd.f32 %v6252_v59, %v3785_v56 }
 0x60f   :  { %v3790_v10 = vsel %vm3789_vm10, %v6252_v59, %v3786_v51 }
 0x610   :  { %v3795_v49 = vsel %vm3792_vm11, %v3794_v15, %v3790_v10 }
 0x611   :  { %v3801_v5 = vmul.f32 %v3799_v4, %v3795_v49 }
 0x66c   :  { %v3804_v61 = vpop.permute.xlu1 %3803 }
 0x66d   :  { %v3806_v1 = vmul.f32 %v3804_v61, %v3795_v49 }
 0x66f   :  { %3808 = vrot.lane.b32.xlu2 %v3806_v1, %s6326_s16 }
 0x6c9   :  { %v3809_v62 = vpop.permute.xlu2 %3808 }
 0x6ca   :  { %v3811_v6 = vadd.f32 %v3809_v62, %v3801_v5 }
 0x6cc   :  { %6253 = vtanh.f32 %v3811_v6  ;;  %v3868_v32 = vrot.slane %v3811_v6, 4 }
 0x6d2   :  { %v6254_v7 = vpop.eup %6253 }
 0x6d3   :  { %3814 = vrot.lane.b32.xlu0 %v6254_v7, %s6325_s1 }
 0x745   :  { %v3815_v8 = vpop.permute.xlu0 %3814 }
 0x746   :  { %v3817_v63 = vmul.f32 %v3815_v8, %v3795_v49  ;;  %v4018_v8 = vld [vmem:[%s9393_s7 + $0x270] sm:$0xf] }
 0x747   :  { %5805 = vmatpush.msk.msrb.mxu2 %vm3969_vm6, %v4018_v8 }
 0x748   :  { %v3819_v11 = vrot.slane %v3817_v63, 4  ;;  %v3965_v63 = vld [vmem:[%s9393_s7 + $0x268] sm:$0xf] }
 0x749   :  { %5802 = vmatpush.msk.msra.mxu0 %vm3969_vm6, %v3965_v63 }
 0x74a   :  { %3822 = vrot.lane.b32.xlu1 %v3819_v11, %s6326_s16  ;;  %v3821_v40 = vadd.f32 %v3819_v11, %v9325_v41  ;;  %v3964_v11 = vld [vmem:[%s9393_s7 + $0x260] sm:$0xff]  ;;  %5803 = vmatmul.msk.f32.vlgmr.msra.gmra.mxu0 %vm3966_vm7, %v9263_v0 }
 0x74b   :  { %4010 = vmatpush.msra.mxu1 %v3964_v11 }
 0x7bc   :  { %v3823_v12 = vpop.permute.xlu1 %3822 }
 0x7bd   :  { %5800 = vmatmul.msk.f32.vlgmr.msra.gmra.mxu2 %vm3686_vm3, %v3823_v12  ;;  %v3963_v12 = vld [vmem:[%s9393_s7 + $0x258] sm:$0xff] }
 0x7be   :  { %4011 = vmatpush.msra.mxu1 %v3963_v12 }
 0x7c0   :  { %4012 = vmatpush.msra.mxu1 %v3962_v13 }
 0x7c2   :  { %4013 = vmatpush.msra.mxu1 %v3961_v21 }
 0x840   :  { %v3843_v20 = vpop.f32.mrf.mxu2 }
 0x841   :  { %v3846_v36 = vadd.f32 %v3843_v20, %v3677_v14 }
 0x843   :  { %6255 = vtanh.f32 %v3846_v36  ;;  %v3847_v22 = vsub.f32 0.0, %v3846_v36 }
 0x845   :  { %v3848_v26 = vmul.f32 1.442695, %v3847_v22  ;;  %v4051_v22 = vld [vmem:[%s9393_s7 + $0x280] sm:$0xff] }
 0x847   :  { %6257 = vpow2.f32 %v3848_v26  ;;  %v3990_v26 = vpop.f32.mrf.mxu0 }
 0x849   :  { %v6256_v17 = vpop.eup %6255 }
 0x84a   :  { %3872 = vrot.lane.b32.xlu2 %v6256_v17, %s6325_s1  ;;  %v4052_v17 = vld [vmem:[%s9393_s7 + $0x288] sm:$0xff] }
 0x84b   :  { %4072 = vmatpush.msra.mxu3 %v4052_v17 }
 0x84d   :  { %v6258_v23 = vpop.eup %6257  ;;  %4073 = vmatpush.msra.mxu3 %v4051_v22 }
 0x84e   :  { %v3850_v24 = vadd.f32 1.0, %v6258_v23 }
 0x850   :  { %6259 = vrcp.f32 %v3850_v24  ;;  %v3862_v28 = vand.u32 2147483648, %v3850_v24  ;;  %vm3856_vm13 = vweird.f32 %v3850_v24  ;;  %v3860_v19 = vand.u32 2147483647, %v3850_v24 }
 0x852   :  { %v3863_v53 = vor.u32 1.1754944e-38, %v3862_v28  ;;  %vm3861_vm15 = vcmp.eq.f32.partialorder %v3860_v19, 8.507059e+37  ;;  %v6238_v28 = vld [vmem:[%s9393_s7 + $0x290] ss:$0 sm:$0xff] }
 0x856   :  { %v6260_v25 = vpop.eup %6259 }
 0x857   :  { %v3852_v44 = vmul.f32 %v6260_v25, %v3850_v24  ;;  %vm3857_vm12 = vweird.f32 %v6260_v25 }
 0x858   :  { %vm3858_vm14 = vmor %vm3856_vm13, %vm3857_vm12 }
 0x859   :  { %v3853_v52 = vsub.f32 1.0, %v3852_v44  ;;  %v6237_v44 = vld [vmem:[%s9393_s7 + $0x278] ss:$0 sm:$0xff] }
 0x85b   :  { %v3854_v33 = vmul.f32 %v6260_v25, %v3853_v52 }
 0x85d   :  { %v3855_v60 = vadd.f32 %v6260_v25, %v3854_v33 }
 0x85f   :  { %v3859_v9 = vsel %vm3858_vm14, %v6260_v25, %v3855_v60 }
 0x860   :  { %v3864_v48 = vsel %vm3861_vm15, %v3863_v53, %v3859_v9 }
 0x861   :  { %v3870_v55 = vmul.f32 %v3868_v32, %v3864_v48 }
 0x8a4   :  { %v3873_v29 = vpop.permute.xlu2 %3872 }
 0x8a5   :  { %v3875_v31 = vmul.f32 %v3873_v29, %v3864_v48 }
 0x8a7   :  { %3877 = vrot.lane.b32.xlu0 %v3875_v31, %s6326_s16 }
 0x919   :  { %v3878_v30 = vpop.permute.xlu0 %3877 }
 0x91a   :  { %v3880_v35 = vadd.f32 %v3878_v30, %v3870_v55 }
 0x91c   :  { %6261 = vtanh.f32 %v3880_v35  ;;  %v3938_v4 = vrot.slane %v3880_v35, 4 }
 0x922   :  { %v6262_v38 = vpop.eup %6261 }
 0x923   :  { %3883 = vrot.lane.b32.xlu1 %v6262_v38, %s6325_s1 }
 0x995   :  { %v3884_v3 = vpop.permute.xlu1 %3883 }
 0x996   :  { %v3886_v42 = vmul.f32 %v3884_v3, %v3864_v48 }
 0x998   :  { %v3887_v43 = vadd.f32 %v3886_v42, %v3821_v40  ;;  %3889 = vrot.lane.b32.xlu2 %v3886_v42, %s6326_s16 }
 0x9f2   :  { %v3890_v45 = vpop.permute.xlu2 %3889 }
 0x9f3   :  { %5801 = vmatmul.msk.f32.vlgmr.msrb.gmra.mxu3 %vm3686_vm3, %v3890_v45 }
 0xa76   :  { %v3910_v16 = vpop.f32.mrf.mxu3 }
 0xa77   :  { %v3914_v2 = vrot.slane %v3910_v16, 4 }
 0xa79   :  { %v3916_v58 = vadd.f32 %v3914_v2, %v3677_v14 }
 0xa7b   :  { %6263 = vtanh.f32 %v3916_v58  ;;  %v3917_v46 = vsub.f32 0.0, %v3916_v58 }
 0xa7d   :  { %v3918_v47 = vmul.f32 1.442695, %v3917_v46 }
 0xa7f   :  { %6265 = vpow2.f32 %v3918_v47 }
 0xa81   :  { %v6264_v57 = vpop.eup %6263 }
 0xa82   :  { %3942 = vrot.lane.b32.xlu0 %v6264_v57, %s6325_s1 }
 0xa85   :  { %v6266_v50 = vpop.eup %6265 }
 0xa86   :  { %v3920_v59 = vadd.f32 1.0, %v6266_v50 }
 0xa88   :  { %6267 = vrcp.f32 %v3920_v59  ;;  %v3932_v54 = vand.u32 2147483648, %v3920_v59  ;;  %vm3926_vm2 = vweird.f32 %v3920_v59  ;;  %v3930_v34 = vand.u32 2147483647, %v3920_v59 }
 0xa8a   :  { %v3933_v15 = vor.u32 1.1754944e-38, %v3932_v54  ;;  %vm3931_vm5 = vcmp.eq.f32.partialorder %v3930_v34, 8.507059e+37  ;;  %4019 = vrot.lane.b32.xlu0 %v9263_v0, %s6327_s2 }
 0xa8e   :  { %v6268_v41 = vpop.eup %6267 }
 0xa8f   :  { %v3922_v27 = vmul.f32 %v6268_v41, %v3920_v59  ;;  %vm3927_vm0 = vweird.f32 %v6268_v41 }
 0xa90   :  { %vm3928_vm4 = vmor %vm3926_vm2, %vm3927_vm0 }
 0xa91   :  { %v3923_v37 = vsub.f32 1.0, %v3922_v27 }
 0xa93   :  { %v3924_v56 = vmul.f32 %v6268_v41, %v3923_v37 }
 0xa95   :  { %v3925_v51 = vadd.f32 %v6268_v41, %v3924_v56 }
 0xa97   :  { %v3929_v10 = vsel %vm3928_vm4, %v6268_v41, %v3925_v51 }
 0xa98   :  { %v3934_v49 = vsel %vm3931_vm5, %v3933_v15, %v3929_v10 }
 0xa99   :  { %v3940_v5 = vmul.f32 %v3938_v4, %v3934_v49 }
 0xaf4   :  { %v3943_v61 = vpop.permute.xlu0 %3942 }
 0xaf5   :  { %v3945_v1 = vmul.f32 %v3943_v61, %v3934_v49 }
 0xaf7   :  { %3947 = vrot.lane.b32.xlu1 %v3945_v1, %s6326_s16 }
 0xafc   :  { %v4020_v18 = vpop.permute.xlu0 %4019 }
 0xafd   :  { %5806 = vmatmul.msk.f32.vlgmr.msrb.gmra.mxu2 %vm3966_vm7, %v4020_v18 }
 0xb69   :  { %v3948_v62 = vpop.permute.xlu1 %3947 }
 0xb6a   :  { %v3950_v6 = vadd.f32 %v3948_v62, %v3940_v5 }
 0xb6c   :  { %6269 = vtanh.f32 %v3950_v6 }
 0xb72   :  { %v6270_v7 = vpop.eup %6269 }
 0xb73   :  { %3953 = vrot.lane.b32.xlu2 %v6270_v7, %s6325_s1  ;;  %s6329_s1 = smov [#allocation4]  }
 0xb80   :  { %v4043_v24 = vpop.f32.mrf.mxu2 }
 0xbcd   :  { %v3954_v39 = vpop.permute.xlu2 %3953 }
 0xbce   :  { %v3956_v14 = vmul.f32 %v3954_v39, %v3934_v49 }
 0xbd0   :  { %v3958_v20 = vrot.slane %v3956_v14, 4 }
 0xbd2   :  { %v3960_v36 = vadd.f32 %v3958_v20, %v3887_v43 }
 0xbd4   :  { %3994 = vrot.lane.b32.xlu1 %v3960_v36, %s6326_s16  ;;  %s4102_s16 = sshll.u32 %s6329_s1, 4  ;;  %s4103_s16 = int_to_ptr.vmem [resolvable:$true] %s4102_s16 }
 0xc46   :  { %v3995_v0 = vpop.permute.xlu1 %3994 }
 0xc47   :  { %5804 = vmatmul.msk.f32.vlgmr.msra.gmra.mxu1 %vm3686_vm3, %v3995_v0  ;;  %vm4078_vm3 = vcmask 125952  }
 0xcc4   :  { %v4015_v23 = vpop.f32.mrf.mxu1 }
 0xcc5   :  { %v4016_v25 = vadd.f32 %v4015_v23, %v3990_v26 }
 0xcc7   :  { %v4046_v52 = vadd.f32 %v4043_v24, %v4016_v25 }
 0xcc9   :  { %v4049_v33 = vadd.f32 %v6237_v44, %v4046_v52 }
 0xccb   :  { %v4050_v60 = vmax.f32 %v4049_v33, 0.0 }
 0xccd   :  { %5807 = vmatmul.msk.f32.vlgmr.msra.gmra.mxu3 %vm3509_vm1, %v4050_v60  ;;  %vm4084_vm1 = vcmask 123904  }
 0xd50   :  { %v4075_v19 = vpop.f32.mrf.mxu3 }
 0xd51   :  { %v4076_v9 = vadd.f32 %v6238_v28, %v4075_v19 }
 0xd53   :  { %v4081_v53 = vrot.slane %v4076_v9, 2  ;;  %4079 = vst.msk [vmem:[#allocation2] sm:$0xf] %vm4078_vm3, %v4076_v9 }
 0xd54   :  { %4096 = dma.vmem_to_hbm [thread:$0]  %s4092_s12, 64, %s4094_s15, [#allocation3]  }
 0xd55   :  { %v4083_v29 = vadd.f32 %v4081_v53, %v4076_v9 }
 0xd57   :  { %4085 = vst.msk [vmem:[#allocation4] sm:$0x3] %vm4084_vm1, %v4083_v29 }
 0xd58   :  { %4107 = dma.vmem_to_hbm [thread:$0]  %s4103_s16, 32, %s4105_s17, [#allocation5]  }
 0xd59   :  { %6320 = dma.done.wait [#allocation3], 64  }
 0xd5a   :  { %6321 = vsyncadd [#allocation3], 4294967232 }
 0xd5b   :  { %6322 = dma.done.wait [#allocation5], 32  }
 0xd5c   :  { %6323 = vsyncadd [#allocation5], 4294967264 }
 0xd5d   :  { %4116 = vsyncpa [#allocation3], 1 }
 0xd5e   :  { %4117 = vsyncpa [#allocation5], 1 }

</bundles_post_ra>
